<compile_context>
chip_gen: v7x
topology: tpu7x:2x2x1
jax: 0.10.0
libtpu: 0.0.40
codegen_flags: <defaults>
</compile_context>

<pallas_src>
import math
from functools import partial

import jax
import jax.numpy as jnp
from jax import lax
from jax.experimental import pallas as pl
from jax.experimental.pallas import tpu as pltpu


# ---------------------------------------------------------------------------
# Kernel 1: fused QKV projection.
#   x block:   (1, s_block, E)        bf16
#   w block:   (E, 3*H*D)             bf16 (constant; Q columns pre-scaled)
#   out block: (1, s_block, 3*H*D)    bf16 (lane-dense)
# ---------------------------------------------------------------------------
def _qkv_proj_kernel(x_ref, w_ref, qkv_ref):
    qkv_ref[0] = jnp.dot(x_ref[0], w_ref[...],
                         preferred_element_type=jnp.float32).astype(qkv_ref.dtype)


# ---------------------------------------------------------------------------
# Kernel 2: flash attention (online softmax).  grid = (B, H, n_q, n_kv).
# Q/K/V tiles come straight from the fused QKV slab (block indices along the
# 3*H*D axis); output goes to a (B, S, H*D) slab at block index (b, qi, h).
# ---------------------------------------------------------------------------
def _flash_attn_kernel(q_ref, k_ref, v_ref, o_ref, m_sc, l_sc, acc_sc,
                       *, kv_block, seq_len, masked):
    ki = pl.program_id(3)

    @pl.when(ki == 0)
    def _():
        m_sc[...] = jnp.full(m_sc.shape, -jnp.inf, dtype=m_sc.dtype)
        l_sc[...] = jnp.zeros_like(l_sc)
        acc_sc[...] = jnp.zeros_like(acc_sc)

    q = q_ref[0]                                                   # (tq, D)  bf16 (pre-scaled)
    k = k_ref[0]                                                   # (tkv, D) bf16
    v = v_ref[0]                                                   # (tkv, D) bf16

    # scores (tq, tkv): contract over D, no explicit transpose of K.
    s = lax.dot_general(q, k, (((1,), (1,)), ((), ())),
                        preferred_element_type=jnp.float32)

    if masked:
        # Padded key columns (>= seq_len) must not contribute to the softmax.
        col = ki * kv_block + lax.broadcasted_iota(jnp.int32, s.shape, 1)
        s = jnp.where(col < seq_len, s, -1e30)

    m_prev = m_sc[...]
    m_new = jnp.maximum(m_prev, jnp.max(s, axis=-1, keepdims=True))
    alpha = jnp.exp(m_prev - m_new)                                # computed once, reused twice
    p = jnp.exp(s - m_new)

    l_sc[...] = alpha * l_sc[...] + jnp.sum(p, axis=-1, keepdims=True)
    acc_sc[...] = alpha * acc_sc[...] + jnp.dot(p.astype(v.dtype), v,
                                                preferred_element_type=jnp.float32)
    m_sc[...] = m_new

    @pl.when(ki == pl.num_programs(3) - 1)
    def _():
        # approx reciprocal on the EUP (adds small approximation error on top of
        # the bf16 output cast; acceptable at the tolerances used below).
        inv_l = pl.reciprocal(l_sc[...], approx=True)
        o_ref[0] = (acc_sc[...] * inv_l).astype(o_ref.dtype)


# ---------------------------------------------------------------------------
# Kernel 3: output projection (+ bias).  One K = H*D matmul per (b, si) step,
# no heads reduction, no accumulator scratch.
# ---------------------------------------------------------------------------
def _out_proj_kernel(a_ref, w_ref, b_ref, o_ref):
    y = jnp.dot(a_ref[0], w_ref[...], preferred_element_type=jnp.float32)
    o_ref[0] = (y + b_ref[...].astype(jnp.float32)).astype(o_ref.dtype)


# ---------------------------------------------------------------------------
# Wrapper
# ---------------------------------------------------------------------------
def _round_up(x, m):
    return ((x + m - 1) // m) * m


def _pick_tile(seq_len, cap):
    """Largest power-of-two multiple of 128 that is <= cap and <= seq_len
    (falls back to 128 for short sequences; padding handles the remainder)."""
    t = 128
    while t < cap and t * 2 <= seq_len:
        t *= 2
    return t


def multi_head_attention(x, w_qkv, w_proj, b_proj, *, heads, head_dim):
    """x: (B, S, E); w_qkv: (E, 3*H*D); w_proj: (H*D, E); b_proj: (1, E)."""
    B, S, E = x.shape
    inner = heads * head_dim
    assert w_qkv.shape == (E, 3 * inner)
    assert w_proj.shape == (inner, E)
    assert b_proj.shape == (1, E)
    assert head_dim % 128 == 0, "head_dim must be a multiple of 128 for this layout"
    scale = 1.0 / math.sqrt(head_dim)

    # ----- tiling: big tiles to fill the 256-wide MXU and amortize step cost -----
    q_block = _pick_tile(S, 256)
    kv_block = _pick_tile(S, 512)          # kv_block >= q_block by construction
    s_block = q_block
    S_pad = _round_up(S, kv_block)         # multiple of both q_block and kv_block
    n_s = S_pad // s_block
    n_q = S_pad // q_block
    n_kv = S_pad // kv_block
    needs_mask = (S_pad != S)

    vmem_cap = 32 * 1024 * 1024            # safe on v7x (64 MiB physical)

    # --- one-time host-side weight prep (bf16 MXU operands, scale folded in) ---
    # Fold the softmax scale into the Q columns (first `inner` columns) only.
    col_scale = jnp.concatenate([
        jnp.full((inner,), scale, dtype=w_qkv.dtype),
        jnp.ones((2 * inner,), dtype=w_qkv.dtype)])
    w_qkv_bf = (w_qkv * col_scale[None, :]).astype(jnp.bfloat16)   # (E, 3*inner)
    w_proj_bf = w_proj.astype(jnp.bfloat16)                        # (inner, E)
    x_bf = x.astype(jnp.bfloat16)
    if needs_mask:
        x_bf = jnp.pad(x_bf, ((0, 0), (0, S_pad - S), (0, 0)))

    # ---------------- 1) fused QKV projection ----------------
    qkv = pl.pallas_call(
        _qkv_proj_kernel,
        out_shape=jax.ShapeDtypeStruct((B, S_pad, 3 * inner), jnp.bfloat16),
        grid_spec=pltpu.PrefetchScalarGridSpec(
            num_scalar_prefetch=0,
            grid=(B, n_s),
            in_specs=[
                pl.BlockSpec((1, s_block, E), lambda b, si: (b, si, 0)),
                pl.BlockSpec((E, 3 * inner), lambda b, si: (0, 0)),
            ],
            out_specs=pl.BlockSpec((1, s_block, 3 * inner), lambda b, si: (b, si, 0)),
        ),
        compiler_params=pltpu.CompilerParams(
            dimension_semantics=("parallel", "parallel"),
            vmem_limit_bytes=vmem_cap),
        cost_estimate=pl.CostEstimate(
            flops=2 * B * S_pad * E * 3 * inner,
            transcendentals=0,
            bytes_accessed=2 * (B * S_pad * E + E * 3 * inner + B * S_pad * 3 * inner)),
    )(x_bf, w_qkv_bf)

    # ---------------- 2) flash attention ----------------
    flash_kernel = partial(_flash_attn_kernel,
                           kv_block=kv_block, seq_len=S, masked=needs_mask)
    attn_out = pl.pallas_call(
        flash_kernel,
        out_shape=jax.ShapeDtypeStruct((B, S_pad, inner), jnp.bfloat16),
        grid_spec=pltpu.PrefetchScalarGridSpec(
            num_scalar_prefetch=0,
            grid=(B, heads, n_q, n_kv),
            in_specs=[
                # Q head h  -> block h           along the 3*H*D axis
                pl.BlockSpec((1, q_block, head_dim),
                             lambda b, h, qi, ki: (b, qi, h)),
                # K head h  -> block heads + h
                pl.BlockSpec((1, kv_block, head_dim),
                             lambda b, h, qi, ki, H=heads: (b, ki, H + h)),
                # V head h  -> block 2*heads + h
                pl.BlockSpec((1, kv_block, head_dim),
                             lambda b, h, qi, ki, H=heads: (b, ki, 2 * H + h)),
            ],
            out_specs=pl.BlockSpec((1, q_block, head_dim),
                                   lambda b, h, qi, ki: (b, qi, h)),
            scratch_shapes=[
                pltpu.VMEM((q_block, 1), jnp.float32),          # running max m
                pltpu.VMEM((q_block, 1), jnp.float32),          # running denom l
                pltpu.VMEM((q_block, head_dim), jnp.float32),   # output accumulator
            ],
        ),
        compiler_params=pltpu.CompilerParams(
            dimension_semantics=("parallel", "parallel", "parallel", "arbitrary"),
            vmem_limit_bytes=vmem_cap),
        cost_estimate=pl.CostEstimate(
            flops=4 * B * heads * S_pad * S_pad * head_dim,
            transcendentals=B * heads * S_pad * S_pad,
            bytes_accessed=2 * 4 * B * S_pad * inner),
    )(qkv, qkv, qkv)

    # ---------------- 3) output projection (+ bias) ----------------
    out_pad = pl.pallas_call(
        _out_proj_kernel,
        out_shape=jax.ShapeDtypeStruct((B, S_pad, E), x.dtype),
        grid_spec=pltpu.PrefetchScalarGridSpec(
            num_scalar_prefetch=0,
            grid=(B, n_s),
            in_specs=[
                pl.BlockSpec((1, s_block, inner), lambda b, si: (b, si, 0)),
                pl.BlockSpec((inner, E), lambda b, si: (0, 0)),
                pl.BlockSpec((1, E), lambda b, si: (0, 0)),
            ],
            out_specs=pl.BlockSpec((1, s_block, E), lambda b, si: (b, si, 0)),
        ),
        compiler_params=pltpu.CompilerParams(
            dimension_semantics=("parallel", "parallel"),
            vmem_limit_bytes=vmem_cap),
        cost_estimate=pl.CostEstimate(
            flops=2 * B * S_pad * inner * E,
            transcendentals=0,
            bytes_accessed=2 * (B * S_pad * inner + inner * E) + 4 * B * S_pad * E),
    )(attn_out, w_proj_bf, b_proj)

    return out_pad[:, :S, :] if needs_mask else out_pad


# ---------------------------------------------------------------------------
# Pure-JAX f32 reference (mirrors the PyTorch module's forward).
# ---------------------------------------------------------------------------
def _reference(x, w_qkv, w_proj, b_proj, *, heads, head_dim):
    B, S, E = x.shape
    inner = heads * head_dim
    scale = 1.0 / math.sqrt(head_dim)
    qkv = jnp.einsum('bse,ef->bsf', x, w_qkv)
    q, k, v = jnp.split(qkv, 3, axis=-1)

    def to_heads(t):
        return t.reshape(B, S, heads, head_dim).transpose(0, 2, 1, 3)

    q, k, v = map(to_heads, (q, k, v))
    dots = jnp.einsum('bhsd,bhtd->bhst', q, k) * scale
    attn = jax.nn.softmax(dots, axis=-1)
    out = jnp.einsum('bhst,bhtd->bhsd', attn, v)
    out = out.transpose(0, 2, 1, 3).reshape(B, S, inner)
    return jnp.einsum('bsi,ie->bse', out, w_proj) + b_proj[0]


if __name__ == "__main__":
    # Small, TPU-tile-aligned shapes consistent with the module's forward.
    batch, seq, embedding_dim = 2, 256, 128
    heads, head_dim = 2, 128
    inner = heads * head_dim

    key = jax.random.PRNGKey(0)
    kx, kw1, kw2, kb = jax.random.split(key, 4)

    x = jax.random.normal(kx, (batch, seq, embedding_dim), dtype=jnp.float32)
    w_qkv = jax.random.normal(kw1, (embedding_dim, 3 * inner), dtype=jnp.float32) * 0.05
    w_proj = jax.random.normal(kw2, (inner, embedding_dim), dtype=jnp.float32) * 0.05
    b_proj = jax.random.normal(kb, (1, embedding_dim), dtype=jnp.float32) * 0.05

    mha = jax.jit(partial(multi_head_attention, heads=heads, head_dim=head_dim))
    out = jax.block_until_ready(mha(x, w_qkv, w_proj, b_proj))

    ref = _reference(x, w_qkv, w_proj, b_proj, heads=heads, head_dim=head_dim)
    assert out.shape == (batch, seq, embedding_dim)
    max_err = float(jnp.max(jnp.abs(out - ref)))
    # bf16 MXU operands with f32 accumulation -> relaxed tolerance vs f32 reference.
    assert jnp.allclose(out, ref, atol=2e-2, rtol=2e-2), f"mismatch vs reference (max abs err {max_err})"

    print("KERNEL_OK")
</pallas_src>

<mosaic_0001>
module attributes {stable_mosaic.version = 11 : i64} {
  func.func @_flash_attn_kernel(%arg0: i32, %arg1: i32, %arg2: i32, %arg3: i32, %arg4: memref<1x256x128xbf16, #tpu.memory_space<vmem>>, %arg5: memref<1x256x128xbf16, #tpu.memory_space<vmem>>, %arg6: memref<1x256x128xbf16, #tpu.memory_space<vmem>>, %arg7: memref<1x256x128xbf16, #tpu.memory_space<vmem>>, %arg8: memref<256x1xf32, #tpu.memory_space<vmem>>, %arg9: memref<256x1xf32, #tpu.memory_space<vmem>>, %arg10: memref<256x128xf32, #tpu.memory_space<vmem>>) attributes {dimension_semantics = [#tpu.dimension_semantics<parallel>, #tpu.dimension_semantics<parallel>, #tpu.dimension_semantics<parallel>, #tpu.dimension_semantics<arbitrary>], iteration_bounds = array<i64: 2, 2, 1, 1>, scalar_prefetch = 0 : i64, scratch_operands = 3 : i64, tpu.core_type = #tpu.core_type<tc>, window_params = [{transform_indices = @transform_0, window_bounds = array<i64: 1, 256, 128>}, {transform_indices = @transform_1, window_bounds = array<i64: 1, 256, 128>}, {transform_indices = @transform_2, window_bounds = array<i64: 1, 256, 128>}, {transform_indices = @transform_3, window_bounds = array<i64: 1, 256, 128>}]} {
    %c0_i32 = arith.constant 0 : i32
    %0 = arith.cmpi eq, %arg3, %c0_i32 : i32
    %1 = arith.extui %0 : i1 to i32
    %c0_i32_0 = arith.constant 0 : i32
    %2 = arith.cmpi ne, %1, %c0_i32_0 : i32
    scf.if %2 {
      %cst_26 = arith.constant 0xFF800000 : f32
      %36 = vector.broadcast %cst_26 : f32 to vector<256x1xf32>
      %c0_27 = arith.constant 0 : index
      %c0_28 = arith.constant 0 : index
      %37 = vector.load %arg8[%c0_27, %c0_28] : memref<256x1xf32, #tpu.memory_space<vmem>>, vector<256x1xf32>
      tpu.vector_store %arg8[%c0_27, %c0_28], %36 {strides = array<i32>} : memref<256x1xf32, #tpu.memory_space<vmem>>, vector<256x1xf32>,
      %cst_29 = arith.constant 0.000000e+00 : f32
      %38 = vector.broadcast %cst_29 : f32 to vector<256x1xf32>
      %c0_30 = arith.constant 0 : index
      %c0_31 = arith.constant 0 : index
      %39 = vector.load %arg9[%c0_30, %c0_31] : memref<256x1xf32, #tpu.memory_space<vmem>>, vector<256x1xf32>
      tpu.vector_store %arg9[%c0_30, %c0_31], %38 {strides = array<i32>} : memref<256x1xf32, #tpu.memory_space<vmem>>, vector<256x1xf32>,
      %cst_32 = arith.constant 0.000000e+00 : f32
      %40 = vector.broadcast %cst_32 : f32 to vector<256x128xf32>
      %c0_33 = arith.constant 0 : index
      %c0_34 = arith.constant 0 : index
      %41 = vector.load %arg10[%c0_33, %c0_34] : memref<256x128xf32, #tpu.memory_space<vmem>>, vector<256x128xf32>
      tpu.vector_store %arg10[%c0_33, %c0_34], %40 {strides = array<i32>} : memref<256x128xf32, #tpu.memory_space<vmem>>, vector<256x128xf32>,
    } else {
    }
    %c0 = arith.constant 0 : index
    %c0_1 = arith.constant 0 : index
    %c0_2 = arith.constant 0 : index
    %3 = vector.load %arg4[%c0, %c0_1, %c0_2] : memref<1x256x128xbf16, #tpu.memory_space<vmem>>, vector<1x256x128xbf16>
    %4 = vector.shape_cast %3 : vector<1x256x128xbf16> to vector<256x128xbf16>
    %c0_3 = arith.constant 0 : index
    %c0_4 = arith.constant 0 : index
    %c0_5 = arith.constant 0 : index
    %5 = vector.load %arg5[%c0_3, %c0_4, %c0_5] : memref<1x256x128xbf16, #tpu.memory_space<vmem>>, vector<1x256x128xbf16>
    %6 = vector.shape_cast %5 : vector<1x256x128xbf16> to vector<256x128xbf16>
    %c0_6 = arith.constant 0 : index
    %c0_7 = arith.constant 0 : index
    %c0_8 = arith.constant 0 : index
    %7 = vector.load %arg6[%c0_6, %c0_7, %c0_8] : memref<1x256x128xbf16, #tpu.memory_space<vmem>>, vector<1x256x128xbf16>
    %8 = vector.shape_cast %7 : vector<1x256x128xbf16> to vector<256x128xbf16>
    %cst = arith.constant dense<0.000000e+00> : vector<256x256xf32>
    %9 = tpu.matmul %4, %6, %cst {dimension_numbers = #tpu.dot_dimension_numbers<[1], [1], [0], [0], [0, 0, 1, 0], [], []>} : vector<256x128xbf16>, vector<256x128xbf16>, vector<256x256xf32> -> vector<256x256xf32>
    %c0_9 = arith.constant 0 : index
    %c0_10 = arith.constant 0 : index
    %10 = vector.load %arg8[%c0_9, %c0_10] : memref<256x1xf32, #tpu.memory_space<vmem>>, vector<256x1xf32>
    %cst_11 = arith.constant dense<0xFF800000> : vector<256xf32>
    %11 = vector.multi_reduction <maximumf>, %9, %cst_11 [1] : vector<256x256xf32> to vector<256xf32>
    %12 = vector.shape_cast %11 : vector<256xf32> to vector<256x1xf32>
    %13 = arith.maximumf %10, %12 : vector<256x1xf32>
    %14 = arith.subf %10, %13 : vector<256x1xf32>
    %15 = math.exp %14 : vector<256x1xf32>
    %16 = vector.broadcast %13 : vector<256x1xf32> to vector<256x256xf32>
    %17 = arith.subf %9, %16 : vector<256x256xf32>
    %18 = math.exp %17 : vector<256x256xf32>
    %c0_12 = arith.constant 0 : index
    %c0_13 = arith.constant 0 : index
    %19 = vector.load %arg9[%c0_12, %c0_13] : memref<256x1xf32, #tpu.memory_space<vmem>>, vector<256x1xf32>
    %20 = arith.mulf %15, %19 : vector<256x1xf32>
    %cst_14 = arith.constant dense<0.000000e+00> : vector<256xf32>
    %21 = vector.multi_reduction <add>, %18, %cst_14 [1] : vector<256x256xf32> to vector<256xf32>
    %22 = vector.shape_cast %21 : vector<256xf32> to vector<256x1xf32>
    %23 = arith.addf %20, %22 : vector<256x1xf32>
    %c0_15 = arith.constant 0 : index
    %c0_16 = arith.constant 0 : index
    %24 = vector.load %arg9[%c0_15, %c0_16] : memref<256x1xf32, #tpu.memory_space<vmem>>, vector<256x1xf32>
    tpu.vector_store %arg9[%c0_15, %c0_16], %23 {strides = array<i32>} : memref<256x1xf32, #tpu.memory_space<vmem>>, vector<256x1xf32>,
    %c0_17 = arith.constant 0 : index
    %c0_18 = arith.constant 0 : index
    %25 = vector.load %arg10[%c0_17, %c0_18] : memref<256x128xf32, #tpu.memory_space<vmem>>, vector<256x128xf32>
    %26 = vector.broadcast %15 : vector<256x1xf32> to vector<256x128xf32>
    %27 = arith.mulf %26, %25 : vector<256x128xf32>
    %28 = arith.truncf %18 : vector<256x256xf32> to vector<256x256xbf16>
    %cst_19 = arith.constant dense<0.000000e+00> : vector<256x128xf32>
    %29 = tpu.matmul %28, %8, %cst_19 {dimension_numbers = #tpu.dot_dimension_numbers<[1], [0], [0], [1], [0, 0, 1, 1], [], []>} : vector<256x256xbf16>, vector<256x128xbf16>, vector<256x128xf32> -> vector<256x128xf32>
    %30 = arith.addf %27, %29 : vector<256x128xf32>
    %c0_20 = arith.constant 0 : index
    %c0_21 = arith.constant 0 : index
    %31 = vector.load %arg10[%c0_20, %c0_21] : memref<256x128xf32, #tpu.memory_space<vmem>>, vector<256x128xf32>
    tpu.vector_store %arg10[%c0_20, %c0_21], %30 {strides = array<i32>} : memref<256x128xf32, #tpu.memory_space<vmem>>, vector<256x128xf32>,
    %c0_22 = arith.constant 0 : index
    %c0_23 = arith.constant 0 : index
    %32 = vector.load %arg8[%c0_22, %c0_23] : memref<256x1xf32, #tpu.memory_space<vmem>>, vector<256x1xf32>
    tpu.vector_store %arg8[%c0_22, %c0_23], %13 {strides = array<i32>} : memref<256x1xf32, #tpu.memory_space<vmem>>, vector<256x1xf32>,
    %c0_i32_24 = arith.constant 0 : i32
    %33 = arith.cmpi eq, %arg3, %c0_i32_24 : i32
    %34 = arith.extui %33 : i1 to i32
    %c0_i32_25 = arith.constant 0 : i32
    %35 = arith.cmpi ne, %34, %c0_i32_25 : i32
    scf.if %35 {
      %c0_26 = arith.constant 0 : index
      %c0_27 = arith.constant 0 : index
      %36 = vector.load %arg9[%c0_26, %c0_27] : memref<256x1xf32, #tpu.memory_space<vmem>>, vector<256x1xf32>
      %37 = tpu.reciprocal %36 {approx = true} : vector<256x1xf32> -> vector<256x1xf32>
      %c0_28 = arith.constant 0 : index
      %c0_29 = arith.constant 0 : index
      %38 = vector.load %arg10[%c0_28, %c0_29] : memref<256x128xf32, #tpu.memory_space<vmem>>, vector<256x128xf32>
      %39 = vector.broadcast %37 : vector<256x1xf32> to vector<256x128xf32>
      %40 = arith.mulf %38, %39 : vector<256x128xf32>
      %41 = arith.truncf %40 : vector<256x128xf32> to vector<256x128xbf16>
      %c0_30 = arith.constant 0 : index
      %c0_31 = arith.constant 0 : index
      %c0_32 = arith.constant 0 : index
      %42 = vector.load %arg7[%c0_30, %c0_31, %c0_32] : memref<1x256x128xbf16, #tpu.memory_space<vmem>>, vector<1x256x128xbf16>
      %43 = vector.shape_cast %42 : vector<1x256x128xbf16> to vector<256x128xbf16>
      %44 = vector.shape_cast %41 : vector<256x128xbf16> to vector<1x256x128xbf16>
      tpu.vector_store %arg7[%c0_30, %c0_31, %c0_32], %44 {strides = array<i32>} : memref<1x256x128xbf16, #tpu.memory_space<vmem>>, vector<1x256x128xbf16>,
    } else {
    }
    return
  }
  func.func @transform_0(%arg0: i32, %arg1: i32, %arg2: i32, %arg3: i32) -> (i32, i32, i32) {
    %c0_i32 = arith.constant 0 : i32
    return %arg0, %arg2, %arg1 : i32, i32, i32
  }
  func.func @transform_1(%arg0: i32, %arg1: i32, %arg2: i32, %arg3: i32) -> (i32, i32, i32) {
    %c2_i32 = arith.constant 2 : i32
    %0 = arith.addi %c2_i32, %arg1 : i32
    %c0_i32 = arith.constant 0 : i32
    return %arg0, %arg3, %0 : i32, i32, i32
  }
  func.func @transform_2(%arg0: i32, %arg1: i32, %arg2: i32, %arg3: i32) -> (i32, i32, i32) {
    %c4_i32 = arith.constant 4 : i32
    %0 = arith.addi %c4_i32, %arg1 : i32
    %c0_i32 = arith.constant 0 : i32
    return %arg0, %arg3, %0 : i32, i32, i32
  }
  func.func @transform_3(%arg0: i32, %arg1: i32, %arg2: i32, %arg3: i32) -> (i32, i32, i32) {
    %c0_i32 = arith.constant 0 : i32
    return %arg0, %arg2, %arg1 : i32, i32, i32
  }
}

module attributes {stable_mosaic.version = 11 : i64} {
  func.func @_qkv_proj_kernel(%arg0: i32, %arg1: i32, %arg2: memref<1x256x128xbf16, #tpu.memory_space<vmem>>, %arg3: memref<128x768xbf16, #tpu.memory_space<vmem>>, %arg4: memref<1x256x768xbf16, #tpu.memory_space<vmem>>) attributes {dimension_semantics = [#tpu.dimension_semantics<parallel>, #tpu.dimension_semantics<parallel>], iteration_bounds = array<i64: 2, 1>, scalar_prefetch = 0 : i64, scratch_operands = 0 : i64, tpu.core_type = #tpu.core_type<tc>, window_params = [{transform_indices = @transform_0, window_bounds = array<i64: 1, 256, 128>}, {pipeline_mode = #tpu.pipeline_mode<synchronous>, transform_indices = @transform_1, window_bounds = array<i64: 128, 768>}, {transform_indices = @transform_2, window_bounds = array<i64: 1, 256, 768>}]} {
    %c0 = arith.constant 0 : index
    %c0_0 = arith.constant 0 : index
    %c0_1 = arith.constant 0 : index
    %0 = vector.load %arg2[%c0, %c0_0, %c0_1] : memref<1x256x128xbf16, #tpu.memory_space<vmem>>, vector<1x256x128xbf16>
    %1 = vector.shape_cast %0 : vector<1x256x128xbf16> to vector<256x128xbf16>
    %c0_2 = arith.constant 0 : index
    %c0_3 = arith.constant 0 : index
    %2 = vector.load %arg3[%c0_2, %c0_3] : memref<128x768xbf16, #tpu.memory_space<vmem>>, vector<128x768xbf16>
    %cst = arith.constant dense<0.000000e+00> : vector<256x768xf32>
    %3 = tpu.matmul %1, %2, %cst {dimension_numbers = #tpu.dot_dimension_numbers<[1], [0], [0], [1], [0, 0, 1, 1], [], []>} : vector<256x128xbf16>, vector<128x768xbf16>, vector<256x768xf32> -> vector<256x768xf32>
    %4 = arith.truncf %3 : vector<256x768xf32> to vector<256x768xbf16>
    %c0_4 = arith.constant 0 : index
    %c0_5 = arith.constant 0 : index
    %c0_6 = arith.constant 0 : index
    %5 = vector.load %arg4[%c0_4, %c0_5, %c0_6] : memref<1x256x768xbf16, #tpu.memory_space<vmem>>, vector<1x256x768xbf16>
    %6 = vector.shape_cast %5 : vector<1x256x768xbf16> to vector<256x768xbf16>
    %7 = vector.shape_cast %4 : vector<256x768xbf16> to vector<1x256x768xbf16>
    tpu.vector_store %arg4[%c0_4, %c0_5, %c0_6], %7 {strides = array<i32>} : memref<1x256x768xbf16, #tpu.memory_space<vmem>>, vector<1x256x768xbf16>,
    return
  }
  func.func @transform_0(%arg0: i32, %arg1: i32) -> (i32, i32, i32) {
    %c0_i32 = arith.constant 0 : i32
    %c0_i32_0 = arith.constant 0 : i32
    return %arg0, %arg1, %c0_i32 : i32, i32, i32
  }
  func.func @transform_1(%arg0: i32, %arg1: i32) -> (i32, i32) {
    %c0_i32 = arith.constant 0 : i32
    %c0_i32_0 = arith.constant 0 : i32
    %c0_i32_1 = arith.constant 0 : i32
    return %c0_i32, %c0_i32_0 : i32, i32
  }
  func.func @transform_2(%arg0: i32, %arg1: i32) -> (i32, i32, i32) {
    %c0_i32 = arith.constant 0 : i32
    %c0_i32_0 = arith.constant 0 : i32
    return %arg0, %arg1, %c0_i32 : i32, i32, i32
  }
}

module attributes {stable_mosaic.version = 11 : i64} {
  func.func @_out_proj_kernel(%arg0: i32, %arg1: i32, %arg2: memref<1x256x256xbf16, #tpu.memory_space<vmem>>, %arg3: memref<256x128xbf16, #tpu.memory_space<vmem>>, %arg4: memref<1x128xf32, #tpu.memory_space<vmem>>, %arg5: memref<1x256x128xf32, #tpu.memory_space<vmem>>) attributes {dimension_semantics = [#tpu.dimension_semantics<parallel>, #tpu.dimension_semantics<parallel>], iteration_bounds = array<i64: 2, 1>, scalar_prefetch = 0 : i64, scratch_operands = 0 : i64, tpu.core_type = #tpu.core_type<tc>, window_params = [{transform_indices = @transform_0, window_bounds = array<i64: 1, 256, 256>}, {pipeline_mode = #tpu.pipeline_mode<synchronous>, transform_indices = @transform_1, window_bounds = array<i64: 256, 128>}, {pipeline_mode = #tpu.pipeline_mode<synchronous>, transform_indices = @transform_2, window_bounds = array<i64: 1, 128>}, {transform_indices = @transform_3, window_bounds = array<i64: 1, 256, 128>}]} {
    %c0 = arith.constant 0 : index
    %c0_0 = arith.constant 0 : index
    %c0_1 = arith.constant 0 : index
    %0 = vector.load %arg2[%c0, %c0_0, %c0_1] : memref<1x256x256xbf16, #tpu.memory_space<vmem>>, vector<1x256x256xbf16>
    %1 = vector.shape_cast %0 : vector<1x256x256xbf16> to vector<256x256xbf16>
    %c0_2 = arith.constant 0 : index
    %c0_3 = arith.constant 0 : index
    %2 = vector.load %arg3[%c0_2, %c0_3] : memref<256x128xbf16, #tpu.memory_space<vmem>>, vector<256x128xbf16>
    %cst = arith.constant dense<0.000000e+00> : vector<256x128xf32>
    %3 = tpu.matmul %1, %2, %cst {dimension_numbers = #tpu.dot_dimension_numbers<[1], [0], [0], [1], [0, 0, 1, 1], [], []>} : vector<256x256xbf16>, vector<256x128xbf16>, vector<256x128xf32> -> vector<256x128xf32>
    %c0_4 = arith.constant 0 : index
    %c0_5 = arith.constant 0 : index
    %4 = vector.load %arg4[%c0_4, %c0_5] : memref<1x128xf32, #tpu.memory_space<vmem>>, vector<1x128xf32>
    %5 = vector.broadcast %4 : vector<1x128xf32> to vector<256x128xf32>
    %6 = arith.addf %3, %5 : vector<256x128xf32>
    %c0_6 = arith.constant 0 : index
    %c0_7 = arith.constant 0 : index
    %c0_8 = arith.constant 0 : index
    %7 = vector.load %arg5[%c0_6, %c0_7, %c0_8] : memref<1x256x128xf32, #tpu.memory_space<vmem>>, vector<1x256x128xf32>
    %8 = vector.shape_cast %7 : vector<1x256x128xf32> to vector<256x128xf32>
    %9 = vector.shape_cast %6 : vector<256x128xf32> to vector<1x256x128xf32>
    tpu.vector_store %arg5[%c0_6, %c0_7, %c0_8], %9 {strides = array<i32>} : memref<1x256x128xf32, #tpu.memory_space<vmem>>, vector<1x256x128xf32>,
    return
  }
  func.func @transform_0(%arg0: i32, %arg1: i32) -> (i32, i32, i32) {
    %c0_i32 = arith.constant 0 : i32
    %c0_i32_0 = arith.constant 0 : i32
    return %arg0, %arg1, %c0_i32 : i32, i32, i32
  }
  func.func @transform_1(%arg0: i32, %arg1: i32) -> (i32, i32) {
    %c0_i32 = arith.constant 0 : i32
    %c0_i32_0 = arith.constant 0 : i32
    %c0_i32_1 = arith.constant 0 : i32
    return %c0_i32, %c0_i32_0 : i32, i32
  }
  func.func @transform_2(%arg0: i32, %arg1: i32) -> (i32, i32) {
    %c0_i32 = arith.constant 0 : i32
    %c0_i32_0 = arith.constant 0 : i32
    %c0_i32_1 = arith.constant 0 : i32
    return %c0_i32, %c0_i32_0 : i32, i32
  }
  func.func @transform_3(%arg0: i32, %arg1: i32) -> (i32, i32, i32) {
    %c0_i32 = arith.constant 0 : i32
    %c0_i32_0 = arith.constant 0 : i32
    return %arg0, %arg1, %c0_i32 : i32, i32, i32
  }
}

</mosaic_0001>

<bundles_post_ra>
// kernel: multi_head_attention.5
= control target key start
LH: loop header
LB: loop body
LE: loop exit
PB: predicated region body
PF: predicated region fallthrough
CT: control target
= control target key end

     0   :  { %8 = vsyncpa [#allocation3], 0  ;;  %s1511_s0 = inlined_call_operand.vmem [shape: bf16[2,256,256], index: 0, kind: input, shape index: {}]   ;;  %s1512_s1 = inlined_call_operand.vmem [shape: bf16[256,128], index: 1, kind: input, shape index: {}]   ;;  %s1513_s2 = inlined_call_operand.vmem [shape: f32[1,128], index: 2, kind: input, shape index: {}]   ;;  %s1514_s3 = inlined_call_operand.hbm [shape: f32[2,256,128], index: 3, kind: output, shape index: {}]  }
   0x1   :  { %10 = vsyncpa [#allocation3 + $0x1], 0  ;;  %s1238_s12 = smov 0   ;;  %s1240_s13 = smov 0  }
   0x2   :  { %s1242_s14 = smov 0   ;;  %s1244_s15 = smov 0  }
   0x3   :  { %s1246_s16 = smov 0   ;;  %s1248_s17 = smov 0  }
   0x4 LB: > { %s822_s18 = sadd.s32 4294967295, %s1213_s17   ;;  %s823_s19 = sadd.s32 4294967294, %s1213_s17   ;;  %s1213_s17 = sphi %s1248_s17, %s16_s17   ;;  %s1209_s16 = sphi %s1246_s16, %s1521_s16   ;;  %s1205_s15 = sphi %s1244_s15, %s1520_s15   ;;  %s1201_s14 = sphi %s1242_s14, %s1519_s14   ;;  %s1197_s13 = sphi %s1240_s13, %s1518_s13   ;;  %s1193_s12 = sphi %s1238_s12, %s1517_s12  }
   0x5   : > { %s28_s20 = sadd.s32 1, %s1209_s16  ;;  %s107_s21 = sadd.s32 1, %s1201_s14 }
   0x6   : > { %p30_p0 = scmp.ge.s32.totalorder %s28_s20, 2  ;;  %p117_p1 = scmp.ne.s32.totalorder %s1201_s14, %s1197_s13 }
   0x7   : > { %p118_p2 = scmp.eq.s32.totalorder %s822_s18, 1  ;;  %p123_p3 = scmp.ne.s32.totalorder %s1197_s13, %s1193_s12 }
   0x8   : > { %s1523_s20 = smov (%p30_p0, %s28_s20), 0  ;;  %p124_p5 = scmp.eq.s32.totalorder %s823_s19, 1 }
   0x9   : > { %p1278_p4 = por %p118_p2, %p117_p1  ;;  %s102_s23 = ssub.s32 %s1209_s16, %s1523_s20 }
   0xa   : > { %p826_p6 = scmp.ge.s32.totalorder %s1213_s17, 1  ;;  %p105_p7 = scmp.eq.s32.totalorder %s102_s23, 0 }
   0xb   : > { %p1285_p8 = por %p124_p5, %p123_p3  ;;  %p162_p9 = scmp.lt.s32.totalorder %s1213_s17, 3 }
   0xc   : > { %s1291_s25 = scalar_select %p105_p7, %s1201_s14, %s107_s21  }
   0xd   : > { %p163_p10 = pnand %p826_p6, %p162_p9 }
   0xe   : > { %v1071_v0 = vld [vmem:[%s1512_s1 + $0x40] sm:$0xff] (!%p163_p10)   ;;  %v1073_v2 = vld [vmem:[%s1512_s1 + $0x48] sm:$0xff] (!%p163_p10)   ;;  %p192_p11 = scmp.lt.s32.totalorder (!%p163_p10), %s1205_s15, 1  ;;  %v1075_v4 = vld [vmem:[%s1512_s1 + $0x50] sm:$0xff] (!%p163_p10)   ;;  %s188_s29 = sand.u32 (!%p163_p10), 1, %s1197_s13  }
   0xf   : > { %166 = sbr.rel (%p163_p10) target bundleno = 337 (0x151), region = 32  ;;  %v1072_v1 = vld [vmem:[%s1512_s1] sm:$0xff] (!%p163_p10)   ;;  %886 = vmatprep.subr.bf16.mxu0 (!%p163_p10), %v1071_v0  ;;  %998 = vmatprep.subr.bf16.mxu1 (!%p163_p10), %v1071_v0  ;;  %v1074_v3 = vld [vmem:[%s1512_s1 + $0x8] sm:$0xff] (!%p163_p10)   ;;  %v1076_v5 = vld [vmem:[%s1512_s1 + $0x10] sm:$0xff] (!%p163_p10)   ;;  %s827_s30 = sshll.u32 (!%p163_p10), %s188_s29, 8 }
  0x10   : > { %887 = vmatpush3.bf16.msra.mxu0 (!%p163_p10), %v1072_v1  ;;  %1006 = vmatpush3.bf16.msra.mxu1 (!%p163_p10), %v1072_v1  ;;  %v1077_v6 = vld [vmem:[%s1512_s1 + $0x58] sm:$0xff] (!%p163_p10)   ;;  %v1079_v8 = vld [vmem:[%s1512_s1 + $0x60] sm:$0xff] (!%p163_p10)   ;;  %v1081_v10 = vld [vmem:[%s1512_s1 + $0x68] sm:$0xff] (!%p163_p10)   ;;  %s885_s7 = sshll.u32 (!%p163_p10), %s1205_s15, 12  ;;  %s1215_s19 = smov (!%p163_p10), [#allocation2]  }
  0x11   : > { %888 = vmatprep.subr.bf16.mxu0 (!%p163_p10), %v1073_v2  ;;  %999 = vmatprep.subr.bf16.mxu1 (!%p163_p10), %v1073_v2  ;;  %v1078_v7 = vld [vmem:[%s1512_s1 + $0x18] sm:$0xff] (!%p163_p10)   ;;  %v1080_v9 = vld [vmem:[%s1512_s1 + $0x20] sm:$0xff] (!%p163_p10)   ;;  %v1082_v13 = vld [vmem:[%s1512_s1 + $0x28] sm:$0xff] (!%p163_p10)   ;;  %s1139_s21 = sshll.u32 (!%p163_p10), %s1215_s19, 4  ;;  %s1140_s21 = int_to_ptr.vmem [resolvable:$false] %s1139_s21 }
  0x12   : > { %v1083_v14 = vld [vmem:[%s1512_s1 + $0x70] sm:$0xff] (!%p163_p10)   ;;  %v1085_v16 = vld [vmem:[%s1512_s1 + $0x78] sm:$0xff] (!%p163_p10)   ;;  %v1386_v50 = vld [vmem:[%s1513_s2] ss:$0 sm:$0xff] (!%p163_p10)  ;;  %s1141_s23 = scalar_lea.vmem (!%p163_p10), %s1140_s21, 8192 }
  0x13   : > { %v1084_v15 = vld [vmem:[%s1512_s1 + $0x30] sm:$0xff] (!%p163_p10)   ;;  %v1086_v17 = vld [vmem:[%s1512_s1 + $0x38] sm:$0xff] (!%p163_p10)  }
  0x14   : > { %889 = vmatpush3.bf16.msra.mxu0 (!%p163_p10), %v1074_v3  ;;  %1007 = vmatpush3.bf16.msra.mxu1 (!%p163_p10), %v1074_v3 }
  0x15   : > { %890 = vmatprep.subr.bf16.mxu0 (!%p163_p10), %v1075_v4  ;;  %1000 = vmatprep.subr.bf16.mxu1 (!%p163_p10), %v1075_v4 }
  0x16   : > { %s193_s11 = scalar_select %p192_p11, %s1205_s15, 1 }
  0x17   : > { %s1465_s15 = scalar_lea.sflag [#allocation3], %s188_s29 }
  0x18   : > { %891 = vmatpush3.bf16.msra.mxu0 %v1076_v5  ;;  %1008 = vmatpush3.bf16.msra.mxu1 %v1076_v5  ;;  %s884_s26 = sshll.u32 %s193_s11, 8  ;;  %s1453_s11 = scalar_lea.hbm %s1514_s3, %s885_s7 }
  0x19   : > { %892 = vmatprep.subr.bf16.mxu0 %v1077_v6  ;;  %1001 = vmatprep.subr.bf16.mxu1 %v1077_v6  ;;  %s1325_s4 = scalar_lea.vmem %s1511_s0, %s884_s26 }
  0x1a   : > { %v1089_v11 = vld [vmem:[%s1325_s4 + $0x4] ss:$8 sps:$4 sm:$0xff]   ;;  %v1087_v18 = vld [vmem:[%s1325_s4] ss:$8 sps:$4 sm:$0xff]   ;;  %v1093_v20 = vld [vmem:[%s1325_s4 + $0x14] ss:$8 sps:$4 sm:$0xff]  }
  0x1b   : > { %v1092_v12 = vld [vmem:[%s1325_s4 + $0x84] ss:$8 sps:$4 sm:$0xff]   ;;  %563 = vmatprep.mubr.bf16.mxu0 %v1089_v11  ;;  %v1090_v19 = vld [vmem:[%s1325_s4 + $0x80] ss:$8 sps:$4 sm:$0xff]   ;;  %v1095_v21 = vld [vmem:[%s1325_s4 + $0x94] ss:$8 sps:$4 sm:$0xff]  }
  0x1c   : > { %893 = vmatpush3.bf16.msra.mxu0 %v1078_v7  ;;  %1009 = vmatpush3.bf16.msra.mxu1 %v1078_v7  ;;  %v1097_v22 = vld [vmem:[%s1325_s4 + $0x10] ss:$8 sps:$4 sm:$0xff]   ;;  %v1099_v24 = vld [vmem:[%s1325_s4 + $0x24] ss:$8 sps:$4 sm:$0xff]   ;;  %v1103_v26 = vld [vmem:[%s1325_s4 + $0x20] ss:$8 sps:$4 sm:$0xff]  }
  0x1d   : > { %894 = vmatprep.subr.bf16.mxu0 %v1079_v8  ;;  %1002 = vmatprep.subr.bf16.mxu1 %v1079_v8  ;;  %v1098_v23 = vld [vmem:[%s1325_s4 + $0x90] ss:$8 sps:$4 sm:$0xff]   ;;  %v1101_v25 = vld [vmem:[%s1325_s4 + $0xa4] ss:$8 sps:$4 sm:$0xff]   ;;  %v1104_v27 = vld [vmem:[%s1325_s4 + $0xa0] ss:$8 sps:$4 sm:$0xff]  }
  0x1e   : > { %627 = vmatprep.mubr.bf16.mxu1 %v1092_v12  ;;  %v1105_v28 = vld [vmem:[%s1325_s4 + $0x34] ss:$8 sps:$4 sm:$0xff]   ;;  %v1109_v30 = vld [vmem:[%s1325_s4 + $0x30] ss:$8 sps:$4 sm:$0xff]   ;;  %v1111_v32 = vld [vmem:[%s1325_s4 + $0x44] ss:$8 sps:$4 sm:$0xff]  }
  0x1f   : > { %v1107_v29 = vld [vmem:[%s1325_s4 + $0xb4] ss:$8 sps:$4 sm:$0xff]   ;;  %v1110_v31 = vld [vmem:[%s1325_s4 + $0xb0] ss:$8 sps:$4 sm:$0xff]   ;;  %v1113_v33 = vld [vmem:[%s1325_s4 + $0xc4] ss:$8 sps:$4 sm:$0xff]  }
  0x20   : > { %895 = vmatpush3.bf16.msra.mxu0 %v1080_v9  ;;  %1010 = vmatpush3.bf16.msra.mxu1 %v1080_v9  ;;  %v1115_v34 = vld [vmem:[%s1325_s4 + $0x40] ss:$8 sps:$4 sm:$0xff]   ;;  %v1117_v36 = vld [vmem:[%s1325_s4 + $0x54] ss:$8 sps:$4 sm:$0xff]   ;;  %v1121_v38 = vld [vmem:[%s1325_s4 + $0x50] ss:$8 sps:$4 sm:$0xff]  }
  0x21   : > { %896 = vmatprep.subr.bf16.mxu0 %v1081_v10  ;;  %1003 = vmatprep.subr.bf16.mxu1 %v1081_v10  ;;  %v1116_v35 = vld [vmem:[%s1325_s4 + $0xc0] ss:$8 sps:$4 sm:$0xff]   ;;  %v1119_v37 = vld [vmem:[%s1325_s4 + $0xd4] ss:$8 sps:$4 sm:$0xff]   ;;  %v1122_v39 = vld [vmem:[%s1325_s4 + $0xd0] ss:$8 sps:$4 sm:$0xff]  }
  0x22   : > { %v1123_v40 = vld [vmem:[%s1325_s4 + $0x64] ss:$8 sps:$4 sm:$0xff]   ;;  %v1127_v42 = vld [vmem:[%s1325_s4 + $0x60] ss:$8 sps:$4 sm:$0xff]   ;;  %v1129_v44 = vld [vmem:[%s1325_s4 + $0x74] ss:$8 sps:$4 sm:$0xff]  }
  0x23   : > { %v1125_v41 = vld [vmem:[%s1325_s4 + $0xe4] ss:$8 sps:$4 sm:$0xff]   ;;  %v1128_v43 = vld [vmem:[%s1325_s4 + $0xe0] ss:$8 sps:$4 sm:$0xff]   ;;  %v1131_v45 = vld [vmem:[%s1325_s4 + $0xf4] ss:$8 sps:$4 sm:$0xff]  }
  0x24   : > { %897 = vmatpush3.bf16.msra.mxu0 %v1082_v13  ;;  %1011 = vmatpush3.bf16.msra.mxu1 %v1082_v13  ;;  %v1133_v46 = vld [vmem:[%s1325_s4 + $0x70] ss:$8 sps:$4 sm:$0xff]  }
  0x25   : > { %898 = vmatprep.subr.bf16.mxu0 %v1083_v14  ;;  %1004 = vmatprep.subr.bf16.mxu1 %v1083_v14  ;;  %v1134_v47 = vld [vmem:[%s1325_s4 + $0xf0] ss:$8 sps:$4 sm:$0xff]   ;;  %s1390_s4 = scalar_lea.vmem [#allocation2], %s827_s30 }
  0x26   : > { %s740_s8 = sshll.u32 %s1390_s4, 4  ;;  %s1455_s8 = int_to_ptr.vmem [resolvable:$true] %s740_s8 }
  0x27   : > { %s1135_s18 = scalar_lea.vmem %s1455_s8, 4096  ;;  %p1142_p1 = scmp.lt.s32.totalorder %s1455_s8, %s1140_s21 }
  0x28   : > { %899 = vmatpush3.bf16.msra.mxu0 %v1084_v15  ;;  %1012 = vmatpush3.bf16.msra.mxu1 %v1084_v15  ;;  %p1136_p12 = scmp.ne.s32.totalorder %s1455_s8, %s1135_s18  ;;  %p1143_p2 = scmp.lt.s32.totalorder %s1141_s23, %s1135_s18 }
  0x29   : > { %900 = vmatprep.subr.bf16.mxu0 %v1085_v16  ;;  %1005 = vmatprep.subr.bf16.mxu1 %v1085_v16 }
  0x2a   : > { %p1137_p13 = pnand %p1136_p12, %p1278_p4  ;;  %p1144_p3 = por %p1143_p2, %p1142_p1 }
  0x2c   : > { %901 = vmatpush3.bf16.msra.mxu0 %v1086_v17  ;;  %1013 = vmatpush3.bf16.msra.mxu1 %v1086_v17  ;;  %p1138_p0 = pneg %p1137_p13 }
  0x2e   : > { %p1145_p5 = pnand %p1144_p3, %p1138_p0 }
  0x2f   : > { %564 = vmatmul.mubr.bf16.vlgmr.msra.gmra.mrb[0].mxu0 %v1087_v18  ;;  %628 = vmatmul.mubr.bf16.vlgmr.msra.gmra.mrb[0].mxu1 %v1090_v19 }
  0x30   : > { %571 = vmatprep.mubr.bf16.mxu0 %v1093_v20  ;;  %635 = vmatprep.mubr.bf16.mxu1 %v1095_v21 }
  0x37   : > { %572 = vmatmul.mubr.bf16.gmra.mrb[4].mxu0 %v1097_v22  ;;  %636 = vmatmul.mubr.bf16.gmra.mrb[4].mxu1 %v1098_v23 }
  0x38   : > { %579 = vmatprep.mubr.bf16.mxu0 %v1099_v24  ;;  %643 = vmatprep.mubr.bf16.mxu1 %v1101_v25 }
  0x3f   : > { %580 = vmatmul.mubr.bf16.gmra.mrb[8].mxu0 %v1103_v26  ;;  %644 = vmatmul.mubr.bf16.gmra.mrb[8].mxu1 %v1104_v27 }
  0x40   : > { %587 = vmatprep.mubr.bf16.mxu0 %v1105_v28  ;;  %651 = vmatprep.mubr.bf16.mxu1 %v1107_v29 }
  0x47   : > { %588 = vmatmul.mubr.bf16.gmra.mrb[12].mxu0 %v1109_v30  ;;  %652 = vmatmul.mubr.bf16.gmra.mrb[12].mxu1 %v1110_v31 }
  0x48   : > { %595 = vmatprep.mubr.bf16.mxu0 %v1111_v32  ;;  %659 = vmatprep.mubr.bf16.mxu1 %v1113_v33 }
  0x4f   : > { %596 = vmatmul.mubr.bf16.gmra.mrb[16].mxu0 %v1115_v34  ;;  %660 = vmatmul.mubr.bf16.gmra.mrb[16].mxu1 %v1116_v35 }
  0x50   : > { %603 = vmatprep.mubr.bf16.mxu0 %v1117_v36  ;;  %667 = vmatprep.mubr.bf16.mxu1 %v1119_v37 }
  0x57   : > { %604 = vmatmul.mubr.bf16.gmra.mrb[20].mxu0 %v1121_v38  ;;  %668 = vmatmul.mubr.bf16.gmra.mrb[20].mxu1 %v1122_v39 }
  0x58   : > { %611 = vmatprep.mubr.bf16.mxu0 %v1123_v40  ;;  %675 = vmatprep.mubr.bf16.mxu1 %v1125_v41 }
  0x5f   : > { %612 = vmatmul.mubr.bf16.gmra.mrb[24].mxu0 %v1127_v42  ;;  %676 = vmatmul.mubr.bf16.gmra.mrb[24].mxu1 %v1128_v43 }
  0x60   : > { %619 = vmatprep.mubr.bf16.mxu0 %v1129_v44  ;;  %683 = vmatprep.mubr.bf16.mxu1 %v1131_v45 }
  0x67   : > { %620 = vmatmul.mubr.bf16.gmra.mrb[28].mxu0 %v1133_v46  ;;  %684 = vmatmul.mubr.bf16.gmra.mrb[28].mxu1 %v1134_v47 }
 0x102   : > { %v902_v48 = vpop.f32.mrb[0].mxu0  ;;  %v950_v49 = vpop.f32.mrb[0].mxu1 }
 0x103   : > { %v903_v51 = vpop.f32.mrb[1].mxu0  ;;  %v951_v52 = vpop.f32.mrb[1].mxu1 }
 0x104   : > { %v904_v53 = vadd.f32 %v903_v51, %v902_v48  ;;  %v952_v54 = vadd.f32 %v951_v52, %v950_v49  ;;  %v905_v55 = vpop.f32.mrb[2].mxu0  ;;  %v953_v56 = vpop.f32.mrb[2].mxu1 }
 0x105   : > { %v906_v57 = vpop.f32.mrb[3].mxu0  ;;  %v954_v58 = vpop.f32.mrb[3].mxu1 }
 0x106   : > { %v566_v59 = vadd.f32 %v904_v53, %v1386_v50  ;;  %v630_v60 = vadd.f32 %v952_v54, %v1386_v50  ;;  %v907_v61 = vadd.f32 %v906_v57, %v905_v55  ;;  %v955_v62 = vadd.f32 %v954_v58, %v953_v56 }
 0x108   : > { %692 = vst [vmem:[%s1390_s4] sm:$0xff] %v566_v59  ;;  %708 = vst [vmem:[%s1390_s4 + $0x80] sm:$0xff] %v630_v60  ;;  %v569_v63 = vadd.f32 %v907_v61, %v1386_v50  ;;  %v633_v0 = vadd.f32 %v955_v62, %v1386_v50 }
 0x10a   : > { %693 = vst [vmem:[%s1390_s4 + $0x8] sm:$0xff] %v569_v63  ;;  %709 = vst [vmem:[%s1390_s4 + $0x88] sm:$0xff] %v633_v0  ;;  %v908_v1 = vpop.f32.mrb[4].mxu0  ;;  %v956_v2 = vpop.f32.mrb[4].mxu1 }
 0x10b   : > { %v909_v3 = vpop.f32.mrb[5].mxu0  ;;  %v957_v4 = vpop.f32.mrb[5].mxu1 }
 0x10c   : > { %v910_v5 = vadd.f32 %v909_v3, %v908_v1  ;;  %v958_v6 = vadd.f32 %v957_v4, %v956_v2  ;;  %v911_v7 = vpop.f32.mrb[6].mxu0  ;;  %v959_v8 = vpop.f32.mrb[6].mxu1 }
 0x10d   : > { %v912_v9 = vpop.f32.mrb[7].mxu0  ;;  %v960_v10 = vpop.f32.mrb[7].mxu1 }
 0x10e   : > { %v574_v11 = vadd.f32 %v910_v5, %v1386_v50  ;;  %v638_v12 = vadd.f32 %v958_v6, %v1386_v50  ;;  %v913_v13 = vadd.f32 %v912_v9, %v911_v7  ;;  %v961_v14 = vadd.f32 %v960_v10, %v959_v8 }
 0x110   : > { %694 = vst [vmem:[%s1390_s4 + $0x10] sm:$0xff] %v574_v11  ;;  %710 = vst [vmem:[%s1390_s4 + $0x90] sm:$0xff] %v638_v12  ;;  %v577_v15 = vadd.f32 %v913_v13, %v1386_v50  ;;  %v641_v16 = vadd.f32 %v961_v14, %v1386_v50 }
 0x112   : > { %695 = vst [vmem:[%s1390_s4 + $0x18] sm:$0xff] %v577_v15  ;;  %711 = vst [vmem:[%s1390_s4 + $0x98] sm:$0xff] %v641_v16  ;;  %v914_v17 = vpop.f32.mrb[8].mxu0  ;;  %v962_v18 = vpop.f32.mrb[8].mxu1 }
 0x113   : > { %v915_v19 = vpop.f32.mrb[9].mxu0  ;;  %v963_v20 = vpop.f32.mrb[9].mxu1 }
 0x114   : > { %v916_v21 = vadd.f32 %v915_v19, %v914_v17  ;;  %v964_v22 = vadd.f32 %v963_v20, %v962_v18  ;;  %v917_v23 = vpop.f32.mrb[10].mxu0  ;;  %v965_v24 = vpop.f32.mrb[10].mxu1 }
 0x115   : > { %v918_v25 = vpop.f32.mrb[11].mxu0  ;;  %v966_v26 = vpop.f32.mrb[11].mxu1 }
 0x116   : > { %v582_v27 = vadd.f32 %v916_v21, %v1386_v50  ;;  %v646_v28 = vadd.f32 %v964_v22, %v1386_v50  ;;  %v919_v29 = vadd.f32 %v918_v25, %v917_v23  ;;  %v967_v30 = vadd.f32 %v966_v26, %v965_v24 }
 0x118   : > { %696 = vst [vmem:[%s1390_s4 + $0x20] sm:$0xff] %v582_v27  ;;  %712 = vst [vmem:[%s1390_s4 + $0xa0] sm:$0xff] %v646_v28  ;;  %v585_v31 = vadd.f32 %v919_v29, %v1386_v50  ;;  %v649_v32 = vadd.f32 %v967_v30, %v1386_v50 }
 0x11a   : > { %697 = vst [vmem:[%s1390_s4 + $0x28] sm:$0xff] %v585_v31  ;;  %713 = vst [vmem:[%s1390_s4 + $0xa8] sm:$0xff] %v649_v32  ;;  %v920_v33 = vpop.f32.mrb[12].mxu0  ;;  %v968_v34 = vpop.f32.mrb[12].mxu1 }
 0x11b   : > { %v921_v35 = vpop.f32.mrb[13].mxu0  ;;  %v969_v36 = vpop.f32.mrb[13].mxu1 }
 0x11c   : > { %v922_v37 = vadd.f32 %v921_v35, %v920_v33  ;;  %v970_v38 = vadd.f32 %v969_v36, %v968_v34  ;;  %v923_v39 = vpop.f32.mrb[14].mxu0  ;;  %v971_v40 = vpop.f32.mrb[14].mxu1 }
 0x11d   : > { %v924_v41 = vpop.f32.mrb[15].mxu0  ;;  %v972_v42 = vpop.f32.mrb[15].mxu1 }
 0x11e   : > { %v590_v43 = vadd.f32 %v922_v37, %v1386_v50  ;;  %v654_v44 = vadd.f32 %v970_v38, %v1386_v50  ;;  %v925_v45 = vadd.f32 %v924_v41, %v923_v39  ;;  %v973_v46 = vadd.f32 %v972_v42, %v971_v40 }
 0x120   : > { %698 = vst [vmem:[%s1390_s4 + $0x30] sm:$0xff] %v590_v43  ;;  %714 = vst [vmem:[%s1390_s4 + $0xb0] sm:$0xff] %v654_v44  ;;  %v593_v47 = vadd.f32 %v925_v45, %v1386_v50  ;;  %v657_v48 = vadd.f32 %v973_v46, %v1386_v50 }
 0x122   : > { %699 = vst [vmem:[%s1390_s4 + $0x38] sm:$0xff] %v593_v47  ;;  %715 = vst [vmem:[%s1390_s4 + $0xb8] sm:$0xff] %v657_v48  ;;  %v926_v49 = vpop.f32.mrb[16].mxu0  ;;  %v974_v51 = vpop.f32.mrb[16].mxu1 }
 0x123   : > { %v927_v52 = vpop.f32.mrb[17].mxu0  ;;  %v975_v53 = vpop.f32.mrb[17].mxu1 }
 0x124   : > { %v928_v54 = vadd.f32 %v927_v52, %v926_v49  ;;  %v976_v55 = vadd.f32 %v975_v53, %v974_v51  ;;  %v929_v56 = vpop.f32.mrb[18].mxu0  ;;  %v977_v57 = vpop.f32.mrb[18].mxu1 }
 0x125   : > { %v930_v58 = vpop.f32.mrb[19].mxu0  ;;  %v978_v59 = vpop.f32.mrb[19].mxu1 }
 0x126   : > { %v598_v60 = vadd.f32 %v928_v54, %v1386_v50  ;;  %v662_v61 = vadd.f32 %v976_v55, %v1386_v50  ;;  %v931_v62 = vadd.f32 %v930_v58, %v929_v56  ;;  %v979_v63 = vadd.f32 %v978_v59, %v977_v57 }
 0x128   : > { %700 = vst [vmem:[%s1390_s4 + $0x40] sm:$0xff] %v598_v60  ;;  %716 = vst [vmem:[%s1390_s4 + $0xc0] sm:$0xff] %v662_v61  ;;  %v601_v0 = vadd.f32 %v931_v62, %v1386_v50  ;;  %v665_v1 = vadd.f32 %v979_v63, %v1386_v50 }
 0x12a   : > { %701 = vst [vmem:[%s1390_s4 + $0x48] sm:$0xff] %v601_v0  ;;  %717 = vst [vmem:[%s1390_s4 + $0xc8] sm:$0xff] %v665_v1  ;;  %v932_v2 = vpop.f32.mrb[20].mxu0  ;;  %v980_v3 = vpop.f32.mrb[20].mxu1 }
 0x12b   : > { %v933_v4 = vpop.f32.mrb[21].mxu0  ;;  %v981_v5 = vpop.f32.mrb[21].mxu1 }
 0x12c   : > { %v934_v6 = vadd.f32 %v933_v4, %v932_v2  ;;  %v982_v7 = vadd.f32 %v981_v5, %v980_v3  ;;  %v935_v8 = vpop.f32.mrb[22].mxu0  ;;  %v983_v9 = vpop.f32.mrb[22].mxu1 }
 0x12d   : > { %v936_v10 = vpop.f32.mrb[23].mxu0  ;;  %v984_v11 = vpop.f32.mrb[23].mxu1 }
 0x12e   : > { %v606_v12 = vadd.f32 %v934_v6, %v1386_v50  ;;  %v670_v13 = vadd.f32 %v982_v7, %v1386_v50  ;;  %v937_v14 = vadd.f32 %v936_v10, %v935_v8  ;;  %v985_v15 = vadd.f32 %v984_v11, %v983_v9 }
 0x130   : > { %702 = vst [vmem:[%s1390_s4 + $0x50] sm:$0xff] %v606_v12  ;;  %718 = vst [vmem:[%s1390_s4 + $0xd0] sm:$0xff] %v670_v13  ;;  %v609_v16 = vadd.f32 %v937_v14, %v1386_v50  ;;  %v673_v17 = vadd.f32 %v985_v15, %v1386_v50 }
 0x132   : > { %703 = vst [vmem:[%s1390_s4 + $0x58] sm:$0xff] %v609_v16  ;;  %719 = vst [vmem:[%s1390_s4 + $0xd8] sm:$0xff] %v673_v17  ;;  %v938_v18 = vpop.f32.mrb[24].mxu0  ;;  %v986_v19 = vpop.f32.mrb[24].mxu1 }
 0x133   : > { %v939_v20 = vpop.f32.mrb[25].mxu0  ;;  %v987_v21 = vpop.f32.mrb[25].mxu1 }
 0x134   : > { %v940_v22 = vadd.f32 %v939_v20, %v938_v18  ;;  %v988_v23 = vadd.f32 %v987_v21, %v986_v19  ;;  %v941_v24 = vpop.f32.mrb[26].mxu0  ;;  %v989_v25 = vpop.f32.mrb[26].mxu1 }
 0x135   : > { %v942_v26 = vpop.f32.mrb[27].mxu0  ;;  %v990_v27 = vpop.f32.mrb[27].mxu1 }
 0x136   : > { %v614_v28 = vadd.f32 %v940_v22, %v1386_v50  ;;  %v678_v29 = vadd.f32 %v988_v23, %v1386_v50  ;;  %v943_v30 = vadd.f32 %v942_v26, %v941_v24  ;;  %v991_v31 = vadd.f32 %v990_v27, %v989_v25 }
 0x138   : > { %704 = vst [vmem:[%s1390_s4 + $0x60] sm:$0xff] %v614_v28  ;;  %720 = vst [vmem:[%s1390_s4 + $0xe0] sm:$0xff] %v678_v29  ;;  %v617_v32 = vadd.f32 %v943_v30, %v1386_v50  ;;  %v681_v33 = vadd.f32 %v991_v31, %v1386_v50 }
 0x13a   : > { %705 = vst [vmem:[%s1390_s4 + $0x68] sm:$0xff] %v617_v32  ;;  %721 = vst [vmem:[%s1390_s4 + $0xe8] sm:$0xff] %v681_v33  ;;  %v944_v34 = vpop.f32.mrb[28].mxu0  ;;  %v992_v35 = vpop.f32.mrb[28].mxu1 }
 0x13b   : > { %v945_v36 = vpop.f32.mrb[29].mxu0  ;;  %v993_v37 = vpop.f32.mrb[29].mxu1 }
 0x13c   : > { %v946_v38 = vadd.f32 %v945_v36, %v944_v34  ;;  %v994_v39 = vadd.f32 %v993_v37, %v992_v35  ;;  %v947_v40 = vpop.f32.mrb[30].mxu0  ;;  %v995_v41 = vpop.f32.mrb[30].mxu1 }
 0x13d   : > { %v948_v42 = vpop.f32.mrb[31].mxu0  ;;  %v996_v43 = vpop.f32.mrb[31].mxu1 }
 0x13e   : > { %v622_v44 = vadd.f32 %v946_v38, %v1386_v50  ;;  %v686_v45 = vadd.f32 %v994_v39, %v1386_v50  ;;  %v949_v46 = vadd.f32 %v948_v42, %v947_v40  ;;  %v997_v47 = vadd.f32 %v996_v43, %v995_v41 }
 0x140   : > { %706 = vst [vmem:[%s1390_s4 + $0x70] sm:$0xff] %v622_v44  ;;  %722 = vst [vmem:[%s1390_s4 + $0xf0] sm:$0xff] %v686_v45  ;;  %v625_v48 = vadd.f32 %v949_v46, %v1386_v50  ;;  %v689_v49 = vadd.f32 %v997_v47, %v1386_v50 }
 0x142   : > { %707 = vst [vmem:[%s1390_s4 + $0x78] sm:$0xff] %v625_v48  ;;  %723 = vst [vmem:[%s1390_s4 + $0xf8] sm:$0xff] %v689_v49 }
 0x143   : > { %1148 = shalt.err (!%p1145_p5)
}
 0x144   : > { %s1149_s26 = scalar_lea.hbm %s1453_s11, 4096  ;;  %s1153_s29 = scalar_lea.hbm %s1514_s3, 8192 }
 0x145   : > { %p1150_p6 = scmp.ne.s32.totalorder %s1453_s11, %s1149_s26  ;;  %p1154_p10 = scmp.lt.u32.totalorder %s1453_s11, %s1514_s3 }
 0x146   : > { %p1155_p11 = scmp.lt.u32.totalorder %s1153_s29, %s1149_s26  ;;  %p1157_p13 = scmp.lt.u32.totalorder %s1149_s26, %s1453_s11 }
 0x147   : > { %p1151_p7 = pnand %p1150_p6, %p1278_p4 }
 0x148   : > { %p1156_p12 = por %p1155_p11, %p1154_p10 }
 0x149   : > { %p1152_p9 = pneg %p1151_p7 }
 0x14a   : > { %p1158_p0 = por %p1157_p13, %p1156_p12 }
 0x14c   : > { %p1159_p1 = pnand %p1158_p0, %p1152_p9 }
 0x14e   : > { %1162 = shalt.err (!%p1159_p1)
}
 0x14f   : > { %s1216_s6 = smov 128   ;;  %s1217_s4 = smov 8  }
 0x150   : > { %1014 = dma.vmem_to_hbm [thread:$0]  (%p1278_p4), %s1455_s8, 4096, %s1453_s11, %s1465_s15, %s1216_s6, %s1216_s6, %s1217_s4  }
 0x151 PF: > { %p1020_p2 = scmp.ge.s32.totalorder %s1213_s17, 2  ;;  %s755_s7 = sand.u32 1, %s1193_s12  }
 0x152   : > { %s756_s9 = scalar_lea.sflag [#allocation3], %s755_s7 }
 0x153   : > { %p1017_p3 = pnand %p1020_p2, %p1285_p8 }
 0x155   : > { %1188 = dma.done.wait (!%p1017_p3), %s756_s9, 4096  }
 0x156   : > { %1190 = vsyncadd (!%p1017_p3), %s756_s9, 4294963200  ;;  %s16_s17 = sadd.s32 1, %s1213_s17   ;;  %s1517_s12 = smov %s1197_s13 }
 0x157   : > { %p13_p5 = scmp.ge.s32.totalorder %s16_s17, 4   ;;  %s1518_s13 = smov %s1201_s14 }
 0x158   : > { %s1519_s14 = smov %s1291_s25  ;;  %s1520_s15 = smov %s1209_s16 }
 0x159   : > { %s1521_s16 = smov %s1523_s20  ;;  %15 = sbr.rel (!%p13_p5) target bundleno = 4 (0x4), region = 67 }
 0x160   :  { %761 = vsyncpa [#allocation3], 1 }
 0x161   :  { %763 = vsyncpa [#allocation3 + $0x1], 1 }

// kernel: multi_head_attention.3
= control target key start
LH: loop header
LB: loop body
LE: loop exit
PB: predicated region body
PF: predicated region fallthrough
CT: control target
= control target key end

     0   :  { %s2383_s9 = smov 0   ;;  %s2385_s10 = smov 0   ;;  %s2783_s0 = inlined_call_operand.vmem [shape: bf16[2,256,128], index: 0, kind: input, shape index: {}]   ;;  %s2784_s1 = inlined_call_operand.vmem [shape: bf16[128,768], index: 1, kind: input, shape index: {}]   ;;  %s2785_s2 = inlined_call_operand.vmem [shape: bf16[2,256,768], index: 2, kind: output, shape index: {}]  }
   0x1   :  { %s2387_s11 = smov 0  }
   0x2 LB: > { %s24_s12 = sadd.s32 1, %s2361_s10  ;;  %p1950_p0 = scmp.ge.s32.totalorder %s2365_s11, 1  ;;  %s2365_s11 = sphi %s2387_s11, %s12_s11   ;;  %s2361_s10 = sphi %s2385_s10, %s2787_s10   ;;  %s2357_s9 = sphi %s2383_s9, %s2786_s9  }
   0x3   : > { %p26_p1 = scmp.ge.s32.totalorder %s24_s12, 2  ;;  %p133_p2 = scmp.lt.s32.totalorder %s2365_s11, 3 }
   0x5   : > { %s2789_s12 = smov (%p26_p1, %s24_s12), 0  ;;  %p134_p3 = pnand %p1950_p0, %p133_p2 }
   0x6   : > { %v2255_v0 = vld [vmem:[%s2784_s1 + $0x4] ss:$24 sps:$4 sm:$0xff] (!%p134_p3)   ;;  %p165_p4 = scmp.lt.s32.totalorder (!%p134_p3), %s2357_s9, 1  ;;  %v2257_v1 = vld [vmem:[%s2784_s1] ss:$24 sps:$4 sm:$0xff] (!%p134_p3)   ;;  %v2367_v2 = vmov (!%p134_p3), 0  }
   0x7   : > { %137 = sbr.rel (%p134_p3) target bundleno = 442 (0x1ba), region = 28  ;;  %634 = vmatprep.mubr.bf16.mxu0 (!%p134_p3), %v2367_v2  ;;  %714 = vmatprep.mubr.bf16.mxu1 (!%p134_p3), %v2367_v2  ;;  %v2258_v3 = vld [vmem:[%s2784_s1 + $0x34] ss:$24 sps:$4 sm:$0xff] (!%p134_p3)   ;;  %v2260_v4 = vld [vmem:[%s2784_s1 + $0x30] ss:$24 sps:$4 sm:$0xff] (!%p134_p3)  }
   0x8   : > { %602 = vmatprep.subr.bf16.mxu0 (!%p134_p3), %v2255_v0  ;;  %2213 = vmatprep.subr.bf16.mxu1 (!%p134_p3), %v2255_v0  ;;  %v2261_v5 = vld [vmem:[%s2784_s1 + $0x64] ss:$24 sps:$4 sm:$0xff] (!%p134_p3)   ;;  %v2263_v6 = vld [vmem:[%s2784_s1 + $0x60] ss:$24 sps:$4 sm:$0xff] (!%p134_p3)   ;;  %v2264_v7 = vld [vmem:[%s2784_s1 + $0x94] ss:$24 sps:$4 sm:$0xff] (!%p134_p3)  }
   0x9   : > { %603 = vmatpush1.bf16.msra.mxu0 (!%p134_p3), %v2257_v1  ;;  %2221 = vmatpush1.bf16.msra.mxu1 (!%p134_p3), %v2257_v1  ;;  %v2266_v8 = vld [vmem:[%s2784_s1 + $0x90] ss:$24 sps:$4 sm:$0xff] (!%p134_p3)   ;;  %v2267_v9 = vld [vmem:[%s2784_s1 + $0xc4] ss:$24 sps:$4 sm:$0xff] (!%p134_p3)   ;;  %v2269_v10 = vld [vmem:[%s2784_s1 + $0xc0] ss:$24 sps:$4 sm:$0xff] (!%p134_p3)  }
   0xa   : > { %604 = vmatprep.subr.bf16.mxu0 (!%p134_p3), %v2258_v3  ;;  %2214 = vmatprep.subr.bf16.mxu1 (!%p134_p3), %v2258_v3  ;;  %v2270_v11 = vld [vmem:[%s2784_s1 + $0xf4] ss:$24 sps:$4 sm:$0xff] (!%p134_p3)   ;;  %v2272_v12 = vld [vmem:[%s2784_s1 + $0xf0] ss:$24 sps:$4 sm:$0xff] (!%p134_p3)   ;;  %v2273_v13 = vld [vmem:[%s2784_s1 + $0x124] ss:$24 sps:$4 sm:$0xff] (!%p134_p3)  }
   0xb   : > { %v2275_v14 = vld [vmem:[%s2784_s1 + $0x120] ss:$24 sps:$4 sm:$0xff] (!%p134_p3)   ;;  %v2276_v15 = vld [vmem:[%s2784_s1 + $0x154] ss:$24 sps:$4 sm:$0xff] (!%p134_p3)   ;;  %v2278_v16 = vld [vmem:[%s2784_s1 + $0x150] ss:$24 sps:$4 sm:$0xff] (!%p134_p3)  }
   0xc   : > { %v2283_v17 = vld [vmem:[%s2784_s1 + $0xc] ss:$24 sps:$4 sm:$0xff] (!%p134_p3)   ;;  %v2281_v21 = vld [vmem:[%s2784_s1 + $0x8] ss:$24 sps:$4 sm:$0xff] (!%p134_p3)   ;;  %v2289_v23 = vld [vmem:[%s2784_s1 + $0x38] ss:$24 sps:$4 sm:$0xff] (!%p134_p3)  }
   0xd   : > { %605 = vmatpush1.bf16.msra.mxu0 (!%p134_p3), %v2260_v4  ;;  %2222 = vmatpush1.bf16.msra.mxu1 (!%p134_p3), %v2260_v4  ;;  %v2286_v19 = vld [vmem:[%s2784_s1 + $0x14] ss:$24 sps:$4 sm:$0xff] (!%p134_p3)   ;;  %v2284_v22 = vld [vmem:[%s2784_s1 + $0x10] ss:$24 sps:$4 sm:$0xff] (!%p134_p3)   ;;  %v2294_v25 = vld [vmem:[%s2784_s1 + $0x44] ss:$24 sps:$4 sm:$0xff] (!%p134_p3)  }
   0xe   : > { %s2791_s9 = smov (!%p165_p4, %s2357_s9), 1  ;;  %606 = vmatprep.subr.bf16.mxu0 %v2261_v5  ;;  %2215 = vmatprep.subr.bf16.mxu1 %v2261_v5  ;;  %v2291_v24 = vld [vmem:[%s2784_s1 + $0x3c] ss:$24 sps:$4 sm:$0xff]   ;;  %v2292_v26 = vld [vmem:[%s2784_s1 + $0x40] ss:$24 sps:$4 sm:$0xff]  }
   0xf   : > { %s2116_s23 = sshll.u32 %s2791_s9, 7  ;;  %v2299_v27 = vld [vmem:[%s2784_s1 + $0x6c] ss:$24 sps:$4 sm:$0xff]   ;;  %v2297_v31 = vld [vmem:[%s2784_s1 + $0x68] ss:$24 sps:$4 sm:$0xff]  }
  0x10   : > { %s2430_s30 = scalar_lea.vmem %s2783_s0, %s2116_s23  ;;  %v2302_v28 = vld [vmem:[%s2784_s1 + $0x74] ss:$24 sps:$4 sm:$0xff]   ;;  %v2300_v32 = vld [vmem:[%s2784_s1 + $0x70] ss:$24 sps:$4 sm:$0xff]   ;;  %v2310_v34 = vld [vmem:[%s2784_s1 + $0xa4] ss:$24 sps:$4 sm:$0xff]  }
  0x11   : > { %607 = vmatpush1.bf16.msra.mxu0 %v2263_v6  ;;  %2223 = vmatpush1.bf16.msra.mxu1 %v2263_v6  ;;  %v2463_v18 = vld [vmem:[%s2430_s30] sm:$0xff]   ;;  %v2500_v29 = vld [vmem:[%s2430_s30 + $0x8] sm:$0xff]   ;;  %v2307_v33 = vld [vmem:[%s2784_s1 + $0x9c] ss:$24 sps:$4 sm:$0xff]  }
  0x12   : > { %608 = vmatprep.subr.bf16.mxu0 %v2264_v7  ;;  %2216 = vmatprep.subr.bf16.mxu1 %v2264_v7  ;;  %v2469_v20 = vld [vmem:[%s2430_s30 + $0x40] sm:$0xff]   ;;  %v2503_v30 = vld [vmem:[%s2430_s30 + $0x48] sm:$0xff]   ;;  %v2305_v35 = vld [vmem:[%s2784_s1 + $0x98] ss:$24 sps:$4 sm:$0xff]  }
  0x13   : > { %v2308_v36 = vld [vmem:[%s2784_s1 + $0xa0] ss:$24 sps:$4 sm:$0xff]   ;;  %v2315_v37 = vld [vmem:[%s2784_s1 + $0xcc] ss:$24 sps:$4 sm:$0xff]   ;;  %v2534_v39 = vld [vmem:[%s2430_s30 + $0x10] sm:$0xff]  }
  0x14   : > { %v2318_v38 = vld [vmem:[%s2784_s1 + $0xd4] ss:$24 sps:$4 sm:$0xff]   ;;  %v2313_v41 = vld [vmem:[%s2784_s1 + $0xc8] ss:$24 sps:$4 sm:$0xff]   ;;  %v2326_v44 = vld [vmem:[%s2784_s1 + $0x104] ss:$24 sps:$4 sm:$0xff]  }
  0x15   : > { %609 = vmatpush1.bf16.msra.mxu0 %v2266_v8  ;;  %2224 = vmatpush1.bf16.msra.mxu1 %v2266_v8  ;;  %v2537_v40 = vld [vmem:[%s2430_s30 + $0x50] sm:$0xff]   ;;  %v2324_v46 = vld [vmem:[%s2784_s1 + $0x100] ss:$24 sps:$4 sm:$0xff]   ;;  %v2331_v47 = vld [vmem:[%s2784_s1 + $0x12c] ss:$24 sps:$4 sm:$0xff]  }
  0x16   : > { %610 = vmatprep.subr.bf16.mxu0 %v2267_v9  ;;  %2217 = vmatprep.subr.bf16.mxu1 %v2267_v9  ;;  %v2316_v42 = vld [vmem:[%s2784_s1 + $0xd0] ss:$24 sps:$4 sm:$0xff]   ;;  %v2323_v43 = vld [vmem:[%s2784_s1 + $0xfc] ss:$24 sps:$4 sm:$0xff]   ;;  %v2340_v56 = vld [vmem:[%s2784_s1 + $0x160] ss:$24 sps:$4 sm:$0xff]  }
  0x17   : > { %v2321_v45 = vld [vmem:[%s2784_s1 + $0xf8] ss:$24 sps:$4 sm:$0xff]   ;;  %v2334_v48 = vld [vmem:[%s2784_s1 + $0x134] ss:$24 sps:$4 sm:$0xff]   ;;  %v2329_v51 = vld [vmem:[%s2784_s1 + $0x128] ss:$24 sps:$4 sm:$0xff]  }
  0x18   : > { %v2303_v49 = vld [vmem:[%s2430_s30 + $0x18] sm:$0xff]   ;;  %v2332_v52 = vld [vmem:[%s2784_s1 + $0x130] ss:$24 sps:$4 sm:$0xff]   ;;  %v2311_v57 = vld [vmem:[%s2430_s30 + $0x20] sm:$0xff]  }
  0x19   : > { %611 = vmatpush1.bf16.msra.mxu0 %v2269_v10  ;;  %2225 = vmatpush1.bf16.msra.mxu1 %v2269_v10  ;;  %v2569_v50 = vld [vmem:[%s2430_s30 + $0x58] sm:$0xff]   ;;  %v2594_v58 = vld [vmem:[%s2430_s30 + $0x60] sm:$0xff]   ;;  %v2319_v59 = vld [vmem:[%s2430_s30 + $0x28] sm:$0xff]  }
  0x1a   : > { %612 = vmatprep.subr.bf16.mxu0 %v2270_v11  ;;  %2218 = vmatprep.subr.bf16.mxu1 %v2270_v11  ;;  %v2339_v53 = vld [vmem:[%s2784_s1 + $0x15c] ss:$24 sps:$4 sm:$0xff]   ;;  %v2337_v55 = vld [vmem:[%s2784_s1 + $0x158] ss:$24 sps:$4 sm:$0xff]   ;;  %v2601_v60 = vld [vmem:[%s2430_s30 + $0x68] sm:$0xff]  }
  0x1b   : > { %v2342_v54 = vld [vmem:[%s2784_s1 + $0x164] ss:$24 sps:$4 sm:$0xff]   ;;  %v2327_v61 = vld [vmem:[%s2430_s30 + $0x30] sm:$0xff]  }
  0x1c   : > { %v2608_v62 = vld [vmem:[%s2430_s30 + $0x70] sm:$0xff]   ;;  %v2335_v63 = vld [vmem:[%s2430_s30 + $0x38] sm:$0xff]  }
  0x1d   : > { %613 = vmatpush1.bf16.msra.mxu0 %v2272_v12  ;;  %2226 = vmatpush1.bf16.msra.mxu1 %v2272_v12  ;;  %v2615_v0 = vld [vmem:[%s2430_s30 + $0x78] sm:$0xff]   ;;  %s2229_s30 = smul.u32 768, %s2791_s9 }
  0x1e   : > { %614 = vmatprep.subr.bf16.mxu0 %v2273_v13  ;;  %2219 = vmatprep.subr.bf16.mxu1 %v2273_v13 }
  0x1f   : > { %s2676_s22 = scalar_lea.vmem %s2785_s2, %s2229_s30 }
  0x21   : > { %615 = vmatpush1.bf16.msra.mxu0 %v2275_v14  ;;  %2227 = vmatpush1.bf16.msra.mxu1 %v2275_v14 }
  0x22   : > { %616 = vmatprep.subr.bf16.mxu0 %v2276_v15  ;;  %2220 = vmatprep.subr.bf16.mxu1 %v2276_v15 }
  0x25   : > { %617 = vmatpush1.bf16.msra.mxu0 %v2278_v16  ;;  %2228 = vmatpush1.bf16.msra.mxu1 %v2278_v16 }
  0x26   : > { %795 = vmatprep.subr.bf16.mxu1 %v2283_v17  ;;  %988 = vmatprep.subr.bf16.mxu0 %v2286_v19 }
  0x28   : > { %635 = vmatmul.mubr.bf16.vlgmr.msra.gmra.mrb[0].mxu0 %v2463_v18  ;;  %715 = vmatmul.mubr.bf16.vlgmr.msra.gmra.mrb[0].mxu1 %v2469_v20 }
  0x29   : > { %796 = vmatpush1.bf16.msra.mxu1 %v2281_v21  ;;  %989 = vmatpush1.bf16.msra.mxu0 %v2284_v22 }
  0x2a   : > { %644 = vmatprep.mubr.bf16.mxu0 %v2367_v2  ;;  %724 = vmatprep.mubr.bf16.mxu1 %v2367_v2 }
  0x2b   : > { %797 = vmatprep.subr.bf16.mxu1 %v2291_v24  ;;  %990 = vmatprep.subr.bf16.mxu0 %v2294_v25 }
  0x2d   : > { %798 = vmatpush1.bf16.msra.mxu1 %v2289_v23  ;;  %991 = vmatpush1.bf16.msra.mxu0 %v2292_v26 }
  0x2e   : > { %799 = vmatprep.subr.bf16.mxu1 %v2299_v27  ;;  %992 = vmatprep.subr.bf16.mxu0 %v2302_v28 }
  0x30   : > { %645 = vmatmul.mubr.bf16.gmra.mrb[4].mxu0 %v2500_v29  ;;  %725 = vmatmul.mubr.bf16.gmra.mrb[4].mxu1 %v2503_v30 }
  0x31   : > { %654 = vmatprep.mubr.bf16.mxu0 %v2367_v2  ;;  %734 = vmatprep.mubr.bf16.mxu1 %v2367_v2 }
  0x32   : > { %800 = vmatpush1.bf16.msra.mxu1 %v2297_v31  ;;  %993 = vmatpush1.bf16.msra.mxu0 %v2300_v32 }
  0x33   : > { %801 = vmatprep.subr.bf16.mxu1 %v2307_v33  ;;  %994 = vmatprep.subr.bf16.mxu0 %v2310_v34 }
  0x36   : > { %802 = vmatpush1.bf16.msra.mxu1 %v2305_v35  ;;  %995 = vmatpush1.bf16.msra.mxu0 %v2308_v36 }
  0x37   : > { %803 = vmatprep.subr.bf16.mxu1 %v2315_v37  ;;  %996 = vmatprep.subr.bf16.mxu0 %v2318_v38 }
  0x38   : > { %655 = vmatmul.mubr.bf16.gmra.mrb[8].mxu0 %v2534_v39  ;;  %735 = vmatmul.mubr.bf16.gmra.mrb[8].mxu1 %v2537_v40 }
  0x39   : > { %664 = vmatprep.mubr.bf16.mxu0 %v2367_v2  ;;  %744 = vmatprep.mubr.bf16.mxu1 %v2367_v2 }
  0x3a   : > { %804 = vmatpush1.bf16.msra.mxu1 %v2313_v41  ;;  %997 = vmatpush1.bf16.msra.mxu0 %v2316_v42 }
  0x3b   : > { %805 = vmatprep.subr.bf16.mxu1 %v2323_v43  ;;  %998 = vmatprep.subr.bf16.mxu0 %v2326_v44 }
  0x3e   : > { %806 = vmatpush1.bf16.msra.mxu1 %v2321_v45  ;;  %999 = vmatpush1.bf16.msra.mxu0 %v2324_v46 }
  0x3f   : > { %807 = vmatprep.subr.bf16.mxu1 %v2331_v47  ;;  %1000 = vmatprep.subr.bf16.mxu0 %v2334_v48 }
  0x40   : > { %665 = vmatmul.mubr.bf16.gmra.mrb[12].mxu0 %v2303_v49  ;;  %745 = vmatmul.mubr.bf16.gmra.mrb[12].mxu1 %v2569_v50 }
  0x41   : > { %674 = vmatprep.mubr.bf16.mxu0 %v2367_v2  ;;  %754 = vmatprep.mubr.bf16.mxu1 %v2367_v2 }
  0x42   : > { %808 = vmatpush1.bf16.msra.mxu1 %v2329_v51  ;;  %1001 = vmatpush1.bf16.msra.mxu0 %v2332_v52 }
  0x43   : > { %809 = vmatprep.subr.bf16.mxu1 %v2339_v53  ;;  %1002 = vmatprep.subr.bf16.mxu0 %v2342_v54 }
  0x46   : > { %810 = vmatpush1.bf16.msra.mxu1 %v2337_v55  ;;  %1003 = vmatpush1.bf16.msra.mxu0 %v2340_v56 }
  0x48   : > { %675 = vmatmul.mubr.bf16.gmra.mrb[16].mxu0 %v2311_v57  ;;  %755 = vmatmul.mubr.bf16.gmra.mrb[16].mxu1 %v2594_v58 }
  0x49   : > { %684 = vmatprep.mubr.bf16.mxu0 %v2367_v2  ;;  %764 = vmatprep.mubr.bf16.mxu1 %v2367_v2 }
  0x50   : > { %685 = vmatmul.mubr.bf16.gmra.mrb[20].mxu0 %v2319_v59  ;;  %765 = vmatmul.mubr.bf16.gmra.mrb[20].mxu1 %v2601_v60 }
  0x51   : > { %694 = vmatprep.mubr.bf16.mxu0 %v2367_v2  ;;  %774 = vmatprep.mubr.bf16.mxu1 %v2367_v2 }
  0x58   : > { %695 = vmatmul.mubr.bf16.gmra.mrb[24].mxu0 %v2327_v61  ;;  %775 = vmatmul.mubr.bf16.gmra.mrb[24].mxu1 %v2608_v62 }
  0x59   : > { %704 = vmatprep.mubr.bf16.mxu0 %v2367_v2  ;;  %784 = vmatprep.mubr.bf16.mxu1 %v2367_v2 }
  0x60   : > { %705 = vmatmul.mubr.bf16.gmra.mrb[28].mxu0 %v2335_v63  ;;  %785 = vmatmul.mubr.bf16.gmra.mrb[28].mxu1 %v2615_v0 }
  0x61   : > { %827 = vmatprep.mubr.bf16.mxu1 %v2367_v2  ;;  %1020 = vmatprep.mubr.bf16.mxu0 %v2367_v2 }
  0x68   : > { %828 = vmatmul.mubr.bf16.vlgmr.msra.gmra.mrb[32].mxu1 %v2463_v18  ;;  %1021 = vmatmul.mubr.bf16.vlgmr.msra.gmra.mrb[32].mxu0 %v2463_v18 }
  0x69   : > { %837 = vmatprep.mubr.bf16.mxu1 %v2367_v2  ;;  %1030 = vmatprep.mubr.bf16.mxu0 %v2367_v2 }
  0x70   : > { %838 = vmatmul.mubr.bf16.gmra.mrb[36].mxu1 %v2500_v29  ;;  %1031 = vmatmul.mubr.bf16.gmra.mrb[36].mxu0 %v2500_v29 }
  0x71   : > { %847 = vmatprep.mubr.bf16.mxu1 %v2367_v2  ;;  %1040 = vmatprep.mubr.bf16.mxu0 %v2367_v2 }
  0x78   : > { %848 = vmatmul.mubr.bf16.gmra.mrb[40].mxu1 %v2534_v39  ;;  %1041 = vmatmul.mubr.bf16.gmra.mrb[40].mxu0 %v2534_v39 }
  0x79   : > { %857 = vmatprep.mubr.bf16.mxu1 %v2367_v2  ;;  %1050 = vmatprep.mubr.bf16.mxu0 %v2367_v2 }
  0x80   : > { %858 = vmatmul.mubr.bf16.gmra.mrb[44].mxu1 %v2303_v49  ;;  %1051 = vmatmul.mubr.bf16.gmra.mrb[44].mxu0 %v2303_v49 }
  0x81   : > { %867 = vmatprep.mubr.bf16.mxu1 %v2367_v2  ;;  %1060 = vmatprep.mubr.bf16.mxu0 %v2367_v2 }
  0x88   : > { %868 = vmatmul.mubr.bf16.gmra.mrb[48].mxu1 %v2311_v57  ;;  %1061 = vmatmul.mubr.bf16.gmra.mrb[48].mxu0 %v2311_v57 }
  0x89   : > { %877 = vmatprep.mubr.bf16.mxu1 %v2367_v2  ;;  %1070 = vmatprep.mubr.bf16.mxu0 %v2367_v2 }
  0x90   : > { %878 = vmatmul.mubr.bf16.gmra.mrb[52].mxu1 %v2319_v59  ;;  %1071 = vmatmul.mubr.bf16.gmra.mrb[52].mxu0 %v2319_v59 }
  0x91   : > { %887 = vmatprep.mubr.bf16.mxu1 %v2367_v2  ;;  %1080 = vmatprep.mubr.bf16.mxu0 %v2367_v2 }
  0x98   : > { %888 = vmatmul.mubr.bf16.gmra.mrb[56].mxu1 %v2327_v61  ;;  %1081 = vmatmul.mubr.bf16.gmra.mrb[56].mxu0 %v2327_v61 }
  0x99   : > { %897 = vmatprep.mubr.bf16.mxu1 %v2367_v2  ;;  %1090 = vmatprep.mubr.bf16.mxu0 %v2367_v2 }
  0xa0   : > { %898 = vmatmul.mubr.bf16.gmra.mrb[60].mxu1 %v2335_v63  ;;  %1091 = vmatmul.mubr.bf16.gmra.mrb[60].mxu0 %v2335_v63 }
  0xa1   : > { %907 = vmatprep.mubr.bf16.mxu1 %v2367_v2  ;;  %1100 = vmatprep.mubr.bf16.mxu0 %v2367_v2 }
  0xa8   : > { %908 = vmatmul.mubr.bf16.gmra.mrb[64].mxu1 %v2469_v20  ;;  %1101 = vmatmul.mubr.bf16.gmra.mrb[64].mxu0 %v2469_v20 }
  0xa9   : > { %917 = vmatprep.mubr.bf16.mxu1 %v2367_v2  ;;  %1110 = vmatprep.mubr.bf16.mxu0 %v2367_v2 }
  0xb0   : > { %918 = vmatmul.mubr.bf16.gmra.mrb[68].mxu1 %v2503_v30  ;;  %1111 = vmatmul.mubr.bf16.gmra.mrb[68].mxu0 %v2503_v30 }
  0xb1   : > { %927 = vmatprep.mubr.bf16.mxu1 %v2367_v2  ;;  %1120 = vmatprep.mubr.bf16.mxu0 %v2367_v2 }
  0xb8   : > { %928 = vmatmul.mubr.bf16.gmra.mrb[72].mxu1 %v2537_v40  ;;  %1121 = vmatmul.mubr.bf16.gmra.mrb[72].mxu0 %v2537_v40 }
  0xb9   : > { %937 = vmatprep.mubr.bf16.mxu1 %v2367_v2  ;;  %1130 = vmatprep.mubr.bf16.mxu0 %v2367_v2 }
  0xc0   : > { %938 = vmatmul.mubr.bf16.gmra.mrb[76].mxu1 %v2569_v50  ;;  %1131 = vmatmul.mubr.bf16.gmra.mrb[76].mxu0 %v2569_v50 }
  0xc1   : > { %947 = vmatprep.mubr.bf16.mxu1 %v2367_v2  ;;  %1140 = vmatprep.mubr.bf16.mxu0 %v2367_v2 }
  0xc8   : > { %948 = vmatmul.mubr.bf16.gmra.mrb[80].mxu1 %v2594_v58  ;;  %1141 = vmatmul.mubr.bf16.gmra.mrb[80].mxu0 %v2594_v58 }
  0xc9   : > { %957 = vmatprep.mubr.bf16.mxu1 %v2367_v2  ;;  %1150 = vmatprep.mubr.bf16.mxu0 %v2367_v2 }
  0xd0   : > { %958 = vmatmul.mubr.bf16.gmra.mrb[84].mxu1 %v2601_v60  ;;  %1151 = vmatmul.mubr.bf16.gmra.mrb[84].mxu0 %v2601_v60 }
  0xd1   : > { %967 = vmatprep.mubr.bf16.mxu1 %v2367_v2  ;;  %1160 = vmatprep.mubr.bf16.mxu0 %v2367_v2 }
  0xd8   : > { %968 = vmatmul.mubr.bf16.gmra.mrb[88].mxu1 %v2608_v62  ;;  %1161 = vmatmul.mubr.bf16.gmra.mrb[88].mxu0 %v2608_v62 }
  0xd9   : > { %977 = vmatprep.mubr.bf16.mxu1 %v2367_v2  ;;  %1170 = vmatprep.mubr.bf16.mxu0 %v2367_v2 }
  0xe0   : > { %978 = vmatmul.mubr.bf16.gmra.mrb[92].mxu1 %v2615_v0  ;;  %1171 = vmatmul.mubr.bf16.gmra.mrb[92].mxu0 %v2615_v0 }
  0xfb   : > { %v636_v1 = vpop.f32.mrb[0].mxu0  ;;  %v716_v3 = vpop.f32.mrb[0].mxu1 }
  0xfc   : > { %v638_v4 = vpop.f32.mrb[1].mxu0  ;;  %v718_v5 = vpop.f32.mrb[1].mxu1 }
  0xfd   : > { %v2117_v6 = vpack.c.bf16 %v638_v4, %v636_v1  ;;  %v2165_v2 = vpack.c.bf16 %v718_v5, %v716_v3  ;;  %v640_v7 = vpop.f32.mrb[2].mxu0  ;;  %v720_v8 = vpop.f32.mrb[2].mxu1 }
  0xfe   : > { %v642_v9 = vpop.f32.mrb[3].mxu0  ;;  %v722_v10 = vpop.f32.mrb[3].mxu1 }
  0xff   : > { %1757 = vst [vmem:[%s2676_s22] sm:$0xff] %v2117_v6  ;;  %1805 = vst [vmem:[%s2676_s22 + $0x180] sm:$0xff] %v2165_v2  ;;  %v2120_v11 = vpack.c.bf16 %v642_v9, %v640_v7  ;;  %v2168_v12 = vpack.c.bf16 %v722_v10, %v720_v8 }
 0x101   : > { %1760 = vst [vmem:[%s2676_s22 + $0x18] sm:$0xff] %v2120_v11  ;;  %1808 = vst [vmem:[%s2676_s22 + $0x198] sm:$0xff] %v2168_v12 }
 0x103   : > { %v646_v13 = vpop.f32.mrb[4].mxu0  ;;  %v726_v14 = vpop.f32.mrb[4].mxu1 }
 0x104   : > { %v648_v15 = vpop.f32.mrb[5].mxu0  ;;  %v728_v16 = vpop.f32.mrb[5].mxu1 }
 0x105   : > { %v2123_v17 = vpack.c.bf16 %v648_v15, %v646_v13  ;;  %v2171_v18 = vpack.c.bf16 %v728_v16, %v726_v14  ;;  %v650_v19 = vpop.f32.mrb[6].mxu0  ;;  %v730_v20 = vpop.f32.mrb[6].mxu1 }
 0x106   : > { %v652_v21 = vpop.f32.mrb[7].mxu0  ;;  %v732_v22 = vpop.f32.mrb[7].mxu1 }
 0x107   : > { %1763 = vst [vmem:[%s2676_s22 + $0x30] sm:$0xff] %v2123_v17  ;;  %1811 = vst [vmem:[%s2676_s22 + $0x1b0] sm:$0xff] %v2171_v18  ;;  %v2126_v23 = vpack.c.bf16 %v652_v21, %v650_v19  ;;  %v2174_v24 = vpack.c.bf16 %v732_v22, %v730_v20 }
 0x109   : > { %1766 = vst [vmem:[%s2676_s22 + $0x48] sm:$0xff] %v2126_v23  ;;  %1814 = vst [vmem:[%s2676_s22 + $0x1c8] sm:$0xff] %v2174_v24 }
 0x10b   : > { %v656_v25 = vpop.f32.mrb[8].mxu0  ;;  %v736_v26 = vpop.f32.mrb[8].mxu1 }
 0x10c   : > { %v658_v27 = vpop.f32.mrb[9].mxu0  ;;  %v738_v28 = vpop.f32.mrb[9].mxu1 }
 0x10d   : > { %v2129_v29 = vpack.c.bf16 %v658_v27, %v656_v25  ;;  %v2177_v30 = vpack.c.bf16 %v738_v28, %v736_v26  ;;  %v660_v31 = vpop.f32.mrb[10].mxu0  ;;  %v740_v32 = vpop.f32.mrb[10].mxu1 }
 0x10e   : > { %v662_v33 = vpop.f32.mrb[11].mxu0  ;;  %v742_v34 = vpop.f32.mrb[11].mxu1 }
 0x10f   : > { %1769 = vst [vmem:[%s2676_s22 + $0x60] sm:$0xff] %v2129_v29  ;;  %1817 = vst [vmem:[%s2676_s22 + $0x1e0] sm:$0xff] %v2177_v30  ;;  %v2132_v35 = vpack.c.bf16 %v662_v33, %v660_v31  ;;  %v2180_v36 = vpack.c.bf16 %v742_v34, %v740_v32 }
 0x111   : > { %1772 = vst [vmem:[%s2676_s22 + $0x78] sm:$0xff] %v2132_v35  ;;  %1820 = vst [vmem:[%s2676_s22 + $0x1f8] sm:$0xff] %v2180_v36 }
 0x113   : > { %v666_v37 = vpop.f32.mrb[12].mxu0  ;;  %v746_v38 = vpop.f32.mrb[12].mxu1 }
 0x114   : > { %v668_v39 = vpop.f32.mrb[13].mxu0  ;;  %v748_v40 = vpop.f32.mrb[13].mxu1 }
 0x115   : > { %v2135_v41 = vpack.c.bf16 %v668_v39, %v666_v37  ;;  %v2183_v42 = vpack.c.bf16 %v748_v40, %v746_v38  ;;  %v670_v43 = vpop.f32.mrb[14].mxu0  ;;  %v750_v44 = vpop.f32.mrb[14].mxu1 }
 0x116   : > { %v672_v45 = vpop.f32.mrb[15].mxu0  ;;  %v752_v46 = vpop.f32.mrb[15].mxu1 }
 0x117   : > { %1775 = vst [vmem:[%s2676_s22 + $0x90] sm:$0xff] %v2135_v41  ;;  %1823 = vst [vmem:[%s2676_s22 + $0x210] sm:$0xff] %v2183_v42  ;;  %v2138_v47 = vpack.c.bf16 %v672_v45, %v670_v43  ;;  %v2186_v48 = vpack.c.bf16 %v752_v46, %v750_v44 }
 0x119   : > { %1778 = vst [vmem:[%s2676_s22 + $0xa8] sm:$0xff] %v2138_v47  ;;  %1826 = vst [vmem:[%s2676_s22 + $0x228] sm:$0xff] %v2186_v48 }
 0x11b   : > { %v676_v49 = vpop.f32.mrb[16].mxu0  ;;  %v756_v50 = vpop.f32.mrb[16].mxu1 }
 0x11c   : > { %v678_v51 = vpop.f32.mrb[17].mxu0  ;;  %v758_v52 = vpop.f32.mrb[17].mxu1 }
 0x11d   : > { %v2141_v53 = vpack.c.bf16 %v678_v51, %v676_v49  ;;  %v2189_v54 = vpack.c.bf16 %v758_v52, %v756_v50  ;;  %v680_v55 = vpop.f32.mrb[18].mxu0  ;;  %v760_v56 = vpop.f32.mrb[18].mxu1 }
 0x11e   : > { %v682_v57 = vpop.f32.mrb[19].mxu0  ;;  %v762_v58 = vpop.f32.mrb[19].mxu1 }
 0x11f   : > { %1781 = vst [vmem:[%s2676_s22 + $0xc0] sm:$0xff] %v2141_v53  ;;  %1829 = vst [vmem:[%s2676_s22 + $0x240] sm:$0xff] %v2189_v54  ;;  %v2144_v59 = vpack.c.bf16 %v682_v57, %v680_v55  ;;  %v2192_v60 = vpack.c.bf16 %v762_v58, %v760_v56 }
 0x121   : > { %1784 = vst [vmem:[%s2676_s22 + $0xd8] sm:$0xff] %v2144_v59  ;;  %1832 = vst [vmem:[%s2676_s22 + $0x258] sm:$0xff] %v2192_v60 }
 0x123   : > { %v686_v61 = vpop.f32.mrb[20].mxu0  ;;  %v766_v62 = vpop.f32.mrb[20].mxu1 }
 0x124   : > { %v688_v63 = vpop.f32.mrb[21].mxu0  ;;  %v768_v0 = vpop.f32.mrb[21].mxu1 }
 0x125   : > { %v2147_v1 = vpack.c.bf16 %v688_v63, %v686_v61  ;;  %v2195_v3 = vpack.c.bf16 %v768_v0, %v766_v62  ;;  %v690_v4 = vpop.f32.mrb[22].mxu0  ;;  %v770_v5 = vpop.f32.mrb[22].mxu1 }
 0x126   : > { %v692_v6 = vpop.f32.mrb[23].mxu0  ;;  %v772_v2 = vpop.f32.mrb[23].mxu1 }
 0x127   : > { %1787 = vst [vmem:[%s2676_s22 + $0xf0] sm:$0xff] %v2147_v1  ;;  %1835 = vst [vmem:[%s2676_s22 + $0x270] sm:$0xff] %v2195_v3  ;;  %v2150_v7 = vpack.c.bf16 %v692_v6, %v690_v4  ;;  %v2198_v8 = vpack.c.bf16 %v772_v2, %v770_v5 }
 0x129   : > { %1790 = vst [vmem:[%s2676_s22 + $0x108] sm:$0xff] %v2150_v7  ;;  %1838 = vst [vmem:[%s2676_s22 + $0x288] sm:$0xff] %v2198_v8 }
 0x12b   : > { %v696_v9 = vpop.f32.mrb[24].mxu0  ;;  %v776_v10 = vpop.f32.mrb[24].mxu1 }
 0x12c   : > { %v698_v11 = vpop.f32.mrb[25].mxu0  ;;  %v778_v12 = vpop.f32.mrb[25].mxu1 }
 0x12d   : > { %v2153_v13 = vpack.c.bf16 %v698_v11, %v696_v9  ;;  %v2201_v14 = vpack.c.bf16 %v778_v12, %v776_v10  ;;  %v700_v15 = vpop.f32.mrb[26].mxu0  ;;  %v780_v16 = vpop.f32.mrb[26].mxu1 }
 0x12e   : > { %v702_v17 = vpop.f32.mrb[27].mxu0  ;;  %v782_v18 = vpop.f32.mrb[27].mxu1 }
 0x12f   : > { %1793 = vst [vmem:[%s2676_s22 + $0x120] sm:$0xff] %v2153_v13  ;;  %1841 = vst [vmem:[%s2676_s22 + $0x2a0] sm:$0xff] %v2201_v14  ;;  %v2156_v19 = vpack.c.bf16 %v702_v17, %v700_v15  ;;  %v2204_v20 = vpack.c.bf16 %v782_v18, %v780_v16 }
 0x131   : > { %1796 = vst [vmem:[%s2676_s22 + $0x138] sm:$0xff] %v2156_v19  ;;  %1844 = vst [vmem:[%s2676_s22 + $0x2b8] sm:$0xff] %v2204_v20 }
 0x133   : > { %v706_v21 = vpop.f32.mrb[28].mxu0  ;;  %v786_v22 = vpop.f32.mrb[28].mxu1 }
 0x134   : > { %v708_v23 = vpop.f32.mrb[29].mxu0  ;;  %v788_v24 = vpop.f32.mrb[29].mxu1 }
 0x135   : > { %v2159_v25 = vpack.c.bf16 %v708_v23, %v706_v21  ;;  %v2207_v26 = vpack.c.bf16 %v788_v24, %v786_v22  ;;  %v710_v27 = vpop.f32.mrb[30].mxu0  ;;  %v790_v28 = vpop.f32.mrb[30].mxu1 }
 0x136   : > { %v712_v29 = vpop.f32.mrb[31].mxu0  ;;  %v792_v30 = vpop.f32.mrb[31].mxu1 }
 0x137   : > { %1799 = vst [vmem:[%s2676_s22 + $0x150] sm:$0xff] %v2159_v25  ;;  %1847 = vst [vmem:[%s2676_s22 + $0x2d0] sm:$0xff] %v2207_v26  ;;  %v2162_v31 = vpack.c.bf16 %v712_v29, %v710_v27  ;;  %v2210_v32 = vpack.c.bf16 %v792_v30, %v790_v28 }
 0x139   : > { %1802 = vst [vmem:[%s2676_s22 + $0x168] sm:$0xff] %v2162_v31  ;;  %1850 = vst [vmem:[%s2676_s22 + $0x2e8] sm:$0xff] %v2210_v32 }
 0x13b   : > { %v829_v33 = vpop.f32.mrb[32].mxu1  ;;  %v1022_v34 = vpop.f32.mrb[32].mxu0 }
 0x13c   : > { %v831_v35 = vpop.f32.mrb[33].mxu1  ;;  %v1024_v36 = vpop.f32.mrb[33].mxu0 }
 0x13d   : > { %v2118_v37 = vpack.c.bf16 %v831_v35, %v829_v33  ;;  %v2119_v38 = vpack.c.bf16 %v1024_v36, %v1022_v34  ;;  %v833_v39 = vpop.f32.mrb[34].mxu1  ;;  %v1026_v40 = vpop.f32.mrb[34].mxu0 }
 0x13e   : > { %v835_v41 = vpop.f32.mrb[35].mxu1  ;;  %v1028_v42 = vpop.f32.mrb[35].mxu0 }
 0x13f   : > { %1758 = vst [vmem:[%s2676_s22 + $0x8] sm:$0xff] %v2118_v37  ;;  %1759 = vst [vmem:[%s2676_s22 + $0x10] sm:$0xff] %v2119_v38  ;;  %v2121_v43 = vpack.c.bf16 %v835_v41, %v833_v39  ;;  %v2122_v44 = vpack.c.bf16 %v1028_v42, %v1026_v40 }
 0x141   : > { %1761 = vst [vmem:[%s2676_s22 + $0x20] sm:$0xff] %v2121_v43  ;;  %1762 = vst [vmem:[%s2676_s22 + $0x28] sm:$0xff] %v2122_v44 }
 0x143   : > { %v839_v45 = vpop.f32.mrb[36].mxu1  ;;  %v1032_v46 = vpop.f32.mrb[36].mxu0 }
 0x144   : > { %v841_v47 = vpop.f32.mrb[37].mxu1  ;;  %v1034_v48 = vpop.f32.mrb[37].mxu0 }
 0x145   : > { %v2124_v49 = vpack.c.bf16 %v841_v47, %v839_v45  ;;  %v2125_v50 = vpack.c.bf16 %v1034_v48, %v1032_v46  ;;  %v843_v51 = vpop.f32.mrb[38].mxu1  ;;  %v1036_v52 = vpop.f32.mrb[38].mxu0 }
 0x146   : > { %v845_v53 = vpop.f32.mrb[39].mxu1  ;;  %v1038_v54 = vpop.f32.mrb[39].mxu0 }
 0x147   : > { %1764 = vst [vmem:[%s2676_s22 + $0x38] sm:$0xff] %v2124_v49  ;;  %1765 = vst [vmem:[%s2676_s22 + $0x40] sm:$0xff] %v2125_v50  ;;  %v2127_v55 = vpack.c.bf16 %v845_v53, %v843_v51  ;;  %v2128_v56 = vpack.c.bf16 %v1038_v54, %v1036_v52 }
 0x149   : > { %1767 = vst [vmem:[%s2676_s22 + $0x50] sm:$0xff] %v2127_v55  ;;  %1768 = vst [vmem:[%s2676_s22 + $0x58] sm:$0xff] %v2128_v56 }
 0x14b   : > { %v849_v57 = vpop.f32.mrb[40].mxu1  ;;  %v1042_v58 = vpop.f32.mrb[40].mxu0 }
 0x14c   : > { %v851_v59 = vpop.f32.mrb[41].mxu1  ;;  %v1044_v60 = vpop.f32.mrb[41].mxu0 }
 0x14d   : > { %v2130_v61 = vpack.c.bf16 %v851_v59, %v849_v57  ;;  %v2131_v62 = vpack.c.bf16 %v1044_v60, %v1042_v58  ;;  %v853_v63 = vpop.f32.mrb[42].mxu1  ;;  %v1046_v0 = vpop.f32.mrb[42].mxu0 }
 0x14e   : > { %v855_v1 = vpop.f32.mrb[43].mxu1  ;;  %v1048_v3 = vpop.f32.mrb[43].mxu0 }
 0x14f   : > { %1770 = vst [vmem:[%s2676_s22 + $0x68] sm:$0xff] %v2130_v61  ;;  %1771 = vst [vmem:[%s2676_s22 + $0x70] sm:$0xff] %v2131_v62  ;;  %v2133_v4 = vpack.c.bf16 %v855_v1, %v853_v63  ;;  %v2134_v5 = vpack.c.bf16 %v1048_v3, %v1046_v0 }
 0x151   : > { %1773 = vst [vmem:[%s2676_s22 + $0x80] sm:$0xff] %v2133_v4  ;;  %1774 = vst [vmem:[%s2676_s22 + $0x88] sm:$0xff] %v2134_v5 }
 0x153   : > { %v859_v6 = vpop.f32.mrb[44].mxu1  ;;  %v1052_v2 = vpop.f32.mrb[44].mxu0 }
 0x154   : > { %v861_v7 = vpop.f32.mrb[45].mxu1  ;;  %v1054_v8 = vpop.f32.mrb[45].mxu0 }
 0x155   : > { %v2136_v9 = vpack.c.bf16 %v861_v7, %v859_v6  ;;  %v2137_v10 = vpack.c.bf16 %v1054_v8, %v1052_v2  ;;  %v863_v11 = vpop.f32.mrb[46].mxu1  ;;  %v1056_v12 = vpop.f32.mrb[46].mxu0 }
 0x156   : > { %v865_v13 = vpop.f32.mrb[47].mxu1  ;;  %v1058_v14 = vpop.f32.mrb[47].mxu0 }
 0x157   : > { %1776 = vst [vmem:[%s2676_s22 + $0x98] sm:$0xff] %v2136_v9  ;;  %1777 = vst [vmem:[%s2676_s22 + $0xa0] sm:$0xff] %v2137_v10  ;;  %v2139_v15 = vpack.c.bf16 %v865_v13, %v863_v11  ;;  %v2140_v16 = vpack.c.bf16 %v1058_v14, %v1056_v12 }
 0x159   : > { %1779 = vst [vmem:[%s2676_s22 + $0xb0] sm:$0xff] %v2139_v15  ;;  %1780 = vst [vmem:[%s2676_s22 + $0xb8] sm:$0xff] %v2140_v16 }
 0x15b   : > { %v869_v17 = vpop.f32.mrb[48].mxu1  ;;  %v1062_v18 = vpop.f32.mrb[48].mxu0 }
 0x15c   : > { %v871_v19 = vpop.f32.mrb[49].mxu1  ;;  %v1064_v20 = vpop.f32.mrb[49].mxu0 }
 0x15d   : > { %v2142_v21 = vpack.c.bf16 %v871_v19, %v869_v17  ;;  %v2143_v22 = vpack.c.bf16 %v1064_v20, %v1062_v18  ;;  %v873_v23 = vpop.f32.mrb[50].mxu1  ;;  %v1066_v24 = vpop.f32.mrb[50].mxu0 }
 0x15e   : > { %v875_v25 = vpop.f32.mrb[51].mxu1  ;;  %v1068_v26 = vpop.f32.mrb[51].mxu0 }
 0x15f   : > { %1782 = vst [vmem:[%s2676_s22 + $0xc8] sm:$0xff] %v2142_v21  ;;  %1783 = vst [vmem:[%s2676_s22 + $0xd0] sm:$0xff] %v2143_v22  ;;  %v2145_v27 = vpack.c.bf16 %v875_v25, %v873_v23  ;;  %v2146_v28 = vpack.c.bf16 %v1068_v26, %v1066_v24 }
 0x161   : > { %1785 = vst [vmem:[%s2676_s22 + $0xe0] sm:$0xff] %v2145_v27  ;;  %1786 = vst [vmem:[%s2676_s22 + $0xe8] sm:$0xff] %v2146_v28 }
 0x163   : > { %v879_v29 = vpop.f32.mrb[52].mxu1  ;;  %v1072_v30 = vpop.f32.mrb[52].mxu0 }
 0x164   : > { %v881_v31 = vpop.f32.mrb[53].mxu1  ;;  %v1074_v32 = vpop.f32.mrb[53].mxu0 }
 0x165   : > { %v2148_v33 = vpack.c.bf16 %v881_v31, %v879_v29  ;;  %v2149_v34 = vpack.c.bf16 %v1074_v32, %v1072_v30  ;;  %v883_v35 = vpop.f32.mrb[54].mxu1  ;;  %v1076_v36 = vpop.f32.mrb[54].mxu0 }
 0x166   : > { %v885_v37 = vpop.f32.mrb[55].mxu1  ;;  %v1078_v38 = vpop.f32.mrb[55].mxu0 }
 0x167   : > { %1788 = vst [vmem:[%s2676_s22 + $0xf8] sm:$0xff] %v2148_v33  ;;  %1789 = vst [vmem:[%s2676_s22 + $0x100] sm:$0xff] %v2149_v34  ;;  %v2151_v39 = vpack.c.bf16 %v885_v37, %v883_v35  ;;  %v2152_v40 = vpack.c.bf16 %v1078_v38, %v1076_v36 }
 0x169   : > { %1791 = vst [vmem:[%s2676_s22 + $0x110] sm:$0xff] %v2151_v39  ;;  %1792 = vst [vmem:[%s2676_s22 + $0x118] sm:$0xff] %v2152_v40 }
 0x16b   : > { %v889_v41 = vpop.f32.mrb[56].mxu1  ;;  %v1082_v42 = vpop.f32.mrb[56].mxu0 }
 0x16c   : > { %v891_v43 = vpop.f32.mrb[57].mxu1  ;;  %v1084_v44 = vpop.f32.mrb[57].mxu0 }
 0x16d   : > { %v2154_v45 = vpack.c.bf16 %v891_v43, %v889_v41  ;;  %v2155_v46 = vpack.c.bf16 %v1084_v44, %v1082_v42  ;;  %v893_v47 = vpop.f32.mrb[58].mxu1  ;;  %v1086_v48 = vpop.f32.mrb[58].mxu0 }
 0x16e   : > { %v895_v49 = vpop.f32.mrb[59].mxu1  ;;  %v1088_v50 = vpop.f32.mrb[59].mxu0 }
 0x16f   : > { %1794 = vst [vmem:[%s2676_s22 + $0x128] sm:$0xff] %v2154_v45  ;;  %1795 = vst [vmem:[%s2676_s22 + $0x130] sm:$0xff] %v2155_v46  ;;  %v2157_v51 = vpack.c.bf16 %v895_v49, %v893_v47  ;;  %v2158_v52 = vpack.c.bf16 %v1088_v50, %v1086_v48 }
 0x171   : > { %1797 = vst [vmem:[%s2676_s22 + $0x140] sm:$0xff] %v2157_v51  ;;  %1798 = vst [vmem:[%s2676_s22 + $0x148] sm:$0xff] %v2158_v52 }
 0x173   : > { %v899_v53 = vpop.f32.mrb[60].mxu1  ;;  %v1092_v54 = vpop.f32.mrb[60].mxu0 }
 0x174   : > { %v901_v55 = vpop.f32.mrb[61].mxu1  ;;  %v1094_v56 = vpop.f32.mrb[61].mxu0 }
 0x175   : > { %v2160_v57 = vpack.c.bf16 %v901_v55, %v899_v53  ;;  %v2161_v58 = vpack.c.bf16 %v1094_v56, %v1092_v54  ;;  %v903_v59 = vpop.f32.mrb[62].mxu1  ;;  %v1096_v60 = vpop.f32.mrb[62].mxu0 }
 0x176   : > { %v905_v61 = vpop.f32.mrb[63].mxu1  ;;  %v1098_v62 = vpop.f32.mrb[63].mxu0 }
 0x177   : > { %1800 = vst [vmem:[%s2676_s22 + $0x158] sm:$0xff] %v2160_v57  ;;  %1801 = vst [vmem:[%s2676_s22 + $0x160] sm:$0xff] %v2161_v58  ;;  %v2163_v63 = vpack.c.bf16 %v905_v61, %v903_v59  ;;  %v2164_v0 = vpack.c.bf16 %v1098_v62, %v1096_v60 }
 0x179   : > { %1803 = vst [vmem:[%s2676_s22 + $0x170] sm:$0xff] %v2163_v63  ;;  %1804 = vst [vmem:[%s2676_s22 + $0x178] sm:$0xff] %v2164_v0 }
 0x17b   : > { %v909_v1 = vpop.f32.mrb[64].mxu1  ;;  %v1102_v3 = vpop.f32.mrb[64].mxu0 }
 0x17c   : > { %v911_v4 = vpop.f32.mrb[65].mxu1  ;;  %v1104_v5 = vpop.f32.mrb[65].mxu0 }
 0x17d   : > { %v2166_v6 = vpack.c.bf16 %v911_v4, %v909_v1  ;;  %v2167_v2 = vpack.c.bf16 %v1104_v5, %v1102_v3  ;;  %v913_v7 = vpop.f32.mrb[66].mxu1  ;;  %v1106_v8 = vpop.f32.mrb[66].mxu0 }
 0x17e   : > { %v915_v9 = vpop.f32.mrb[67].mxu1  ;;  %v1108_v10 = vpop.f32.mrb[67].mxu0 }
 0x17f   : > { %1806 = vst [vmem:[%s2676_s22 + $0x188] sm:$0xff] %v2166_v6  ;;  %1807 = vst [vmem:[%s2676_s22 + $0x190] sm:$0xff] %v2167_v2  ;;  %v2169_v11 = vpack.c.bf16 %v915_v9, %v913_v7  ;;  %v2170_v12 = vpack.c.bf16 %v1108_v10, %v1106_v8 }
 0x181   : > { %1809 = vst [vmem:[%s2676_s22 + $0x1a0] sm:$0xff] %v2169_v11  ;;  %1810 = vst [vmem:[%s2676_s22 + $0x1a8] sm:$0xff] %v2170_v12 }
 0x183   : > { %v919_v13 = vpop.f32.mrb[68].mxu1  ;;  %v1112_v14 = vpop.f32.mrb[68].mxu0 }
 0x184   : > { %v921_v15 = vpop.f32.mrb[69].mxu1  ;;  %v1114_v16 = vpop.f32.mrb[69].mxu0 }
 0x185   : > { %v2172_v17 = vpack.c.bf16 %v921_v15, %v919_v13  ;;  %v2173_v18 = vpack.c.bf16 %v1114_v16, %v1112_v14  ;;  %v923_v19 = vpop.f32.mrb[70].mxu1  ;;  %v1116_v20 = vpop.f32.mrb[70].mxu0 }
 0x186   : > { %v925_v21 = vpop.f32.mrb[71].mxu1  ;;  %v1118_v22 = vpop.f32.mrb[71].mxu0 }
 0x187   : > { %1812 = vst [vmem:[%s2676_s22 + $0x1b8] sm:$0xff] %v2172_v17  ;;  %1813 = vst [vmem:[%s2676_s22 + $0x1c0] sm:$0xff] %v2173_v18  ;;  %v2175_v23 = vpack.c.bf16 %v925_v21, %v923_v19  ;;  %v2176_v24 = vpack.c.bf16 %v1118_v22, %v1116_v20 }
 0x189   : > { %1815 = vst [vmem:[%s2676_s22 + $0x1d0] sm:$0xff] %v2175_v23  ;;  %1816 = vst [vmem:[%s2676_s22 + $0x1d8] sm:$0xff] %v2176_v24 }
 0x18b   : > { %v929_v25 = vpop.f32.mrb[72].mxu1  ;;  %v1122_v26 = vpop.f32.mrb[72].mxu0 }
 0x18c   : > { %v931_v27 = vpop.f32.mrb[73].mxu1  ;;  %v1124_v28 = vpop.f32.mrb[73].mxu0 }
 0x18d   : > { %v2178_v29 = vpack.c.bf16 %v931_v27, %v929_v25  ;;  %v2179_v30 = vpack.c.bf16 %v1124_v28, %v1122_v26  ;;  %v933_v31 = vpop.f32.mrb[74].mxu1  ;;  %v1126_v32 = vpop.f32.mrb[74].mxu0 }
 0x18e   : > { %v935_v33 = vpop.f32.mrb[75].mxu1  ;;  %v1128_v34 = vpop.f32.mrb[75].mxu0 }
 0x18f   : > { %1818 = vst [vmem:[%s2676_s22 + $0x1e8] sm:$0xff] %v2178_v29  ;;  %1819 = vst [vmem:[%s2676_s22 + $0x1f0] sm:$0xff] %v2179_v30  ;;  %v2181_v35 = vpack.c.bf16 %v935_v33, %v933_v31  ;;  %v2182_v36 = vpack.c.bf16 %v1128_v34, %v1126_v32 }
 0x191   : > { %1821 = vst [vmem:[%s2676_s22 + $0x200] sm:$0xff] %v2181_v35  ;;  %1822 = vst [vmem:[%s2676_s22 + $0x208] sm:$0xff] %v2182_v36 }
 0x193   : > { %v939_v37 = vpop.f32.mrb[76].mxu1  ;;  %v1132_v38 = vpop.f32.mrb[76].mxu0 }
 0x194   : > { %v941_v39 = vpop.f32.mrb[77].mxu1  ;;  %v1134_v40 = vpop.f32.mrb[77].mxu0 }
 0x195   : > { %v2184_v41 = vpack.c.bf16 %v941_v39, %v939_v37  ;;  %v2185_v42 = vpack.c.bf16 %v1134_v40, %v1132_v38  ;;  %v943_v43 = vpop.f32.mrb[78].mxu1  ;;  %v1136_v44 = vpop.f32.mrb[78].mxu0 }
 0x196   : > { %v945_v45 = vpop.f32.mrb[79].mxu1  ;;  %v1138_v46 = vpop.f32.mrb[79].mxu0 }
 0x197   : > { %1824 = vst [vmem:[%s2676_s22 + $0x218] sm:$0xff] %v2184_v41  ;;  %1825 = vst [vmem:[%s2676_s22 + $0x220] sm:$0xff] %v2185_v42  ;;  %v2187_v47 = vpack.c.bf16 %v945_v45, %v943_v43  ;;  %v2188_v48 = vpack.c.bf16 %v1138_v46, %v1136_v44 }
 0x199   : > { %1827 = vst [vmem:[%s2676_s22 + $0x230] sm:$0xff] %v2187_v47  ;;  %1828 = vst [vmem:[%s2676_s22 + $0x238] sm:$0xff] %v2188_v48 }
 0x19b   : > { %v949_v49 = vpop.f32.mrb[80].mxu1  ;;  %v1142_v50 = vpop.f32.mrb[80].mxu0 }
 0x19c   : > { %v951_v51 = vpop.f32.mrb[81].mxu1  ;;  %v1144_v52 = vpop.f32.mrb[81].mxu0 }
 0x19d   : > { %v2190_v53 = vpack.c.bf16 %v951_v51, %v949_v49  ;;  %v2191_v54 = vpack.c.bf16 %v1144_v52, %v1142_v50  ;;  %v953_v55 = vpop.f32.mrb[82].mxu1  ;;  %v1146_v56 = vpop.f32.mrb[82].mxu0 }
 0x19e   : > { %v955_v57 = vpop.f32.mrb[83].mxu1  ;;  %v1148_v58 = vpop.f32.mrb[83].mxu0 }
 0x19f   : > { %1830 = vst [vmem:[%s2676_s22 + $0x248] sm:$0xff] %v2190_v53  ;;  %1831 = vst [vmem:[%s2676_s22 + $0x250] sm:$0xff] %v2191_v54  ;;  %v2193_v59 = vpack.c.bf16 %v955_v57, %v953_v55  ;;  %v2194_v60 = vpack.c.bf16 %v1148_v58, %v1146_v56 }
 0x1a1   : > { %1833 = vst [vmem:[%s2676_s22 + $0x260] sm:$0xff] %v2193_v59  ;;  %1834 = vst [vmem:[%s2676_s22 + $0x268] sm:$0xff] %v2194_v60 }
 0x1a3   : > { %v959_v61 = vpop.f32.mrb[84].mxu1  ;;  %v1152_v62 = vpop.f32.mrb[84].mxu0 }
 0x1a4   : > { %v961_v63 = vpop.f32.mrb[85].mxu1  ;;  %v1154_v0 = vpop.f32.mrb[85].mxu0 }
 0x1a5   : > { %v2196_v1 = vpack.c.bf16 %v961_v63, %v959_v61  ;;  %v2197_v3 = vpack.c.bf16 %v1154_v0, %v1152_v62  ;;  %v963_v4 = vpop.f32.mrb[86].mxu1  ;;  %v1156_v5 = vpop.f32.mrb[86].mxu0 }
 0x1a6   : > { %v965_v6 = vpop.f32.mrb[87].mxu1  ;;  %v1158_v2 = vpop.f32.mrb[87].mxu0 }
 0x1a7   : > { %1836 = vst [vmem:[%s2676_s22 + $0x278] sm:$0xff] %v2196_v1  ;;  %1837 = vst [vmem:[%s2676_s22 + $0x280] sm:$0xff] %v2197_v3  ;;  %v2199_v7 = vpack.c.bf16 %v965_v6, %v963_v4  ;;  %v2200_v8 = vpack.c.bf16 %v1158_v2, %v1156_v5 }
 0x1a9   : > { %1839 = vst [vmem:[%s2676_s22 + $0x290] sm:$0xff] %v2199_v7  ;;  %1840 = vst [vmem:[%s2676_s22 + $0x298] sm:$0xff] %v2200_v8 }
 0x1ab   : > { %v969_v9 = vpop.f32.mrb[88].mxu1  ;;  %v1162_v10 = vpop.f32.mrb[88].mxu0 }
 0x1ac   : > { %v971_v11 = vpop.f32.mrb[89].mxu1  ;;  %v1164_v12 = vpop.f32.mrb[89].mxu0 }
 0x1ad   : > { %v2202_v13 = vpack.c.bf16 %v971_v11, %v969_v9  ;;  %v2203_v14 = vpack.c.bf16 %v1164_v12, %v1162_v10  ;;  %v973_v15 = vpop.f32.mrb[90].mxu1  ;;  %v1166_v16 = vpop.f32.mrb[90].mxu0 }
 0x1ae   : > { %v975_v17 = vpop.f32.mrb[91].mxu1  ;;  %v1168_v18 = vpop.f32.mrb[91].mxu0 }
 0x1af   : > { %1842 = vst [vmem:[%s2676_s22 + $0x2a8] sm:$0xff] %v2202_v13  ;;  %1843 = vst [vmem:[%s2676_s22 + $0x2b0] sm:$0xff] %v2203_v14  ;;  %v2205_v19 = vpack.c.bf16 %v975_v17, %v973_v15  ;;  %v2206_v20 = vpack.c.bf16 %v1168_v18, %v1166_v16 }
 0x1b1   : > { %1845 = vst [vmem:[%s2676_s22 + $0x2c0] sm:$0xff] %v2205_v19  ;;  %1846 = vst [vmem:[%s2676_s22 + $0x2c8] sm:$0xff] %v2206_v20 }
 0x1b3   : > { %v979_v21 = vpop.f32.mrb[92].mxu1  ;;  %v1172_v22 = vpop.f32.mrb[92].mxu0 }
 0x1b4   : > { %v981_v23 = vpop.f32.mrb[93].mxu1  ;;  %v1174_v24 = vpop.f32.mrb[93].mxu0 }
 0x1b5   : > { %v2208_v25 = vpack.c.bf16 %v981_v23, %v979_v21  ;;  %v2209_v26 = vpack.c.bf16 %v1174_v24, %v1172_v22  ;;  %v983_v27 = vpop.f32.mrb[94].mxu1  ;;  %v1176_v28 = vpop.f32.mrb[94].mxu0 }
 0x1b6   : > { %v985_v29 = vpop.f32.mrb[95].mxu1  ;;  %v1178_v30 = vpop.f32.mrb[95].mxu0 }
 0x1b7   : > { %1848 = vst [vmem:[%s2676_s22 + $0x2d8] sm:$0xff] %v2208_v25  ;;  %1849 = vst [vmem:[%s2676_s22 + $0x2e0] sm:$0xff] %v2209_v26  ;;  %v2211_v31 = vpack.c.bf16 %v985_v29, %v983_v27  ;;  %v2212_v32 = vpack.c.bf16 %v1178_v30, %v1176_v28 }
 0x1b9   : > { %1851 = vst [vmem:[%s2676_s22 + $0x2f0] sm:$0xff] %v2211_v31  ;;  %1852 = vst [vmem:[%s2676_s22 + $0x2f8] sm:$0xff] %v2212_v32 }
 0x1ba PF: > { %s12_s11 = sadd.s32 1, %s2365_s11   ;;  %s2786_s9 = smov %s2361_s10 }
 0x1bb   : > { %p9_p5 = scmp.ge.s32.totalorder %s12_s11, 4   ;;  %s2787_s10 = smov %s2789_s12 }
 0x1bd   :  { %11 = sbr.rel (!%p9_p5) target bundleno = 2 (0x2), region = 58 }

// kernel: multi_head_attention.4
= control target key start
LH: loop header
LB: loop body
LE: loop exit
PB: predicated region body
PF: predicated region fallthrough
CT: control target
= control target key end

     0   :  { %s6188_s0 = inlined_call_operand.vmem [shape: bf16[2,256,768], index: 0, kind: input, shape index: {}, may-alias: {0,1,2}]   ;;  %s6189_s1 = inlined_call_operand.vmem [shape: bf16[2,256,768], index: 1, kind: input, shape index: {}, may-alias: {0,1,2}]   ;;  %s6190_s2 = inlined_call_operand.vmem [shape: bf16[2,256,768], index: 2, kind: input, shape index: {}, may-alias: {0,1,2}]   ;;  %s6191_s3 = inlined_call_operand.vmem [shape: bf16[2,256,256], index: 3, kind: output, shape index: {}]  }
   0x1   :  { %6266 = sst [smem:[#allocation76_spill]] %s6191_s3 }
   0x2   :  { %s4510_s12 = smov 0   ;;  %s4512_s13 = smov 0  }
   0x3   :  { %s4514_s14 = smov 0   ;;  %s4516_s15 = smov 0  }
   0x4   :  { %s4518_s16 = smov 0   ;;  %s4520_s17 = smov 0  }
   0x5   :  { %s4522_s18 = smov 0   ;;  %s4524_s19 = smov 0  }
   0x6   :  { %s4526_s20 = smov 0   ;;  %s4528_s21 = smov 0  }
   0x7   :  { %s4530_s22 = smov 0  }
   0x8 LB: > { %s35_s24 = sadd.s32 1, %s4477_s20  ;;  %s39_s25 = sadd.s32 1, %s4481_s21  ;;  %s4485_s22 = sphi %s4530_s22, %s13_s22   ;;  %s4481_s21 = sphi %s4528_s21, %s6471_s21   ;;  %s4477_s20 = sphi %s4526_s20, %s6470_s20   ;;  %s4473_s19 = sphi %s4524_s19, %s6469_s19   ;;  %s4469_s18 = sphi %s4522_s18, %s6468_s18   ;;  %s4465_s17 = sphi %s4520_s17, %s6467_s17   ;;  %s4461_s16 = sphi %s4518_s16, %s6466_s16   ;;  %s4457_s15 = sphi %s4516_s15, %s6465_s15   ;;  %s4453_s14 = sphi %s4514_s14, %s6464_s14   ;;  %s4449_s13 = sphi %s4512_s13, %s6463_s13   ;;  %s4445_s12 = sphi %s4510_s12, %s6462_s12  }
   0x9   : > { %p37_p0 = scmp.ge.s32.totalorder %s35_s24, 2  ;;  %s50_s26 = sadd.s32 1, %s4465_s17 }
   0xa   : > { %p57_p1 = scmp.ne.s32.totalorder %s4465_s17, %s4461_s16  ;;  %p58_p2 = scmp.eq.s32.totalorder %s4485_s22, 0 }
   0xb   : > { %s6473_s24 = smov (%p37_p0, %s35_s24), 0  ;;  %s6475_s25 = smov (!%p37_p0, %s39_s25), %s4481_s21 }
   0xc   : > { %s46_s27 = ssub.s32 %s4477_s20, %s6473_s24  ;;  %p41_p3 = scmp.ge.s32.totalorder %s6475_s25, 2 }
   0xd   : > { %s73_s28 = sadd.s32 2, %s4477_s20  ;;  %p4583_p4 = por %p58_p2, %p57_p1 }
   0xe   : > { %s74_s30 = sadd.s32 2, %s6473_s24  ;;  %s6477_s25 = smov (%p41_p3, %s6475_s25), 0 }
   0xf   : > { %6268 = sst [smem:[#allocation9_spill]] %s6477_s25  ;;  %s78_s4 = ssub.s32 %s73_s28, %s74_s30 }
  0x10   : > { %s82_s5 = sadd.s32 1, %s4457_s15  ;;  %s43_s6 = ssub.s32 %s4481_s21, %s6477_s25 }
  0x11   : > { %p89_p5 = scmp.ne.s32.totalorder %s4457_s15, %s4453_s14  ;;  %s47_s7 = sor.u32 %s46_s27, %s43_s6 }
  0x12   : > { %s79_s8 = sor.u32 %s78_s4, %s43_s6  ;;  %p48_p6 = scmp.eq.s32.totalorder %s47_s7, 0 }
  0x13   : > { %p80_p7 = scmp.eq.s32.totalorder %s79_s8, 0  ;;  %p4597_p8 = por %p89_p5, %p58_p2 }
  0x14   : > { %s105_s10 = sadd.s32 4, %s4477_s20  ;;  %s106_s30 = sadd.s32 4, %s6473_s24 }
  0x15   : > { %s4603_s11 = scalar_select %p48_p6, %s4465_s17, %s50_s26  }
  0x16   : > { %s4606_s28 = scalar_select %p80_p7, %s4457_s15, %s82_s5  }
  0x17   : > { %s114_s23 = sadd.s32 1, %s4449_s13  ;;  %s110_s25 = ssub.s32 %s105_s10, %s106_s30 }
  0x18   : > { %p121_p9 = scmp.ne.s32.totalorder %s4449_s13, %s4445_s12  ;;  %s111_s27 = sor.u32 %s110_s25, %s43_s6 }
  0x19   : > { %s6270_s3 = sadd.s32 4294967295, %s4485_s22   ;;  %p112_p11 = scmp.eq.s32.totalorder %s111_s27, 0 }
  0x1a   : > { %p155_p10 = scmp.eq.s32.totalorder %s6270_s3, 3  ;;  %p4616_p12 = por %p121_p9, %p58_p2 }
  0x1b   : > { %s4628_s26 = scalar_select %p112_p11, %s4449_s13, %s114_s23  }
  0x1c   : > { %p4623_p13 = por %p155_p10, %p57_p1  ;;  %p3553_p0 = scmp.ge.s32.totalorder %s4485_s22, 4 }
  0x1e   : > { %177 = sbr.rel (%p3553_p0) target bundleno = 121 (0x79), region = 16 }
  0x25   : > { %180 = sbr.rel (!%p4583_p4) target bundleno = 65 (0x41), region = 20  ;;  %s182_s3 = sand.u32 (%p4583_p4), 1, %s4465_s17  }
  0x26   : > { %s4001_s25 = smul.u32 (%p4583_p4), 192, %s4481_s21  ;;  %s3554_s5 = sshll.u32 (%p4583_p4), %s182_s3, 7 }
  0x27   : > { %s4644_s23 = scalar_lea.vmem (%p4583_p4), [#allocation5], %s3554_s5 }
  0x28   : > { %s189_s6 = sadd.s32 (%p4583_p4), %s4477_s20, %s4001_s25 }
  0x29   : > { %s3555_s8 = sshll.u32 (%p4583_p4), %s189_s6, 2 }
  0x2a   : > { %s4639_s27 = scalar_lea.vmem (%p4583_p4), %s6188_s0, %s3555_s8 }
  0x2b   : > { %v207_v0 = vld [vmem:[%s4639_s27] sm:$0xf] (%p4583_p4)  ;;  %v209_v1 = vld [vmem:[%s4639_s27 + $0x18] sm:$0xf] (%p4583_p4)  ;;  %v211_v2 = vld [vmem:[%s4639_s27 + $0x30] sm:$0xf] (%p4583_p4) }
  0x2c   : > { %208 = vst [vmem:[%s4644_s23] sm:$0xf] %v207_v0  ;;  %210 = vst [vmem:[%s4644_s23 + $0x4] sm:$0xf] %v209_v1  ;;  %v213_v3 = vld [vmem:[%s4639_s27 + $0x48] sm:$0xf] }
  0x2d   : > { %212 = vst [vmem:[%s4644_s23 + $0x8] sm:$0xf] %v211_v2  ;;  %v215_v4 = vld [vmem:[%s4639_s27 + $0x60] sm:$0xf]  ;;  %v217_v5 = vld [vmem:[%s4639_s27 + $0x78] sm:$0xf] }
  0x2e   : > { %214 = vst [vmem:[%s4644_s23 + $0xc] sm:$0xf] %v213_v3  ;;  %216 = vst [vmem:[%s4644_s23 + $0x10] sm:$0xf] %v215_v4  ;;  %v219_v6 = vld [vmem:[%s4639_s27 + $0x90] sm:$0xf] }
  0x2f   : > { %218 = vst [vmem:[%s4644_s23 + $0x14] sm:$0xf] %v217_v5  ;;  %v221_v7 = vld [vmem:[%s4639_s27 + $0xa8] sm:$0xf]  ;;  %v223_v8 = vld [vmem:[%s4639_s27 + $0xc0] sm:$0xf] }
  0x30   : > { %220 = vst [vmem:[%s4644_s23 + $0x18] sm:$0xf] %v219_v6  ;;  %222 = vst [vmem:[%s4644_s23 + $0x1c] sm:$0xf] %v221_v7  ;;  %v225_v9 = vld [vmem:[%s4639_s27 + $0xd8] sm:$0xf] }
  0x31   : > { %224 = vst [vmem:[%s4644_s23 + $0x20] sm:$0xf] %v223_v8  ;;  %v227_v10 = vld [vmem:[%s4639_s27 + $0xf0] sm:$0xf]  ;;  %v229_v11 = vld [vmem:[%s4639_s27 + $0x108] sm:$0xf] }
  0x32   : > { %226 = vst [vmem:[%s4644_s23 + $0x24] sm:$0xf] %v225_v9  ;;  %228 = vst [vmem:[%s4644_s23 + $0x28] sm:$0xf] %v227_v10  ;;  %v231_v12 = vld [vmem:[%s4639_s27 + $0x120] sm:$0xf] }
  0x33   : > { %230 = vst [vmem:[%s4644_s23 + $0x2c] sm:$0xf] %v229_v11  ;;  %v233_v13 = vld [vmem:[%s4639_s27 + $0x138] sm:$0xf]  ;;  %v235_v14 = vld [vmem:[%s4639_s27 + $0x150] sm:$0xf] }
  0x34   : > { %232 = vst [vmem:[%s4644_s23 + $0x30] sm:$0xf] %v231_v12  ;;  %234 = vst [vmem:[%s4644_s23 + $0x34] sm:$0xf] %v233_v13  ;;  %v237_v15 = vld [vmem:[%s4639_s27 + $0x168] sm:$0xf] }
  0x35   : > { %236 = vst [vmem:[%s4644_s23 + $0x38] sm:$0xf] %v235_v14  ;;  %v239_v16 = vld [vmem:[%s4639_s27 + $0x180] sm:$0xf]  ;;  %v241_v17 = vld [vmem:[%s4639_s27 + $0x198] sm:$0xf] }
  0x36   : > { %238 = vst [vmem:[%s4644_s23 + $0x3c] sm:$0xf] %v237_v15  ;;  %240 = vst [vmem:[%s4644_s23 + $0x40] sm:$0xf] %v239_v16  ;;  %v243_v18 = vld [vmem:[%s4639_s27 + $0x1b0] sm:$0xf] }
  0x37   : > { %242 = vst [vmem:[%s4644_s23 + $0x44] sm:$0xf] %v241_v17  ;;  %v245_v19 = vld [vmem:[%s4639_s27 + $0x1c8] sm:$0xf]  ;;  %v247_v20 = vld [vmem:[%s4639_s27 + $0x1e0] sm:$0xf] }
  0x38   : > { %244 = vst [vmem:[%s4644_s23 + $0x48] sm:$0xf] %v243_v18  ;;  %246 = vst [vmem:[%s4644_s23 + $0x4c] sm:$0xf] %v245_v19  ;;  %v249_v21 = vld [vmem:[%s4639_s27 + $0x1f8] sm:$0xf] }
  0x39   : > { %248 = vst [vmem:[%s4644_s23 + $0x50] sm:$0xf] %v247_v20  ;;  %v251_v22 = vld [vmem:[%s4639_s27 + $0x210] sm:$0xf]  ;;  %v253_v23 = vld [vmem:[%s4639_s27 + $0x228] sm:$0xf] }
  0x3a   : > { %250 = vst [vmem:[%s4644_s23 + $0x54] sm:$0xf] %v249_v21  ;;  %252 = vst [vmem:[%s4644_s23 + $0x58] sm:$0xf] %v251_v22  ;;  %v255_v24 = vld [vmem:[%s4639_s27 + $0x240] sm:$0xf] }
  0x3b   : > { %254 = vst [vmem:[%s4644_s23 + $0x5c] sm:$0xf] %v253_v23  ;;  %v257_v25 = vld [vmem:[%s4639_s27 + $0x258] sm:$0xf]  ;;  %v259_v26 = vld [vmem:[%s4639_s27 + $0x270] sm:$0xf] }
  0x3c   : > { %256 = vst [vmem:[%s4644_s23 + $0x60] sm:$0xf] %v255_v24  ;;  %258 = vst [vmem:[%s4644_s23 + $0x64] sm:$0xf] %v257_v25  ;;  %v261_v27 = vld [vmem:[%s4639_s27 + $0x288] sm:$0xf] }
  0x3d   : > { %260 = vst [vmem:[%s4644_s23 + $0x68] sm:$0xf] %v259_v26  ;;  %v263_v28 = vld [vmem:[%s4639_s27 + $0x2a0] sm:$0xf]  ;;  %v265_v29 = vld [vmem:[%s4639_s27 + $0x2b8] sm:$0xf] }
  0x3e   : > { %262 = vst [vmem:[%s4644_s23 + $0x6c] sm:$0xf] %v261_v27  ;;  %264 = vst [vmem:[%s4644_s23 + $0x70] sm:$0xf] %v263_v28  ;;  %v267_v30 = vld [vmem:[%s4639_s27 + $0x2d0] sm:$0xf] }
  0x3f   : > { %266 = vst [vmem:[%s4644_s23 + $0x74] sm:$0xf] %v265_v29  ;;  %v269_v31 = vld [vmem:[%s4639_s27 + $0x2e8] sm:$0xf]  ;;  %268 = vst [vmem:[%s4644_s23 + $0x78] sm:$0xf] %v267_v30 }
  0x40   : > { %270 = vst [vmem:[%s4644_s23 + $0x7c] sm:$0xf] %v269_v31 }
  0x41 PF: > { %357 = sbr.rel (!%p4597_p8) target bundleno = 93 (0x5d), region = 61  ;;  %s359_s29 = sand.u32 (%p4597_p8), 1, %s4457_s15  }
  0x42   : > { %s3446_s3 = smul.u32 (%p4597_p8), 192, %s4481_s21  ;;  %s3556_s25 = sshll.u32 (%p4597_p8), %s359_s29, 7 }
  0x43   : > { %s4720_s9 = scalar_lea.vmem (%p4597_p8), [#allocation6], %s3556_s25 }
  0x44   : > { %s3447_s5 = sadd.s32 (%p4597_p8), %s4477_s20, %s3446_s3 }
  0x45   : > { %s3557_s6 = sshll.u32 (%p4597_p8), %s3447_s5, 2 }
  0x46   : > { %s4715_s30 = scalar_lea.vmem (%p4597_p8), %s6189_s1, %s3557_s6 }
  0x47   : > { %v3558_v32 = vld [vmem:[%s4715_s30 + $0x8] sm:$0xf] (%p4597_p8)  ;;  %v3559_v33 = vld [vmem:[%s4715_s30 + $0x20] sm:$0xf] (%p4597_p8)  ;;  %v3560_v34 = vld [vmem:[%s4715_s30 + $0x38] sm:$0xf] (%p4597_p8) }
  0x48   : > { %386 = vst [vmem:[%s4720_s9] sm:$0xf] %v3558_v32  ;;  %388 = vst [vmem:[%s4720_s9 + $0x4] sm:$0xf] %v3559_v33  ;;  %v3561_v35 = vld [vmem:[%s4715_s30 + $0x50] sm:$0xf] }
  0x49   : > { %390 = vst [vmem:[%s4720_s9 + $0x8] sm:$0xf] %v3560_v34  ;;  %v3562_v36 = vld [vmem:[%s4715_s30 + $0x68] sm:$0xf]  ;;  %v3563_v37 = vld [vmem:[%s4715_s30 + $0x80] sm:$0xf] }
  0x4a   : > { %392 = vst [vmem:[%s4720_s9 + $0xc] sm:$0xf] %v3561_v35  ;;  %394 = vst [vmem:[%s4720_s9 + $0x10] sm:$0xf] %v3562_v36  ;;  %v3564_v38 = vld [vmem:[%s4715_s30 + $0x98] sm:$0xf] }
  0x4b   : > { %396 = vst [vmem:[%s4720_s9 + $0x14] sm:$0xf] %v3563_v37  ;;  %v3565_v39 = vld [vmem:[%s4715_s30 + $0xb0] sm:$0xf]  ;;  %v3566_v40 = vld [vmem:[%s4715_s30 + $0xc8] sm:$0xf] }
  0x4c   : > { %398 = vst [vmem:[%s4720_s9 + $0x18] sm:$0xf] %v3564_v38  ;;  %400 = vst [vmem:[%s4720_s9 + $0x1c] sm:$0xf] %v3565_v39  ;;  %v3567_v41 = vld [vmem:[%s4715_s30 + $0xe0] sm:$0xf] }
  0x4d   : > { %402 = vst [vmem:[%s4720_s9 + $0x20] sm:$0xf] %v3566_v40  ;;  %v3568_v42 = vld [vmem:[%s4715_s30 + $0xf8] sm:$0xf]  ;;  %v3569_v43 = vld [vmem:[%s4715_s30 + $0x110] sm:$0xf] }
  0x4e   : > { %404 = vst [vmem:[%s4720_s9 + $0x24] sm:$0xf] %v3567_v41  ;;  %406 = vst [vmem:[%s4720_s9 + $0x28] sm:$0xf] %v3568_v42  ;;  %v3570_v44 = vld [vmem:[%s4715_s30 + $0x128] sm:$0xf] }
  0x4f   : > { %408 = vst [vmem:[%s4720_s9 + $0x2c] sm:$0xf] %v3569_v43  ;;  %v3571_v45 = vld [vmem:[%s4715_s30 + $0x140] sm:$0xf]  ;;  %v3572_v46 = vld [vmem:[%s4715_s30 + $0x158] sm:$0xf] }
  0x50   : > { %410 = vst [vmem:[%s4720_s9 + $0x30] sm:$0xf] %v3570_v44  ;;  %412 = vst [vmem:[%s4720_s9 + $0x34] sm:$0xf] %v3571_v45  ;;  %v3573_v47 = vld [vmem:[%s4715_s30 + $0x170] sm:$0xf] }
  0x51   : > { %414 = vst [vmem:[%s4720_s9 + $0x38] sm:$0xf] %v3572_v46  ;;  %v3574_v48 = vld [vmem:[%s4715_s30 + $0x188] sm:$0xf]  ;;  %v3575_v49 = vld [vmem:[%s4715_s30 + $0x1a0] sm:$0xf] }
  0x52   : > { %416 = vst [vmem:[%s4720_s9 + $0x3c] sm:$0xf] %v3573_v47  ;;  %418 = vst [vmem:[%s4720_s9 + $0x40] sm:$0xf] %v3574_v48  ;;  %v3576_v50 = vld [vmem:[%s4715_s30 + $0x1b8] sm:$0xf] }
  0x53   : > { %420 = vst [vmem:[%s4720_s9 + $0x44] sm:$0xf] %v3575_v49  ;;  %v3577_v51 = vld [vmem:[%s4715_s30 + $0x1d0] sm:$0xf]  ;;  %v3578_v52 = vld [vmem:[%s4715_s30 + $0x1e8] sm:$0xf] }
  0x54   : > { %422 = vst [vmem:[%s4720_s9 + $0x48] sm:$0xf] %v3576_v50  ;;  %424 = vst [vmem:[%s4720_s9 + $0x4c] sm:$0xf] %v3577_v51  ;;  %v3579_v53 = vld [vmem:[%s4715_s30 + $0x200] sm:$0xf] }
  0x55   : > { %426 = vst [vmem:[%s4720_s9 + $0x50] sm:$0xf] %v3578_v52  ;;  %v3580_v54 = vld [vmem:[%s4715_s30 + $0x218] sm:$0xf]  ;;  %v3581_v55 = vld [vmem:[%s4715_s30 + $0x230] sm:$0xf] }
  0x56   : > { %428 = vst [vmem:[%s4720_s9 + $0x54] sm:$0xf] %v3579_v53  ;;  %430 = vst [vmem:[%s4720_s9 + $0x58] sm:$0xf] %v3580_v54  ;;  %v3582_v56 = vld [vmem:[%s4715_s30 + $0x248] sm:$0xf] }
  0x57   : > { %432 = vst [vmem:[%s4720_s9 + $0x5c] sm:$0xf] %v3581_v55  ;;  %v3583_v57 = vld [vmem:[%s4715_s30 + $0x260] sm:$0xf]  ;;  %v3584_v58 = vld [vmem:[%s4715_s30 + $0x278] sm:$0xf] }
  0x58   : > { %434 = vst [vmem:[%s4720_s9 + $0x60] sm:$0xf] %v3582_v56  ;;  %436 = vst [vmem:[%s4720_s9 + $0x64] sm:$0xf] %v3583_v57  ;;  %v3585_v59 = vld [vmem:[%s4715_s30 + $0x290] sm:$0xf] }
  0x59   : > { %438 = vst [vmem:[%s4720_s9 + $0x68] sm:$0xf] %v3584_v58  ;;  %v3586_v60 = vld [vmem:[%s4715_s30 + $0x2a8] sm:$0xf]  ;;  %v3587_v61 = vld [vmem:[%s4715_s30 + $0x2c0] sm:$0xf] }
  0x5a   : > { %440 = vst [vmem:[%s4720_s9 + $0x6c] sm:$0xf] %v3585_v59  ;;  %442 = vst [vmem:[%s4720_s9 + $0x70] sm:$0xf] %v3586_v60  ;;  %v3588_v62 = vld [vmem:[%s4715_s30 + $0x2d8] sm:$0xf] }
  0x5b   : > { %444 = vst [vmem:[%s4720_s9 + $0x74] sm:$0xf] %v3587_v61  ;;  %v3589_v63 = vld [vmem:[%s4715_s30 + $0x2f0] sm:$0xf]  ;;  %446 = vst [vmem:[%s4720_s9 + $0x78] sm:$0xf] %v3588_v62 }
  0x5c   : > { %448 = vst [vmem:[%s4720_s9 + $0x7c] sm:$0xf] %v3589_v63 }
  0x5d PF: > { %535 = sbr.rel (!%p4616_p12) target bundleno = 121 (0x79), region = 102  ;;  %s537_s27 = sand.u32 (%p4616_p12), 1, %s4449_s13  }
  0x5e   : > { %s3455_s23 = smul.u32 (%p4616_p12), 192, %s4481_s21  ;;  %s3590_s29 = sshll.u32 (%p4616_p12), %s537_s27, 7 }
  0x5f   : > { %s4796_s4 = scalar_lea.vmem (%p4616_p12), [#allocation7], %s3590_s29 }
  0x60   : > { %s3456_s3 = sadd.s32 (%p4616_p12), %s4477_s20, %s3455_s23 }
  0x61   : > { %s3591_s25 = sshll.u32 (%p4616_p12), %s3456_s3, 2 }
  0x62   : > { %s4791_s8 = scalar_lea.vmem (%p4616_p12), %s6190_s2, %s3591_s25 }
  0x63   : > { %v3592_v0 = vld [vmem:[%s4791_s8 + $0x10] sm:$0xf] (%p4616_p12)  ;;  %v3593_v1 = vld [vmem:[%s4791_s8 + $0x28] sm:$0xf] (%p4616_p12)  ;;  %v3594_v2 = vld [vmem:[%s4791_s8 + $0x40] sm:$0xf] (%p4616_p12) }
  0x64   : > { %564 = vst [vmem:[%s4796_s4] sm:$0xf] %v3592_v0  ;;  %566 = vst [vmem:[%s4796_s4 + $0x4] sm:$0xf] %v3593_v1  ;;  %v3595_v3 = vld [vmem:[%s4791_s8 + $0x58] sm:$0xf] }
  0x65   : > { %568 = vst [vmem:[%s4796_s4 + $0x8] sm:$0xf] %v3594_v2  ;;  %v3596_v4 = vld [vmem:[%s4791_s8 + $0x70] sm:$0xf]  ;;  %v3597_v5 = vld [vmem:[%s4791_s8 + $0x88] sm:$0xf] }
  0x66   : > { %570 = vst [vmem:[%s4796_s4 + $0xc] sm:$0xf] %v3595_v3  ;;  %572 = vst [vmem:[%s4796_s4 + $0x10] sm:$0xf] %v3596_v4  ;;  %v3598_v6 = vld [vmem:[%s4791_s8 + $0xa0] sm:$0xf] }
  0x67   : > { %574 = vst [vmem:[%s4796_s4 + $0x14] sm:$0xf] %v3597_v5  ;;  %v3599_v7 = vld [vmem:[%s4791_s8 + $0xb8] sm:$0xf]  ;;  %v3600_v8 = vld [vmem:[%s4791_s8 + $0xd0] sm:$0xf] }
  0x68   : > { %576 = vst [vmem:[%s4796_s4 + $0x18] sm:$0xf] %v3598_v6  ;;  %578 = vst [vmem:[%s4796_s4 + $0x1c] sm:$0xf] %v3599_v7  ;;  %v3601_v9 = vld [vmem:[%s4791_s8 + $0xe8] sm:$0xf] }
  0x69   : > { %580 = vst [vmem:[%s4796_s4 + $0x20] sm:$0xf] %v3600_v8  ;;  %v3602_v10 = vld [vmem:[%s4791_s8 + $0x100] sm:$0xf]  ;;  %v3603_v11 = vld [vmem:[%s4791_s8 + $0x118] sm:$0xf] }
  0x6a   : > { %582 = vst [vmem:[%s4796_s4 + $0x24] sm:$0xf] %v3601_v9  ;;  %584 = vst [vmem:[%s4796_s4 + $0x28] sm:$0xf] %v3602_v10  ;;  %v3604_v12 = vld [vmem:[%s4791_s8 + $0x130] sm:$0xf] }
  0x6b   : > { %586 = vst [vmem:[%s4796_s4 + $0x2c] sm:$0xf] %v3603_v11  ;;  %v3605_v13 = vld [vmem:[%s4791_s8 + $0x148] sm:$0xf]  ;;  %v3606_v14 = vld [vmem:[%s4791_s8 + $0x160] sm:$0xf] }
  0x6c   : > { %588 = vst [vmem:[%s4796_s4 + $0x30] sm:$0xf] %v3604_v12  ;;  %590 = vst [vmem:[%s4796_s4 + $0x34] sm:$0xf] %v3605_v13  ;;  %v3607_v15 = vld [vmem:[%s4791_s8 + $0x178] sm:$0xf] }
  0x6d   : > { %592 = vst [vmem:[%s4796_s4 + $0x38] sm:$0xf] %v3606_v14  ;;  %v3608_v16 = vld [vmem:[%s4791_s8 + $0x190] sm:$0xf]  ;;  %v3609_v17 = vld [vmem:[%s4791_s8 + $0x1a8] sm:$0xf] }
  0x6e   : > { %594 = vst [vmem:[%s4796_s4 + $0x3c] sm:$0xf] %v3607_v15  ;;  %596 = vst [vmem:[%s4796_s4 + $0x40] sm:$0xf] %v3608_v16  ;;  %v3610_v18 = vld [vmem:[%s4791_s8 + $0x1c0] sm:$0xf] }
  0x6f   : > { %598 = vst [vmem:[%s4796_s4 + $0x44] sm:$0xf] %v3609_v17  ;;  %v3611_v19 = vld [vmem:[%s4791_s8 + $0x1d8] sm:$0xf]  ;;  %v3612_v20 = vld [vmem:[%s4791_s8 + $0x1f0] sm:$0xf] }
  0x70   : > { %600 = vst [vmem:[%s4796_s4 + $0x48] sm:$0xf] %v3610_v18  ;;  %602 = vst [vmem:[%s4796_s4 + $0x4c] sm:$0xf] %v3611_v19  ;;  %v3613_v21 = vld [vmem:[%s4791_s8 + $0x208] sm:$0xf] }
  0x71   : > { %604 = vst [vmem:[%s4796_s4 + $0x50] sm:$0xf] %v3612_v20  ;;  %v3614_v22 = vld [vmem:[%s4791_s8 + $0x220] sm:$0xf]  ;;  %v3615_v23 = vld [vmem:[%s4791_s8 + $0x238] sm:$0xf] }
  0x72   : > { %606 = vst [vmem:[%s4796_s4 + $0x54] sm:$0xf] %v3613_v21  ;;  %608 = vst [vmem:[%s4796_s4 + $0x58] sm:$0xf] %v3614_v22  ;;  %v3616_v24 = vld [vmem:[%s4791_s8 + $0x250] sm:$0xf] }
  0x73   : > { %610 = vst [vmem:[%s4796_s4 + $0x5c] sm:$0xf] %v3615_v23  ;;  %v3617_v25 = vld [vmem:[%s4791_s8 + $0x268] sm:$0xf]  ;;  %v3618_v26 = vld [vmem:[%s4791_s8 + $0x280] sm:$0xf] }
  0x74   : > { %612 = vst [vmem:[%s4796_s4 + $0x60] sm:$0xf] %v3616_v24  ;;  %614 = vst [vmem:[%s4796_s4 + $0x64] sm:$0xf] %v3617_v25  ;;  %v3619_v27 = vld [vmem:[%s4791_s8 + $0x298] sm:$0xf] }
  0x75   : > { %616 = vst [vmem:[%s4796_s4 + $0x68] sm:$0xf] %v3618_v26  ;;  %v3620_v28 = vld [vmem:[%s4791_s8 + $0x2b0] sm:$0xf]  ;;  %v3621_v29 = vld [vmem:[%s4791_s8 + $0x2c8] sm:$0xf] }
  0x76   : > { %618 = vst [vmem:[%s4796_s4 + $0x6c] sm:$0xf] %v3619_v27  ;;  %620 = vst [vmem:[%s4796_s4 + $0x70] sm:$0xf] %v3620_v28  ;;  %v3622_v30 = vld [vmem:[%s4791_s8 + $0x2e0] sm:$0xf] }
  0x77   : > { %622 = vst [vmem:[%s4796_s4 + $0x74] sm:$0xf] %v3621_v29  ;;  %v3623_v31 = vld [vmem:[%s4791_s8 + $0x2f8] sm:$0xf]  ;;  %624 = vst [vmem:[%s4796_s4 + $0x78] sm:$0xf] %v3622_v30 }
  0x78   : > { %626 = vst [vmem:[%s4796_s4 + $0x7c] sm:$0xf] %v3623_v31 }
  0x79 PF: > { %p3624_p1 = scmp.ge.s32.totalorder %s4485_s22, 1  ;;  %p712_p2 = scmp.lt.s32.totalorder %s4485_s22, 5 }
  0x7b   : > { %p713_p3 = pnand %p3624_p1, %p712_p2 }
  0x7d   : > { %716 = sbr.rel (%p713_p3) target bundleno = 1143 (0x477), region = 143 }
  0x84   : > { %s726_s10 = sand.u32 1, %s4453_s14   ;;  %s719_s14 = sand.u32 1, %s4461_s16   ;;  %vm774_vm0 = vcmask 7168   ;;  %v4487_v0 = vmov -inf   ;;  %v4488_v18 = vmov 0   ;;  %v4489_v26 = vmov 0.0  }
  0x85   : > { %s3626_s30 = sshll.u32 %s726_s10, 7  ;;  %s4870_s27 = sshll.u32 %s719_s14, 7  ;;  %775 = vst.msk [vmem:[#allocation2] sm:$0xff] %vm774_vm0, %v4487_v0  ;;  %776 = vst.msk [vmem:[#allocation2 + $0x8] sm:$0xff] %vm774_vm0, %v4487_v0  ;;  %4093 = vset.pattern.permute.xlu0 %v4488_v18  ;;  %4094 = vset.pattern.permute.xlu1 %v4488_v18 }
  0x86   : > { %s4862_s9 = scalar_lea.vmem [#allocation6], %s3626_s30  ;;  %s4875_s23 = scalar_lea.vmem [#allocation5], %s4870_s27  ;;  %777 = vst.msk [vmem:[#allocation2 + $0x10] sm:$0xff] %vm774_vm0, %v4487_v0  ;;  %778 = vst.msk [vmem:[#allocation2 + $0x18] sm:$0xff] %vm774_vm0, %v4487_v0 }
  0x87   : > { %v4095_v32 = vld [vmem:[%s4862_s9 + $0x40] sm:$0xff]   ;;  %v4097_v34 = vld [vmem:[%s4862_s9 + $0x48] sm:$0xff]   ;;  %v4099_v36 = vld [vmem:[%s4862_s9 + $0x50] sm:$0xff]   ;;  %779 = vst.msk [vmem:[#allocation2 + $0x20] sm:$0xff] %vm774_vm0, %v4487_v0  ;;  %s733_s16 = sand.u32 1, %s4445_s12   ;;  %s6033_s12 = scalar_lea.vmem [#allocation8], %s4870_s27 }
  0x88   : > { %v4096_v33 = vld [vmem:[%s4862_s9] sm:$0xff]   ;;  %3841 = vmatprep.subr.bf16.mxu0 %v4095_v32  ;;  %v4098_v35 = vld [vmem:[%s4862_s9 + $0x8] sm:$0xff]   ;;  %v4100_v37 = vld [vmem:[%s4862_s9 + $0x10] sm:$0xff]   ;;  %780 = vst.msk [vmem:[#allocation2 + $0x28] sm:$0xff] %vm774_vm0, %v4487_v0  ;;  %s3627_s29 = sshll.u32 %s733_s16, 7  ;;  %s3710_s25 = sshll.u32 (%p4623_p13), %s4473_s19, 6 }
  0x89   : > { %3842 = vmatpush3.bf16.xpose.msra.mxu0 %v4096_v33  ;;  %v4101_v38 = vld [vmem:[%s4862_s9 + $0x58] sm:$0xff]   ;;  %v4111_v39 = vld [vmem:[%s4875_s23] sm:$0xff]   ;;  %v4105_v43 = vld [vmem:[%s4862_s9 + $0x68] sm:$0xff]   ;;  %781 = vst.msk [vmem:[#allocation2 + $0x30] sm:$0xff] %vm774_vm0, %v4487_v0  ;;  %s5159_s3 = scalar_lea.vmem [#allocation7], %s3627_s29  ;;  %s3256_s5 = sadd.s32 (%p4623_p13), %s4469_s18, %s3710_s25 }
  0x8a   : > { %3843 = vmatprep.subr.bf16.mxu0 %v4097_v34  ;;  %3857 = vmatprep.mubr.bf16.mxu0 %v4111_v39  ;;  %v4102_v40 = vld [vmem:[%s4862_s9 + $0x18] sm:$0xff]   ;;  %v4103_v41 = vld [vmem:[%s4862_s9 + $0x60] sm:$0xff]   ;;  %v4106_v44 = vld [vmem:[%s4862_s9 + $0x28] sm:$0xff]   ;;  %782 = vst.msk [vmem:[#allocation2 + $0x38] sm:$0xff] %vm774_vm0, %v4487_v0  ;;  %s3711_s7 = sshll.u32 (%p4623_p13), %s3256_s5, 2  ;;  %s6460_s4 = sld [smem:[#allocation76_spill]] (%p4623_p13) }
  0x8b   : > { %v4104_v42 = vld [vmem:[%s4862_s9 + $0x20] sm:$0xff]   ;;  %v4107_v45 = vld [vmem:[%s4862_s9 + $0x70] sm:$0xff]   ;;  %v4109_v47 = vld [vmem:[%s4862_s9 + $0x78] sm:$0xff]   ;;  %783 = vst.msk [vmem:[#allocation2 + $0x40] sm:$0xff] %vm774_vm0, %v4487_v0 }
  0x8c   : > { %v4108_v46 = vld [vmem:[%s4862_s9 + $0x30] sm:$0xff]   ;;  %v4110_v48 = vld [vmem:[%s4862_s9 + $0x38] sm:$0xff]   ;;  %v4112_v49 = vld [vmem:[%s4875_s23 + $0x8] sm:$0xff]   ;;  %784 = vst.msk [vmem:[#allocation2 + $0x48] sm:$0xff] %vm774_vm0, %v4487_v0 }
  0x8d   : > { %v4113_v50 = vld [vmem:[%s4875_s23 + $0x10] sm:$0xff]   ;;  %v4114_v51 = vld [vmem:[%s4875_s23 + $0x18] sm:$0xff]   ;;  %v4115_v52 = vld [vmem:[%s4875_s23 + $0x20] sm:$0xff]   ;;  %785 = vst.msk [vmem:[#allocation2 + $0x50] sm:$0xff] %vm774_vm0, %v4487_v0 }
  0x8e   : > { %v4116_v53 = vld [vmem:[%s4875_s23 + $0x28] sm:$0xff]   ;;  %v4117_v54 = vld [vmem:[%s4875_s23 + $0x30] sm:$0xff]   ;;  %v4118_v55 = vld [vmem:[%s4875_s23 + $0x38] sm:$0xff]   ;;  %786 = vst.msk [vmem:[#allocation2 + $0x58] sm:$0xff] %vm774_vm0, %v4487_v0 }
  0x8f   : > { %v4119_v56 = vld [vmem:[%s4875_s23 + $0x40] sm:$0xff]   ;;  %v4120_v57 = vld [vmem:[%s4875_s23 + $0x48] sm:$0xff]   ;;  %v4121_v58 = vld [vmem:[%s4875_s23 + $0x50] sm:$0xff]   ;;  %787 = vst.msk [vmem:[#allocation2 + $0x60] sm:$0xff] %vm774_vm0, %v4487_v0 }
  0x90   : > { %v4122_v59 = vld [vmem:[%s4875_s23 + $0x58] sm:$0xff]   ;;  %v4123_v60 = vld [vmem:[%s4875_s23 + $0x60] sm:$0xff]   ;;  %v4124_v61 = vld [vmem:[%s4875_s23 + $0x68] sm:$0xff]   ;;  %788 = vst.msk [vmem:[#allocation2 + $0x68] sm:$0xff] %vm774_vm0, %v4487_v0  ;;  %s6096_s10 = scalar_lea.vmem (%p4623_p13), %s6460_s4, %s3711_s7 }
  0x91   : > { %3844 = vmatpush3.bf16.xpose.msra.mxu0 %v4098_v35  ;;  %v4125_v62 = vld [vmem:[%s4875_s23 + $0x70] sm:$0xff]   ;;  %v4126_v63 = vld [vmem:[%s4875_s23 + $0x78] sm:$0xff]   ;;  %789 = vst.msk [vmem:[#allocation2 + $0x70] sm:$0xff] %vm774_vm0, %v4487_v0  ;;  %790 = vst.msk [vmem:[#allocation2 + $0x78] sm:$0xff] %vm774_vm0, %v4487_v0 }
  0x92   : > { %3845 = vmatprep.subr.bf16.mxu0 %v4099_v36  ;;  %791 = vst.msk [vmem:[#allocation2 + $0x80] sm:$0xff] %vm774_vm0, %v4487_v0  ;;  %792 = vst.msk [vmem:[#allocation2 + $0x88] sm:$0xff] %vm774_vm0, %v4487_v0 }
  0x93   : > { %793 = vst.msk [vmem:[#allocation2 + $0x90] sm:$0xff] %vm774_vm0, %v4487_v0  ;;  %794 = vst.msk [vmem:[#allocation2 + $0x98] sm:$0xff] %vm774_vm0, %v4487_v0 }
  0x94   : > { %795 = vst.msk [vmem:[#allocation2 + $0xa0] sm:$0xff] %vm774_vm0, %v4487_v0  ;;  %796 = vst.msk [vmem:[#allocation2 + $0xa8] sm:$0xff] %vm774_vm0, %v4487_v0 }
  0x95   : > { %797 = vst.msk [vmem:[#allocation2 + $0xb0] sm:$0xff] %vm774_vm0, %v4487_v0  ;;  %798 = vst.msk [vmem:[#allocation2 + $0xb8] sm:$0xff] %vm774_vm0, %v4487_v0 }
  0x96   : > { %799 = vst.msk [vmem:[#allocation2 + $0xc0] sm:$0xff] %vm774_vm0, %v4487_v0  ;;  %800 = vst.msk [vmem:[#allocation2 + $0xc8] sm:$0xff] %vm774_vm0, %v4487_v0 }
  0x97   : > { %801 = vst.msk [vmem:[#allocation2 + $0xd0] sm:$0xff] %vm774_vm0, %v4487_v0  ;;  %802 = vst.msk [vmem:[#allocation2 + $0xd8] sm:$0xff] %vm774_vm0, %v4487_v0 }
  0x98   : > { %803 = vst.msk [vmem:[#allocation2 + $0xe0] sm:$0xff] %vm774_vm0, %v4487_v0  ;;  %804 = vst.msk [vmem:[#allocation2 + $0xe8] sm:$0xff] %vm774_vm0, %v4487_v0 }
  0x99   : > { %3846 = vmatpush3.bf16.xpose.msra.mxu0 %v4100_v37  ;;  %805 = vst.msk [vmem:[#allocation2 + $0xf0] sm:$0xff] %vm774_vm0, %v4487_v0  ;;  %806 = vst.msk [vmem:[#allocation2 + $0xf8] sm:$0xff] %vm774_vm0, %v4487_v0 }
  0x9a   : > { %3847 = vmatprep.subr.bf16.mxu0 %v4101_v38  ;;  %808 = vst.msk [vmem:[#allocation3 + $0x8] sm:$0xff] %vm774_vm0, %v4489_v26  ;;  %807 = vst.msk [vmem:[#allocation3] sm:$0xff] %vm774_vm0, %v4489_v26 }
  0x9b   : > { %809 = vst.msk [vmem:[#allocation3 + $0x10] sm:$0xff] %vm774_vm0, %v4489_v26  ;;  %810 = vst.msk [vmem:[#allocation3 + $0x18] sm:$0xff] %vm774_vm0, %v4489_v26 }
  0x9c   : > { %811 = vst.msk [vmem:[#allocation3 + $0x20] sm:$0xff] %vm774_vm0, %v4489_v26  ;;  %812 = vst.msk [vmem:[#allocation3 + $0x28] sm:$0xff] %vm774_vm0, %v4489_v26 }
  0x9d   : > { %813 = vst.msk [vmem:[#allocation3 + $0x30] sm:$0xff] %vm774_vm0, %v4489_v26  ;;  %814 = vst.msk [vmem:[#allocation3 + $0x38] sm:$0xff] %vm774_vm0, %v4489_v26 }
  0x9e   : > { %815 = vst.msk [vmem:[#allocation3 + $0x40] sm:$0xff] %vm774_vm0, %v4489_v26  ;;  %816 = vst.msk [vmem:[#allocation3 + $0x48] sm:$0xff] %vm774_vm0, %v4489_v26 }
  0x9f   : > { %817 = vst.msk [vmem:[#allocation3 + $0x50] sm:$0xff] %vm774_vm0, %v4489_v26  ;;  %818 = vst.msk [vmem:[#allocation3 + $0x58] sm:$0xff] %vm774_vm0, %v4489_v26 }
  0xa0   : > { %819 = vst.msk [vmem:[#allocation3 + $0x60] sm:$0xff] %vm774_vm0, %v4489_v26  ;;  %820 = vst.msk [vmem:[#allocation3 + $0x68] sm:$0xff] %vm774_vm0, %v4489_v26 }
  0xa1   : > { %3848 = vmatpush3.bf16.xpose.msra.mxu0 %v4102_v40  ;;  %821 = vst.msk [vmem:[#allocation3 + $0x70] sm:$0xff] %vm774_vm0, %v4489_v26  ;;  %822 = vst.msk [vmem:[#allocation3 + $0x78] sm:$0xff] %vm774_vm0, %v4489_v26 }
  0xa2   : > { %3849 = vmatprep.subr.bf16.mxu0 %v4103_v41  ;;  %823 = vst.msk [vmem:[#allocation3 + $0x80] sm:$0xff] %vm774_vm0, %v4489_v26  ;;  %824 = vst.msk [vmem:[#allocation3 + $0x88] sm:$0xff] %vm774_vm0, %v4489_v26 }
  0xa3   : > { %825 = vst.msk [vmem:[#allocation3 + $0x90] sm:$0xff] %vm774_vm0, %v4489_v26  ;;  %826 = vst.msk [vmem:[#allocation3 + $0x98] sm:$0xff] %vm774_vm0, %v4489_v26 }
  0xa4   : > { %827 = vst.msk [vmem:[#allocation3 + $0xa0] sm:$0xff] %vm774_vm0, %v4489_v26  ;;  %828 = vst.msk [vmem:[#allocation3 + $0xa8] sm:$0xff] %vm774_vm0, %v4489_v26 }
  0xa5   : > { %829 = vst.msk [vmem:[#allocation3 + $0xb0] sm:$0xff] %vm774_vm0, %v4489_v26  ;;  %830 = vst.msk [vmem:[#allocation3 + $0xb8] sm:$0xff] %vm774_vm0, %v4489_v26 }
  0xa6   : > { %831 = vst.msk [vmem:[#allocation3 + $0xc0] sm:$0xff] %vm774_vm0, %v4489_v26  ;;  %832 = vst.msk [vmem:[#allocation3 + $0xc8] sm:$0xff] %vm774_vm0, %v4489_v26 }
  0xa7   : > { %833 = vst.msk [vmem:[#allocation3 + $0xd0] sm:$0xff] %vm774_vm0, %v4489_v26  ;;  %834 = vst.msk [vmem:[#allocation3 + $0xd8] sm:$0xff] %vm774_vm0, %v4489_v26 }
  0xa8   : > { %835 = vst.msk [vmem:[#allocation3 + $0xe0] sm:$0xff] %vm774_vm0, %v4489_v26  ;;  %836 = vst.msk [vmem:[#allocation3 + $0xe8] sm:$0xff] %vm774_vm0, %v4489_v26 }
  0xa9   : > { %3850 = vmatpush3.bf16.xpose.msra.mxu0 %v4104_v42  ;;  %837 = vst.msk [vmem:[#allocation3 + $0xf0] sm:$0xff] %vm774_vm0, %v4489_v26  ;;  %838 = vst.msk [vmem:[#allocation3 + $0xf8] sm:$0xff] %vm774_vm0, %v4489_v26 }
  0xaa   : > { %3851 = vmatprep.subr.bf16.mxu0 %v4105_v43 }
  0xb1   : > { %3852 = vmatpush3.bf16.xpose.msra.mxu0 %v4106_v44 }
  0xb2   : > { %3853 = vmatprep.subr.bf16.mxu0 %v4107_v45 }
  0xb9   : > { %3854 = vmatpush3.bf16.xpose.msra.mxu0 %v4108_v46 }
  0xba   : > { %3855 = vmatprep.subr.bf16.mxu0 %v4109_v47 }
  0xc1   : > { %3856 = vmatpush3.bf16.xpose.msra.mxu0 %v4110_v48 }
  0xc8   : > { %3858 = vmatmul.mubr.bf16.vlgmr.msra.gmra.mrb[0].mxu0 %v4111_v39 }
  0xc9   : > { %3859 = vmatprep.mubr.bf16.mxu0 %v4112_v49 }
  0xd0   : > { %3860 = vmatmul.mubr.bf16.gmra.mrb[4].mxu0 %v4112_v49 }
  0xd1   : > { %3861 = vmatprep.mubr.bf16.mxu0 %v4113_v50 }
  0xd8   : > { %3862 = vmatmul.mubr.bf16.gmra.mrb[8].mxu0 %v4113_v50 }
  0xd9   : > { %3863 = vmatprep.mubr.bf16.mxu0 %v4114_v51 }
  0xe0   : > { %3864 = vmatmul.mubr.bf16.gmra.mrb[12].mxu0 %v4114_v51 }
  0xe1   : > { %3865 = vmatprep.mubr.bf16.mxu0 %v4115_v52 }
  0xe8   : > { %3866 = vmatmul.mubr.bf16.gmra.mrb[16].mxu0 %v4115_v52 }
  0xe9   : > { %3867 = vmatprep.mubr.bf16.mxu0 %v4116_v53 }
  0xf0   : > { %3868 = vmatmul.mubr.bf16.gmra.mrb[20].mxu0 %v4116_v53 }
  0xf1   : > { %3869 = vmatprep.mubr.bf16.mxu0 %v4117_v54 }
  0xf8   : > { %3870 = vmatmul.mubr.bf16.gmra.mrb[24].mxu0 %v4117_v54 }
  0xf9   : > { %3871 = vmatprep.mubr.bf16.mxu0 %v4118_v55 }
 0x100   : > { %3872 = vmatmul.mubr.bf16.gmra.mrb[28].mxu0 %v4118_v55 }
 0x101   : > { %3873 = vmatprep.mubr.bf16.mxu0 %v4119_v56 }
 0x108   : > { %3874 = vmatmul.mubr.bf16.gmra.mrb[32].mxu0 %v4119_v56 }
 0x109   : > { %3875 = vmatprep.mubr.bf16.mxu0 %v4120_v57 }
 0x110   : > { %3876 = vmatmul.mubr.bf16.gmra.mrb[36].mxu0 %v4120_v57 }
 0x111   : > { %3877 = vmatprep.mubr.bf16.mxu0 %v4121_v58 }
 0x118   : > { %3878 = vmatmul.mubr.bf16.gmra.mrb[40].mxu0 %v4121_v58 }
 0x119   : > { %3879 = vmatprep.mubr.bf16.mxu0 %v4122_v59 }
 0x120   : > { %3880 = vmatmul.mubr.bf16.gmra.mrb[44].mxu0 %v4122_v59 }
 0x121   : > { %3881 = vmatprep.mubr.bf16.mxu0 %v4123_v60 }
 0x128   : > { %3882 = vmatmul.mubr.bf16.gmra.mrb[48].mxu0 %v4123_v60 }
 0x129   : > { %3883 = vmatprep.mubr.bf16.mxu0 %v4124_v61 }
 0x130   : > { %3884 = vmatmul.mubr.bf16.gmra.mrb[52].mxu0 %v4124_v61 }
 0x131   : > { %3885 = vmatprep.mubr.bf16.mxu0 %v4125_v62 }
 0x138   : > { %3886 = vmatmul.mubr.bf16.gmra.mrb[56].mxu0 %v4125_v62 }
 0x139   : > { %3887 = vmatprep.mubr.bf16.mxu0 %v4126_v63 }
 0x140   : > { %3888 = vmatmul.mubr.bf16.gmra.mrb[60].mxu0 %v4126_v63 }
 0x19b   : > { %v4934_v1 = vpop.f32.mrb[0].mxu0 }
 0x19c   : > { %v4936_v2 = vpop.f32.mrb[1].mxu0 }
 0x19d   : > { %v4938_v3 = vpop.f32.mrb[2].mxu0  ;;  %v1384_v4 = vmax.f32 %v4934_v1, %v4936_v2 }
 0x19e   : > { %v4942_v5 = vpop.f32.mrb[3].mxu0 }
 0x19f   : > { %1385 = vmax.xlane.f32.xlu0 %v1384_v4  ;;  %v1387_v6 = vmax.f32 %v4938_v3, %v4942_v5 }
 0x1a3   : > { %1388 = vmax.xlane.f32.xlu0 %v1387_v6  ;;  %v4946_v7 = vpop.f32.mrb[4].mxu0 }
 0x1a4   : > { %v4948_v8 = vpop.f32.mrb[5].mxu0 }
 0x1a5   : > { %v4950_v9 = vpop.f32.mrb[6].mxu0  ;;  %v1390_v10 = vmax.f32 %v4946_v7, %v4948_v8 }
 0x1a6   : > { %v4954_v11 = vpop.f32.mrb[7].mxu0 }
 0x1a7   : > { %1391 = vmax.xlane.f32.xlu1 %v1390_v10  ;;  %v1393_v12 = vmax.f32 %v4950_v9, %v4954_v11 }
 0x1ab   : > { %1394 = vmax.xlane.f32.xlu1 %v1393_v12  ;;  %v4958_v13 = vpop.f32.mrb[8].mxu0 }
 0x1ac   : > { %v4960_v14 = vpop.f32.mrb[9].mxu0 }
 0x1ad   : > { %v4962_v15 = vpop.f32.mrb[10].mxu0  ;;  %v1396_v16 = vmax.f32 %v4958_v13, %v4960_v14 }
 0x1ae   : > { %6273 = vst [vmem:[#allocation10_spill] sm:$0xff] %v4962_v15  ;;  %v4966_v17 = vpop.f32.mrb[11].mxu0 }
 0x1af   : > { %6274 = vst [vmem:[#allocation11_spill] sm:$0xff] %v4966_v17  ;;  %1397 = vmax.xlane.f32.xlu0 %v1396_v16  ;;  %v1399_v19 = vmax.f32 %v4962_v15, %v4966_v17 }
 0x1b1   : > { %1400 = vmax.xlane.f32.xlu1 %v1399_v19 }
 0x1b3   : > { %v4970_v20 = vpop.f32.mrb[12].mxu0 }
 0x1b4   : > { %6275 = vst [vmem:[#allocation12_spill] sm:$0xff] %v4970_v20  ;;  %v4972_v21 = vpop.f32.mrb[13].mxu0 }
 0x1b5   : > { %6276 = vst [vmem:[#allocation13_spill] sm:$0xff] %v4972_v21  ;;  %v4974_v22 = vpop.f32.mrb[14].mxu0  ;;  %v1402_v23 = vmax.f32 %v4970_v20, %v4972_v21  ;;  %v5419_v21 = vld [vmem:[#allocation2 + $0xc8] sm:$0xff]  ;;  %v5433_v20 = vld [vmem:[#allocation2 + $0xd0] sm:$0xff] }
 0x1b6   : > { %6277 = vst [vmem:[#allocation14_spill] sm:$0xff] %v4974_v22  ;;  %v4978_v24 = vpop.f32.mrb[15].mxu0  ;;  %6332 = vst [vmem:[#allocation69_spill] sm:$0xff] %v5419_v21 }
 0x1b7   : > { %6278 = vst [vmem:[#allocation15_spill] sm:$0xff] %v4978_v24  ;;  %1403 = vmax.xlane.f32.xlu0 %v1402_v23  ;;  %v1405_v25 = vmax.f32 %v4974_v22, %v4978_v24  ;;  %6335 = vst [vmem:[#allocation72_spill] sm:$0xff] %v5433_v20 }
 0x1b9   : > { %1406 = vmax.xlane.f32.xlu1 %v1405_v25 }
 0x1bb   : > { %v5014_v27 = vpop.f32.mrb[16].mxu0 }
 0x1bc   : > { %6279 = vst [vmem:[#allocation16_spill] sm:$0xff] %v5014_v27  ;;  %v5016_v28 = vpop.f32.mrb[17].mxu0 }
 0x1bd   : > { %6280 = vst [vmem:[#allocation17_spill] sm:$0xff] %v5016_v28  ;;  %v5018_v29 = vpop.f32.mrb[18].mxu0  ;;  %v1408_v30 = vmax.f32 %v5014_v27, %v5016_v28  ;;  %v5399_v28 = vld [vmem:[#allocation2 + $0xb8] sm:$0xff] }
 0x1be   : > { %6281 = vst [vmem:[#allocation18_spill] sm:$0xff] %v5018_v29  ;;  %v5022_v31 = vpop.f32.mrb[19].mxu0  ;;  %6328 = vst [vmem:[#allocation65_spill] sm:$0xff] %v5399_v28 }
 0x1bf   : > { %6282 = vst [vmem:[#allocation19_spill] sm:$0xff] %v5022_v31  ;;  %1409 = vmax.xlane.f32.xlu0 %v1408_v30  ;;  %v1411_v32 = vmax.f32 %v5018_v29, %v5022_v31 }
 0x1c1   : > { %1412 = vmax.xlane.f32.xlu1 %v1411_v32 }
 0x1c3   : > { %v5026_v33 = vpop.f32.mrb[20].mxu0 }
 0x1c4   : > { %6283 = vst [vmem:[#allocation20_spill] sm:$0xff] %v5026_v33  ;;  %v5028_v34 = vpop.f32.mrb[21].mxu0 }
 0x1c5   : > { %6284 = vst [vmem:[#allocation21_spill] sm:$0xff] %v5028_v34  ;;  %v5030_v35 = vpop.f32.mrb[22].mxu0  ;;  %v1414_v36 = vmax.f32 %v5026_v33, %v5028_v34  ;;  %v5379_v34 = vld [vmem:[#allocation2 + $0xa8] sm:$0xff] }
 0x1c6   : > { %6285 = vst [vmem:[#allocation22_spill] sm:$0xff] %v5030_v35  ;;  %v5034_v37 = vpop.f32.mrb[23].mxu0 }
 0x1c7   : > { %6286 = vst [vmem:[#allocation23_spill] sm:$0xff] %v5034_v37  ;;  %1415 = vmax.xlane.f32.xlu0 %v1414_v36  ;;  %v1417_v38 = vmax.f32 %v5030_v35, %v5034_v37 }
 0x1c9   : > { %1418 = vmax.xlane.f32.xlu1 %v1417_v38 }
 0x1cb   : > { %v5038_v39 = vpop.f32.mrb[24].mxu0 }
 0x1cc   : > { %6287 = vst [vmem:[#allocation24_spill] sm:$0xff] %v5038_v39  ;;  %v5040_v40 = vpop.f32.mrb[25].mxu0 }
 0x1cd   : > { %6288 = vst [vmem:[#allocation25_spill] sm:$0xff] %v5040_v40  ;;  %v5042_v41 = vpop.f32.mrb[26].mxu0  ;;  %v1420_v42 = vmax.f32 %v5038_v39, %v5040_v40  ;;  %v5359_v40 = vld [vmem:[#allocation2 + $0x98] sm:$0xff] }
 0x1ce   : > { %6289 = vst [vmem:[#allocation26_spill] sm:$0xff] %v5042_v41  ;;  %v5046_v43 = vpop.f32.mrb[27].mxu0 }
 0x1cf   : > { %6290 = vst [vmem:[#allocation27_spill] sm:$0xff] %v5046_v43  ;;  %1421 = vmax.xlane.f32.xlu0 %v1420_v42  ;;  %v1423_v44 = vmax.f32 %v5042_v41, %v5046_v43 }
 0x1d1   : > { %1424 = vmax.xlane.f32.xlu1 %v1423_v44 }
 0x1d3   : > { %v5050_v45 = vpop.f32.mrb[28].mxu0 }
 0x1d4   : > { %6291 = vst [vmem:[#allocation28_spill] sm:$0xff] %v5050_v45  ;;  %v5052_v46 = vpop.f32.mrb[29].mxu0 }
 0x1d5   : > { %6292 = vst [vmem:[#allocation29_spill] sm:$0xff] %v5052_v46  ;;  %v5054_v47 = vpop.f32.mrb[30].mxu0  ;;  %v1426_v48 = vmax.f32 %v5050_v45, %v5052_v46  ;;  %v5339_v46 = vld [vmem:[#allocation2 + $0x88] sm:$0xff] }
 0x1d6   : > { %6293 = vst [vmem:[#allocation30_spill] sm:$0xff] %v5054_v47  ;;  %v5058_v49 = vpop.f32.mrb[31].mxu0 }
 0x1d7   : > { %6294 = vst [vmem:[#allocation31_spill] sm:$0xff] %v5058_v49  ;;  %1427 = vmax.xlane.f32.xlu0 %v1426_v48  ;;  %v1429_v50 = vmax.f32 %v5054_v47, %v5058_v49 }
 0x1d9   : > { %1430 = vmax.xlane.f32.xlu1 %v1429_v50 }
 0x1db   : > { %v5062_v51 = vpop.f32.mrb[32].mxu0 }
 0x1dc   : > { %6295 = vst [vmem:[#allocation32_spill] sm:$0xff] %v5062_v51  ;;  %v5064_v52 = vpop.f32.mrb[33].mxu0 }
 0x1dd   : > { %6296 = vst [vmem:[#allocation33_spill] sm:$0xff] %v5064_v52  ;;  %v5066_v53 = vpop.f32.mrb[34].mxu0  ;;  %v1432_v54 = vmax.f32 %v5062_v51, %v5064_v52  ;;  %v5319_v52 = vld [vmem:[#allocation2 + $0x78] sm:$0xff] }
 0x1de   : > { %6297 = vst [vmem:[#allocation34_spill] sm:$0xff] %v5066_v53  ;;  %v5070_v55 = vpop.f32.mrb[35].mxu0 }
 0x1df   : > { %6298 = vst [vmem:[#allocation35_spill] sm:$0xff] %v5070_v55  ;;  %1433 = vmax.xlane.f32.xlu0 %v1432_v54  ;;  %v1435_v56 = vmax.f32 %v5066_v53, %v5070_v55 }
 0x1e1   : > { %1436 = vmax.xlane.f32.xlu1 %v1435_v56 }
 0x1e3   : > { %v5074_v57 = vpop.f32.mrb[36].mxu0 }
 0x1e4   : > { %6299 = vst [vmem:[#allocation36_spill] sm:$0xff] %v5074_v57  ;;  %v5076_v58 = vpop.f32.mrb[37].mxu0 }
 0x1e5   : > { %6300 = vst [vmem:[#allocation37_spill] sm:$0xff] %v5076_v58  ;;  %v5078_v59 = vpop.f32.mrb[38].mxu0  ;;  %v1438_v60 = vmax.f32 %v5074_v57, %v5076_v58  ;;  %v5299_v58 = vld [vmem:[#allocation2 + $0x68] sm:$0xff] }
 0x1e6   : > { %6301 = vst [vmem:[#allocation38_spill] sm:$0xff] %v5078_v59  ;;  %v5082_v61 = vpop.f32.mrb[39].mxu0 }
 0x1e7   : > { %6302 = vst [vmem:[#allocation39_spill] sm:$0xff] %v5082_v61  ;;  %1439 = vmax.xlane.f32.xlu0 %v1438_v60  ;;  %v1441_v62 = vmax.f32 %v5078_v59, %v5082_v61 }
 0x1e9   : > { %1442 = vmax.xlane.f32.xlu1 %v1441_v62 }
 0x1eb   : > { %v5086_v63 = vpop.f32.mrb[40].mxu0 }
 0x1ec   : > { %6303 = vst [vmem:[#allocation40_spill] sm:$0xff] %v5086_v63  ;;  %v5088_v0 = vpop.f32.mrb[41].mxu0 }
 0x1ed   : > { %6304 = vst [vmem:[#allocation41_spill] sm:$0xff] %v5088_v0  ;;  %v5090_v4 = vpop.f32.mrb[42].mxu0  ;;  %v1444_v6 = vmax.f32 %v5086_v63, %v5088_v0  ;;  %v5279_v0 = vld [vmem:[#allocation2 + $0x58] sm:$0xff] }
 0x1ee   : > { %6305 = vst [vmem:[#allocation42_spill] sm:$0xff] %v5090_v4  ;;  %v5094_v10 = vpop.f32.mrb[43].mxu0 }
 0x1ef   : > { %6306 = vst [vmem:[#allocation43_spill] sm:$0xff] %v5094_v10  ;;  %1445 = vmax.xlane.f32.xlu0 %v1444_v6  ;;  %v1447_v12 = vmax.f32 %v5090_v4, %v5094_v10 }
 0x1f1   : > { %1448 = vmax.xlane.f32.xlu1 %v1447_v12 }
 0x1f3   : > { %v5098_v16 = vpop.f32.mrb[44].mxu0 }
 0x1f4   : > { %6307 = vst [vmem:[#allocation44_spill] sm:$0xff] %v5098_v16  ;;  %v5100_v18 = vpop.f32.mrb[45].mxu0 }
 0x1f5   : > { %6308 = vst [vmem:[#allocation45_spill] sm:$0xff] %v5100_v18  ;;  %v5102_v19 = vpop.f32.mrb[46].mxu0  ;;  %v1450_v23 = vmax.f32 %v5098_v16, %v5100_v18  ;;  %v5236_v18 = vld [vmem:[#allocation2 + $0x30] sm:$0xff] }
 0x1f6   : > { %6309 = vst [vmem:[#allocation46_spill] sm:$0xff] %v5102_v19  ;;  %v5106_v25 = vpop.f32.mrb[47].mxu0 }
 0x1f7   : > { %6310 = vst [vmem:[#allocation47_spill] sm:$0xff] %v5106_v25  ;;  %1451 = vmax.xlane.f32.xlu0 %v1450_v23  ;;  %v1453_v26 = vmax.f32 %v5102_v19, %v5106_v25  ;;  %v4140_v25 = vld [vmem:[%s5159_s3 + $0x30] sm:$0xff]  }
 0x1f9   : > { %1454 = vmax.xlane.f32.xlu1 %v1453_v26 }
 0x1fb   : > { %v5110_v30 = vpop.f32.mrb[48].mxu0 }
 0x1fc   : > { %6311 = vst [vmem:[#allocation48_spill] sm:$0xff] %v5110_v30  ;;  %v5112_v32 = vpop.f32.mrb[49].mxu0 }
 0x1fd   : > { %6312 = vst [vmem:[#allocation49_spill] sm:$0xff] %v5112_v32  ;;  %v5114_v36 = vpop.f32.mrb[50].mxu0  ;;  %v1456_v38 = vmax.f32 %v5110_v30, %v5112_v32  ;;  %v5208_v32 = vld [vmem:[#allocation2 + $0x20] sm:$0xff] }
 0x1fe   : > { %6313 = vst [vmem:[#allocation50_spill] sm:$0xff] %v5114_v36  ;;  %v5118_v42 = vpop.f32.mrb[51].mxu0 }
 0x1ff   : > { %6314 = vst [vmem:[#allocation51_spill] sm:$0xff] %v5118_v42  ;;  %1457 = vmax.xlane.f32.xlu0 %v1456_v38  ;;  %v1459_v44 = vmax.f32 %v5114_v36, %v5118_v42  ;;  %v5196_v42 = vld [vmem:[#allocation2 + $0x18] sm:$0xff]  ;;  %v4138_v36 = vld [vmem:[%s5159_s3 + $0x28] sm:$0xff]  }
 0x201   : > { %1460 = vmax.xlane.f32.xlu1 %v1459_v44 }
 0x203   : > { %v5122_v48 = vpop.f32.mrb[52].mxu0 }
 0x204   : > { %6315 = vst [vmem:[#allocation52_spill] sm:$0xff] %v5122_v48  ;;  %v5124_v50 = vpop.f32.mrb[53].mxu0 }
 0x205   : > { %6316 = vst [vmem:[#allocation53_spill] sm:$0xff] %v5124_v50  ;;  %v5126_v54 = vpop.f32.mrb[54].mxu0  ;;  %v1462_v56 = vmax.f32 %v5122_v48, %v5124_v50  ;;  %v4136_v48 = vld [vmem:[%s5159_s3 + $0x20] sm:$0xff]  }
 0x206   : > { %6317 = vst [vmem:[#allocation54_spill] sm:$0xff] %v5126_v54  ;;  %v5130_v60 = vpop.f32.mrb[55].mxu0 }
 0x207   : > { %6318 = vst [vmem:[#allocation55_spill] sm:$0xff] %v5130_v60  ;;  %1463 = vmax.xlane.f32.xlu0 %v1462_v56  ;;  %v1465_v62 = vmax.f32 %v5126_v54, %v5130_v60 }
 0x209   : > { %1466 = vmax.xlane.f32.xlu1 %v1465_v62 }
 0x20b   : > { %v5134_v6 = vpop.f32.mrb[56].mxu0 }
 0x20c   : > { %6319 = vst [vmem:[#allocation56_spill] sm:$0xff] %v5134_v6  ;;  %v5136_v12 = vpop.f32.mrb[57].mxu0 }
 0x20d   : > { %6320 = vst [vmem:[#allocation57_spill] sm:$0xff] %v5136_v12  ;;  %v5138_v23 = vpop.f32.mrb[58].mxu0  ;;  %v1468_v26 = vmax.f32 %v5134_v6, %v5136_v12  ;;  %v4134_v6 = vld [vmem:[%s5159_s3 + $0x18] sm:$0xff]  }
 0x20e   : > { %6321 = vst [vmem:[#allocation58_spill] sm:$0xff] %v5138_v23  ;;  %v5142_v38 = vpop.f32.mrb[59].mxu0 }
 0x20f   : > { %6322 = vst [vmem:[#allocation59_spill] sm:$0xff] %v5142_v38  ;;  %1469 = vmax.xlane.f32.xlu0 %v1468_v26  ;;  %v1471_v44 = vmax.f32 %v5138_v23, %v5142_v38  ;;  %v4127_v26 = vld [vmem:[%s5159_s3 + $0x40] sm:$0xff]   ;;  %v4132_v38 = vld [vmem:[%s5159_s3 + $0x10] sm:$0xff]  }
 0x210   : > { %3889 = vmatprep.subr.bf16.mxu1 %v4127_v26  ;;  %v4135_v26 = vld [vmem:[%s5159_s3 + $0x60] sm:$0xff]  }
 0x211   : > { %1472 = vmax.xlane.f32.xlu1 %v1471_v44  ;;  %v4128_v44 = vld [vmem:[%s5159_s3] sm:$0xff]  }
 0x212   : > { %3890 = vmatpush3.bf16.msra.mxu1 %v4128_v44  ;;  %v4133_v44 = vld [vmem:[%s5159_s3 + $0x58] sm:$0xff]  }
 0x213   : > { %v5146_v56 = vpop.f32.mrb[60].mxu0 }
 0x214   : > { %6323 = vst [vmem:[#allocation60_spill] sm:$0xff] %v5146_v56  ;;  %v5148_v62 = vpop.f32.mrb[61].mxu0 }
 0x215   : > { %6324 = vst [vmem:[#allocation61_spill] sm:$0xff] %v5148_v62  ;;  %v5150_v60 = vpop.f32.mrb[62].mxu0  ;;  %v1474_v54 = vmax.f32 %v5146_v56, %v5148_v62  ;;  %v4129_v62 = vld [vmem:[%s5159_s3 + $0x48] sm:$0xff]   ;;  %v5164_v56 = vld [vmem:[#allocation2] sm:$0xff] }
 0x216   : > { %6325 = vst [vmem:[#allocation62_spill] sm:$0xff] %v5150_v60  ;;  %v5154_v50 = vpop.f32.mrb[63].mxu0  ;;  %3891 = vmatprep.subr.bf16.mxu1 %v4129_v62 }
 0x217   : > { %6326 = vst [vmem:[#allocation63_spill] sm:$0xff] %v5154_v50  ;;  %v1477_v12 = vmax.f32 %v5150_v60, %v5154_v50  ;;  %1475 = vmax.xlane.f32.xlu0 %v1474_v54  ;;  %v4130_v54 = vld [vmem:[%s5159_s3 + $0x8] sm:$0xff]  }
 0x218   : > { %3892 = vmatpush3.bf16.msra.mxu1 %v4130_v54  ;;  %v5168_v60 = vld [vmem:[#allocation2 + $0x8] sm:$0xff] }
 0x219   : > { %1478 = vmax.xlane.f32.xlu1 %v1477_v12  ;;  %v4131_v12 = vld [vmem:[%s5159_s3 + $0x50] sm:$0xff]  }
 0x21a   : > { %3893 = vmatprep.subr.bf16.mxu1 %v4131_v12  ;;  %v4137_v12 = vld [vmem:[%s5159_s3 + $0x68] sm:$0xff]  }
 0x21c   : > { %3894 = vmatpush3.bf16.msra.mxu1 %v4132_v38 }
 0x21d   : > { %3895 = vmatprep.subr.bf16.mxu1 %v4133_v44  ;;  %v5215_v44 = vld [vmem:[#allocation2 + $0x28] sm:$0xff] }
 0x220   : > { %3896 = vmatpush3.bf16.msra.mxu1 %v4134_v6 }
 0x221   : > { %3897 = vmatprep.subr.bf16.mxu1 %v4135_v26 }
 0x224   : > { %3898 = vmatpush3.bf16.msra.mxu1 %v4136_v48 }
 0x225   : > { %3899 = vmatprep.subr.bf16.mxu1 %v4137_v12 }
 0x228   : > { %3900 = vmatpush3.bf16.msra.mxu1 %v4138_v36  ;;  %v4141_v36 = vld [vmem:[%s5159_s3 + $0x78] sm:$0xff]  }
 0x22c   : > { %v1386_v50 = vpop.xlane.xlu0 %1385 }
 0x22d   : > { %v5172_v23 = vmax.f32 %v5164_v56, %v1386_v50  ;;  %v5184_v50 = vld [vmem:[#allocation2 + $0x10] sm:$0xff] }
 0x22f   : > { %2762 = vst.msk [vmem:[#allocation2] sm:$0xff] %vm774_vm0, %v5172_v23  ;;  %1610 = vperm.xlu0 %4093, %v5172_v23  }
 0x230   : > { %v1389_v62 = vpop.xlane.xlu0 %1388 }
 0x231   : > { %v5181_v54 = vmax.f32 %v5168_v60, %v1389_v62 }
 0x233   : > { %2763 = vst.msk [vmem:[#allocation2 + $0x8] sm:$0xff] %vm774_vm0, %v5181_v54  ;;  %1615 = vperm.xlu1 %4094, %v5181_v54  }
 0x234   : > { %v1392_v38 = vpop.xlane.xlu1 %1391 }
 0x235   : > { %v5193_v62 = vmax.f32 %v5184_v50, %v1392_v38 }
 0x237   : > { %2764 = vst.msk [vmem:[#allocation2 + $0x10] sm:$0xff] %vm774_vm0, %v5193_v62  ;;  %1620 = vperm.xlu1 %4094, %v5193_v62  }
 0x238   : > { %v1395_v6 = vpop.xlane.xlu1 %1394 }
 0x239   : > { %v5205_v38 = vmax.f32 %v5196_v42, %v1395_v6  ;;  %v4139_v6 = vld [vmem:[%s5159_s3 + $0x70] sm:$0xff]  }
 0x23a   : > { %3901 = vmatprep.subr.bf16.mxu1 %v4139_v6  ;;  %v4142_v6 = vld [vmem:[%s5159_s3 + $0x38] sm:$0xff]  }
 0x23b   : > { %2765 = vst.msk [vmem:[#allocation2 + $0x18] sm:$0xff] %vm774_vm0, %v5205_v38  ;;  %1625 = vperm.xlu1 %4094, %v5205_v38   ;;  %3902 = vmatpush3.bf16.msra.mxu1 %v4140_v25 }
 0x23c   : > { %v1398_v48 = vpop.xlane.xlu0 %1397  ;;  %3903 = vmatprep.subr.bf16.mxu1 %v4141_v36 }
 0x23d   : > { %v5219_v30 = vmax.f32 %v5208_v32, %v1398_v48  ;;  %v5259_v48 = vld [vmem:[#allocation2 + $0x48] sm:$0xff] }
 0x23e   : > { %v1401_v12 = vpop.xlane.xlu1 %1400 }
 0x23f   : > { %2766 = vst.msk [vmem:[#allocation2 + $0x20] sm:$0xff] %vm774_vm0, %v5219_v30  ;;  %v5227_v19 = vmax.f32 %v5215_v44, %v1401_v12  ;;  %1630 = vperm.xlu1 %4094, %v5219_v30   ;;  %3904 = vmatpush3.bf16.msra.mxu1 %v4142_v6  ;;  %v5239_v12 = vld [vmem:[#allocation2 + $0x38] sm:$0xff] }
 0x241   : > { %2767 = vst.msk [vmem:[#allocation2 + $0x28] sm:$0xff] %vm774_vm0, %v5227_v19 }
 0x243   : > { %1635 = vperm.xlu1 %4094, %v5227_v19  }
 0x244   : > { %v1404_v26 = vpop.xlane.xlu0 %1403 }
 0x245   : > { %v5242_v16 = vmax.f32 %v5236_v18, %v1404_v26  ;;  %v5256_v26 = vld [vmem:[#allocation2 + $0x40] sm:$0xff] }
 0x246   : > { %v1407_v25 = vpop.xlane.xlu1 %1406 }
 0x247   : > { %2768 = vst.msk [vmem:[#allocation2 + $0x30] sm:$0xff] %vm774_vm0, %v5242_v16  ;;  %v5249_v10 = vmax.f32 %v5239_v12, %v1407_v25  ;;  %1640 = vperm.xlu1 %4094, %v5242_v16  }
 0x249   : > { %2769 = vst.msk [vmem:[#allocation2 + $0x38] sm:$0xff] %vm774_vm0, %v5249_v10 }
 0x24b   : > { %1645 = vperm.xlu1 %4094, %v5249_v10  }
 0x24c   : > { %v1410_v6 = vpop.xlane.xlu0 %1409 }
 0x24d   : > { %v5262_v4 = vmax.f32 %v5256_v26, %v1410_v6  ;;  %v5277_v6 = vld [vmem:[#allocation2 + $0x50] sm:$0xff] }
 0x24e   : > { %v1413_v25 = vpop.xlane.xlu1 %1412 }
 0x24f   : > { %2770 = vst.msk [vmem:[#allocation2 + $0x40] sm:$0xff] %vm774_vm0, %v5262_v4  ;;  %v5269_v36 = vmax.f32 %v5259_v48, %v1413_v25  ;;  %1650 = vperm.xlu1 %4094, %v5262_v4  }
 0x251   : > { %2771 = vst.msk [vmem:[#allocation2 + $0x48] sm:$0xff] %vm774_vm0, %v5269_v36  ;;  %1655 = vperm.xlu0 %4093, %v5269_v36  }
 0x254   : > { %v1416_v61 = vpop.xlane.xlu0 %1415 }
 0x255   : > { %v5282_v59 = vmax.f32 %v5277_v6, %v1416_v61  ;;  %v5297_v61 = vld [vmem:[#allocation2 + $0x60] sm:$0xff] }
 0x256   : > { %v1419_v25 = vpop.xlane.xlu1 %1418 }
 0x257   : > { %2772 = vst.msk [vmem:[#allocation2 + $0x50] sm:$0xff] %vm774_vm0, %v5282_v59  ;;  %v5289_v63 = vmax.f32 %v5279_v0, %v1419_v25  ;;  %1660 = vperm.xlu1 %4094, %v5282_v59  }
 0x259   : > { %2773 = vst.msk [vmem:[#allocation2 + $0x58] sm:$0xff] %vm774_vm0, %v5289_v63  ;;  %1665 = vperm.xlu0 %4093, %v5289_v63  }
 0x25c   : > { %v1422_v55 = vpop.xlane.xlu0 %1421 }
 0x25d   : > { %v5302_v53 = vmax.f32 %v5297_v61, %v1422_v55  ;;  %v5317_v55 = vld [vmem:[#allocation2 + $0x70] sm:$0xff] }
 0x25e   : > { %v1425_v25 = vpop.xlane.xlu1 %1424 }
 0x25f   : > { %2774 = vst.msk [vmem:[#allocation2 + $0x60] sm:$0xff] %vm774_vm0, %v5302_v53  ;;  %v5309_v57 = vmax.f32 %v5299_v58, %v1425_v25  ;;  %1670 = vperm.xlu1 %4094, %v5302_v53  }
 0x261   : > { %2775 = vst.msk [vmem:[#allocation2 + $0x68] sm:$0xff] %vm774_vm0, %v5309_v57  ;;  %1675 = vperm.xlu0 %4093, %v5309_v57  }
 0x264   : > { %v1428_v49 = vpop.xlane.xlu0 %1427 }
 0x265   : > { %v5322_v47 = vmax.f32 %v5317_v55, %v1428_v49  ;;  %v5337_v49 = vld [vmem:[#allocation2 + $0x80] sm:$0xff] }
 0x266   : > { %v1431_v25 = vpop.xlane.xlu1 %1430 }
 0x267   : > { %2776 = vst.msk [vmem:[#allocation2 + $0x70] sm:$0xff] %vm774_vm0, %v5322_v47  ;;  %v5329_v51 = vmax.f32 %v5319_v52, %v1431_v25  ;;  %1680 = vperm.xlu1 %4094, %v5322_v47  }
 0x269   : > { %2777 = vst.msk [vmem:[#allocation2 + $0x78] sm:$0xff] %vm774_vm0, %v5329_v51  ;;  %1685 = vperm.xlu0 %4093, %v5329_v51  }
 0x26c   : > { %v1434_v43 = vpop.xlane.xlu0 %1433 }
 0x26d   : > { %v5342_v41 = vmax.f32 %v5337_v49, %v1434_v43  ;;  %v5357_v43 = vld [vmem:[#allocation2 + $0x90] sm:$0xff] }
 0x26e   : > { %v1437_v25 = vpop.xlane.xlu1 %1436 }
 0x26f   : > { %2778 = vst.msk [vmem:[#allocation2 + $0x80] sm:$0xff] %vm774_vm0, %v5342_v41  ;;  %v5349_v45 = vmax.f32 %v5339_v46, %v1437_v25  ;;  %1690 = vperm.xlu1 %4094, %v5342_v41  }
 0x271   : > { %2779 = vst.msk [vmem:[#allocation2 + $0x88] sm:$0xff] %vm774_vm0, %v5349_v45  ;;  %1695 = vperm.xlu0 %4093, %v5349_v45  }
 0x274   : > { %v1440_v37 = vpop.xlane.xlu0 %1439 }
 0x275   : > { %v5362_v35 = vmax.f32 %v5357_v43, %v1440_v37  ;;  %v5377_v37 = vld [vmem:[#allocation2 + $0xa0] sm:$0xff] }
 0x276   : > { %v1443_v25 = vpop.xlane.xlu1 %1442 }
 0x277   : > { %2780 = vst.msk [vmem:[#allocation2 + $0x90] sm:$0xff] %vm774_vm0, %v5362_v35  ;;  %v5369_v39 = vmax.f32 %v5359_v40, %v1443_v25  ;;  %1700 = vperm.xlu1 %4094, %v5362_v35  }
 0x279   : > { %2781 = vst.msk [vmem:[#allocation2 + $0x98] sm:$0xff] %vm774_vm0, %v5369_v39  ;;  %1705 = vperm.xlu0 %4093, %v5369_v39  }
 0x27c   : > { %v1446_v31 = vpop.xlane.xlu0 %1445 }
 0x27d   : > { %v5382_v29 = vmax.f32 %v5377_v37, %v1446_v31  ;;  %v5397_v31 = vld [vmem:[#allocation2 + $0xb0] sm:$0xff] }
 0x27e   : > { %v1449_v25 = vpop.xlane.xlu1 %1448  ;;  %6327 = vst [vmem:[#allocation64_spill] sm:$0xff] %v5397_v31 }
 0x27f   : > { %2782 = vst.msk [vmem:[#allocation2 + $0xa0] sm:$0xff] %vm774_vm0, %v5382_v29  ;;  %v5389_v33 = vmax.f32 %v5379_v34, %v1449_v25  ;;  %1710 = vperm.xlu1 %4094, %v5382_v29  }
 0x281   : > { %2783 = vst.msk [vmem:[#allocation2 + $0xa8] sm:$0xff] %vm774_vm0, %v5389_v33  ;;  %1715 = vperm.xlu0 %4093, %v5389_v33  }
 0x284   : > { %v1452_v24 = vpop.xlane.xlu0 %1451 }
 0x285   : > { %v5402_v22 = vmax.f32 %v5397_v31, %v1452_v24  ;;  %v5417_v24 = vld [vmem:[#allocation2 + $0xc0] sm:$0xff] }
 0x286   : > { %v1455_v25 = vpop.xlane.xlu1 %1454  ;;  %6331 = vst [vmem:[#allocation68_spill] sm:$0xff] %v5417_v24 }
 0x287   : > { %6329 = vst [vmem:[#allocation66_spill] sm:$0xff] %v5402_v22  ;;  %2784 = vst.msk [vmem:[#allocation2 + $0xb0] sm:$0xff] %vm774_vm0, %v5402_v22  ;;  %v5409_v27 = vmax.f32 %v5399_v28, %v1455_v25  ;;  %1720 = vperm.xlu1 %4094, %v5402_v22   ;;  %v5435_v28 = vld [vmem:[#allocation2 + $0xd8] sm:$0xff] }
 0x288   : > { %6336 = vst [vmem:[#allocation73_spill] sm:$0xff] %v5435_v28 }
 0x289   : > { %6330 = vst [vmem:[#allocation67_spill] sm:$0xff] %v5409_v27  ;;  %2785 = vst.msk [vmem:[#allocation2 + $0xb8] sm:$0xff] %vm774_vm0, %v5409_v27  ;;  %1725 = vperm.xlu0 %4093, %v5409_v27  }
 0x28c   : > { %v1458_v17 = vpop.xlane.xlu0 %1457 }
 0x28d   : > { %v5422_v15 = vmax.f32 %v5417_v24, %v1458_v17 }
 0x28e   : > { %v1461_v25 = vpop.xlane.xlu1 %1460 }
 0x28f   : > { %6333 = vst [vmem:[#allocation70_spill] sm:$0xff] %v5422_v15  ;;  %2786 = vst.msk [vmem:[#allocation2 + $0xc0] sm:$0xff] %vm774_vm0, %v5422_v15  ;;  %v5427_v22 = vmax.f32 %v5419_v21, %v1461_v25  ;;  %1730 = vperm.xlu1 %4094, %v5422_v15   ;;  %v5449_v21 = vld [vmem:[#allocation2 + $0xe0] sm:$0xff]  ;;  %v5454_v15 = vld [vmem:[#allocation2 + $0xe8] sm:$0xff] }
 0x291   : > { %6334 = vst [vmem:[#allocation71_spill] sm:$0xff] %v5427_v22  ;;  %2787 = vst.msk [vmem:[#allocation2 + $0xc8] sm:$0xff] %vm774_vm0, %v5427_v22  ;;  %1735 = vperm.xlu0 %4093, %v5427_v22  }
 0x294   : > { %v1464_v27 = vpop.xlane.xlu0 %1463 }
 0x295   : > { %v5438_v17 = vmax.f32 %v5433_v20, %v1464_v27  ;;  %v6339_v27 = vsub.f32 %v5168_v60, %v5181_v54  ;;  %v6341_v60 = vsub.f32 %v5184_v50, %v5193_v62  ;;  %v5482_v50 = vld [vmem:[#allocation2 + $0xf8] sm:$0xff] }
 0x296   : > { %v1467_v24 = vpop.xlane.xlu1 %1466 }
 0x297   : > { %6337 = vst [vmem:[#allocation74_spill] sm:$0xff] %v5438_v17  ;;  %2788 = vst.msk [vmem:[#allocation2 + $0xd0] sm:$0xff] %vm774_vm0, %v5438_v17  ;;  %v5443_v25 = vmax.f32 %v5435_v28, %v1467_v24  ;;  %1740 = vperm.xlu1 %4094, %v5438_v17   ;;  %v1546_v20 = vmul.f32 1.442695, %v6339_v27  ;;  %v6340_v24 = vsub.f32 %v5164_v56, %v5172_v23  ;;  %v1548_v54 = vmul.f32 1.442695, %v6341_v60 }
 0x298   : > { %v5477_v56 = vld [vmem:[#allocation2 + $0xf0] sm:$0xff] }
 0x299   : > { %6338 = vst [vmem:[#allocation75_spill] sm:$0xff] %v5443_v25  ;;  %2789 = vst.msk [vmem:[#allocation2 + $0xd8] sm:$0xff] %vm774_vm0, %v5443_v25  ;;  %1745 = vperm.xlu0 %4093, %v5443_v25   ;;  %v1544_v28 = vmul.f32 1.442695, %v6340_v24  ;;  %4143 = vpow2.f32 %v1546_v20  ;;  %v6343_v20 = vsub.f32 %v5208_v32, %v5219_v30  ;;  %v6346_v32 = vsub.f32 %v5239_v12, %v5249_v10 }
 0x29b   : > { %4145 = vpow2.f32 %v1544_v28  ;;  %v6344_v28 = vsub.f32 %v5215_v44, %v5227_v19  ;;  %v6347_v19 = vsub.f32 %v5256_v26, %v5262_v4  ;;  %v6349_v4 = vsub.f32 %v5277_v6, %v5282_v59 }
 0x29c   : > { %v1470_v22 = vpop.xlane.xlu0 %1469  ;;  %4147 = vpow2.f32 %v1548_v54  ;;  %v1558_v54 = vmul.f32 1.442695, %v6346_v32  ;;  %v6352_v59 = vsub.f32 %v5299_v58, %v5309_v57  ;;  %v6355_v32 = vsub.f32 %v5337_v49, %v5342_v41 }
 0x29d   : > { %v5457_v31 = vmax.f32 %v5449_v21, %v1470_v22  ;;  %v6342_v22 = vsub.f32 %v5196_v42, %v5205_v38  ;;  %v1554_v24 = vmul.f32 1.442695, %v6344_v28  ;;  %v6345_v38 = vsub.f32 %v5236_v18, %v5242_v16 }
 0x29e   : > { %v1473_v17 = vpop.xlane.xlu1 %1472  ;;  %v1560_v44 = vmul.f32 1.442695, %v6347_v19  ;;  %v1564_v12 = vmul.f32 1.442695, %v6349_v4  ;;  %v1570_v6 = vmul.f32 1.442695, %v6352_v59 }
 0x29f   : > { %2790 = vst.msk [vmem:[#allocation2 + $0xe0] sm:$0xff] %vm774_vm0, %v5457_v31  ;;  %v5465_v25 = vmax.f32 %v5454_v15, %v1473_v17  ;;  %1750 = vperm.xlu1 %4094, %v5457_v31   ;;  %v1550_v23 = vmul.f32 1.442695, %v6342_v22  ;;  %v1552_v17 = vmul.f32 1.442695, %v6343_v20  ;;  %v6348_v22 = vsub.f32 %v5259_v48, %v5269_v36 }
 0x2a0   : > { %v1556_v60 = vmul.f32 1.442695, %v6345_v38 }
 0x2a1   : > { %2791 = vst.msk [vmem:[#allocation2 + $0xe8] sm:$0xff] %vm774_vm0, %v5465_v25  ;;  %1755 = vperm.xlu0 %4093, %v5465_v25   ;;  %4149 = vpow2.f32 %v1550_v23  ;;  %v1562_v10 = vmul.f32 1.442695, %v6348_v22  ;;  %v6350_v23 = vsub.f32 %v5279_v0, %v5289_v63 }
 0x2a2   : > { %4151 = vpow2.f32 %v1552_v17  ;;  %v6351_v17 = vsub.f32 %v5297_v61, %v5302_v53  ;;  %v6353_v53 = vsub.f32 %v5317_v55, %v5322_v47 }
 0x2a3   : > { %v5510_v18 = vpop.eup %4143  ;;  %4153 = vpow2.f32 %v1554_v24  ;;  %v1566_v20 = vmul.f32 1.442695, %v6350_v23 }
 0x2a4   : > { %v1476_v27 = vpop.xlane.xlu0 %1475  ;;  %4155 = vpow2.f32 %v1556_v60  ;;  %v1568_v48 = vmul.f32 1.442695, %v6351_v17  ;;  %v1572_v61 = vmul.f32 1.442695, %v6353_v53 }
 0x2a5   : > { %v5485_v62 = vmax.f32 %v5477_v56, %v1476_v27  ;;  %v5519_v26 = vpop.eup %4145  ;;  %4157 = vpow2.f32 %v1558_v54  ;;  %v1576_v54 = vmul.f32 1.442695, %v6355_v32  ;;  %v6365_v32 = vld [vmem:[#allocation68_spill] sm:$0xff] }
 0x2a6   : > { %v1479_v42 = vpop.xlane.xlu1 %1478  ;;  %4159 = vpow2.f32 %v1560_v44  ;;  %v5528_v36 = vpop.eup %4147 }
 0x2a7   : > { %2792 = vst.msk [vmem:[#allocation2 + $0xf0] sm:$0xff] %vm774_vm0, %v5485_v62  ;;  %v5496_v30 = vmax.f32 %v5482_v50, %v1479_v42  ;;  %1760 = vperm.xlu1 %4094, %v5485_v62   ;;  %4161 = vpow2.f32 %v1562_v10 }
 0x2a8   : > { %4163 = vpow2.f32 %v1564_v12 }
 0x2a9   : > { %2793 = vst.msk [vmem:[#allocation2 + $0xf8] sm:$0xff] %vm774_vm0, %v5496_v30  ;;  %1765 = vperm.xlu0 %4093, %v5496_v30   ;;  %4165 = vpow2.f32 %v1566_v20 }
 0x2aa   : > { %4167 = vpow2.f32 %v1568_v48 }
 0x2ab   : > { %2224 = vperm.xlu1 %4094, %v5510_v18   ;;  %v5536_v0 = vpop.eup %4149  ;;  %4169 = vpow2.f32 %v1570_v6 }
 0x2ac   : > { %v5542_v57 = vpop.eup %4151 }
 0x2ad   : > { %2219 = vperm.xlu0 %4093, %v5519_v26   ;;  %v5550_v47 = vpop.eup %4153 }
 0x2ae   : > { %v1611_v27 = vpop.permute.xlu0 %1610  ;;  %v5552_v55 = vpop.eup %4155 }
 0x2af   : > { %v1768_v28 = vsub.f32 %v4934_v1, %v1611_v27  ;;  %v1769_v63 = vsub.f32 %v4936_v2, %v1611_v27  ;;  %2229 = vperm.xlu1 %4094, %v5528_v36   ;;  %v6354_v1 = vsub.f32 %v5319_v52, %v5329_v51  ;;  %v5558_v19 = vpop.eup %4157  ;;  %v6359_v27 = vsub.f32 %v5377_v37, %v5382_v29 }
 0x2b0   : > { %v5563_v22 = vpop.eup %4159 }
 0x2b1   : > { %v1832_v24 = vmul.f32 1.442695, %v1768_v28  ;;  %v1834_v42 = vmul.f32 1.442695, %v1769_v63  ;;  %2234 = vperm.xlu0 %4093, %v5536_v0   ;;  %v1574_v2 = vmul.f32 1.442695, %v6354_v1  ;;  %v5568_v49 = vpop.eup %4161 }
 0x2b2   : > { %v1616_v58 = vpop.permute.xlu1 %1615  ;;  %v5570_v4 = vpop.eup %4163 }
 0x2b3   : > { %4171 = vpow2.f32 %v1832_v24  ;;  %v1770_v38 = vsub.f32 %v4938_v3, %v1616_v58  ;;  %v1771_v60 = vsub.f32 %v4942_v5, %v1616_v58  ;;  %2239 = vperm.xlu1 %4094, %v5542_v57   ;;  %v6356_v3 = vsub.f32 %v5339_v46, %v5349_v45  ;;  %v5576_v20 = vpop.eup %4165  ;;  %v6361_v58 = vld [vmem:[#allocation64_spill] sm:$0xff] }
 0x2b4   : > { %4173 = vpow2.f32 %v1834_v42  ;;  %v6357_v45 = vsub.f32 %v5357_v43, %v5362_v35  ;;  %v5581_v48 = vpop.eup %4167 }
 0x2b5   : > { %4175 = vpow2.f32 %v1572_v61  ;;  %v1836_v51 = vmul.f32 1.442695, %v1770_v38  ;;  %v1838_v52 = vmul.f32 1.442695, %v1771_v60  ;;  %2244 = vperm.xlu0 %4093, %v5550_v47   ;;  %v1578_v5 = vmul.f32 1.442695, %v6356_v3  ;;  %v5586_v43 = vpop.eup %4169 }
 0x2b6   : > { %4177 = vpow2.f32 %v1574_v2  ;;  %v1621_v44 = vpop.permute.xlu1 %1620  ;;  %v1580_v46 = vmul.f32 1.442695, %v6357_v45  ;;  %v6362_v38 = vld [vmem:[#allocation66_spill] sm:$0xff] }
 0x2b7   : > { %4179 = vpow2.f32 %v1836_v51  ;;  %v1772_v10 = vsub.f32 %v4946_v7, %v1621_v44  ;;  %v1773_v41 = vsub.f32 %v4948_v8, %v1621_v44  ;;  %2249 = vperm.xlu1 %4094, %v5552_v55   ;;  %v6358_v7 = vsub.f32 %v5359_v40, %v5369_v39 }
 0x2b8   : > { %4181 = vpow2.f32 %v1838_v52  ;;  %v1584_v39 = vmul.f32 1.442695, %v6359_v27 }
 0x2b9   : > { %4183 = vpow2.f32 %v1576_v54  ;;  %v1840_v12 = vmul.f32 1.442695, %v1772_v10  ;;  %v1842_v23 = vmul.f32 1.442695, %v1773_v41  ;;  %2254 = vperm.xlu0 %4093, %v5558_v19   ;;  %v1582_v8 = vmul.f32 1.442695, %v6358_v7 }
 0x2ba   : > { %4185 = vpow2.f32 %v1578_v5  ;;  %v1626_v17 = vpop.permute.xlu1 %1625  ;;  %v6366_v5 = vld [vmem:[#allocation10_spill] sm:$0xff]  ;;  %v6367_v10 = vld [vmem:[#allocation11_spill] sm:$0xff]  ;;  %v6368_v7 = vld [vmem:[#allocation65_spill] sm:$0xff] }
 0x2bb   : > { %4187 = vpow2.f32 %v1840_v12  ;;  %v1774_v59 = vsub.f32 %v4950_v9, %v1626_v17  ;;  %v1775_v35 = vsub.f32 %v4954_v11, %v1626_v17  ;;  %2259 = vperm.xlu1 %4094, %v5563_v22   ;;  %v6360_v9 = vsub.f32 %v5379_v34, %v5389_v33 }
 0x2bc   : > { %4189 = vpow2.f32 %v1842_v23 }
 0x2bd   : > { %v4172_v6 = vpop.eup %4171  ;;  %4191 = vpow2.f32 %v1580_v46  ;;  %v1844_v40 = vmul.f32 1.442695, %v1774_v59  ;;  %v1846_v28 = vmul.f32 1.442695, %v1775_v35  ;;  %2264 = vperm.xlu0 %4093, %v5568_v49   ;;  %v1586_v11 = vmul.f32 1.442695, %v6360_v9 }
 0x2be   : > { %v4174_v63 = vpop.eup %4173  ;;  %4193 = vpow2.f32 %v1582_v8  ;;  %v1631_v53 = vpop.permute.xlu1 %1630  ;;  %v6369_v8 = vld [vmem:[#allocation67_spill] sm:$0xff]  ;;  %v6373_v9 = vld [vmem:[#allocation74_spill] sm:$0xff] }
 0x2bf   : > { %v5595_v61 = vpop.eup %4175  ;;  %4195 = vpow2.f32 %v1844_v40  ;;  %v1776_v24 = vsub.f32 %v4958_v13, %v1631_v53  ;;  %v1777_v42 = vsub.f32 %v4960_v14, %v1631_v53  ;;  %2269 = vperm.xlu1 %4094, %v5570_v4   ;;  %v5600_v29 = vadd.f32 %v4174_v63, %v4172_v6  ;;  %v6364_v14 = vld [vmem:[#allocation70_spill] sm:$0xff]  ;;  %v6371_v35 = vld [vmem:[#allocation71_spill] sm:$0xff] }
 0x2c0   : > { %v5602_v37 = vpop.eup %4177  ;;  %4197 = vpow2.f32 %v1846_v28  ;;  %v6363_v13 = vsub.f32 %v6361_v58, %v6362_v38  ;;  %v1536_v54 = vsub.f32 %v6365_v32, %v6364_v14  ;;  %v6370_v17 = vsub.f32 %v6368_v7, %v6369_v8  ;;  %v6379_v7 = vld [vmem:[#allocation14_spill] sm:$0xff] }
 0x2c1   : > { %v4180_v1 = vpop.eup %4179  ;;  %4199 = vpow2.f32 %v1584_v39  ;;  %v1848_v2 = vmul.f32 1.442695, %v1776_v24  ;;  %v1850_v33 = vmul.f32 1.442695, %v1777_v42  ;;  %2274 = vperm.xlu0 %4093, %v5576_v20  }
 0x2c2   : > { %v4182_v34 = vpop.eup %4181  ;;  %4201 = vpow2.f32 %v1586_v11  ;;  %v1588_v60 = vmul.f32 1.442695, %v6363_v13  ;;  %v1636_v51 = vpop.permute.xlu1 %1635  ;;  %v2409_v52 = vpack.c.bf16 %v4180_v1, %v4172_v6  ;;  %v1590_v59 = vmul.f32 1.442695, %v6370_v17  ;;  %v6372_v6 = vld [vmem:[#allocation69_spill] sm:$0xff]  ;;  %v6374_v11 = vld [vmem:[#allocation72_spill] sm:$0xff] }
 0x2c3   : > { %v5610_v3 = vpop.eup %4183  ;;  %4203 = vpow2.f32 %v1848_v2  ;;  %v1778_v44 = vsub.f32 %v6366_v5, %v1636_v51  ;;  %v1779_v41 = vsub.f32 %v6367_v10, %v1636_v51  ;;  %2279 = vperm.xlu1 %4094, %v5581_v48   ;;  %v2410_v45 = vpack.c.bf16 %v4182_v34, %v4174_v63  ;;  %v6378_v5 = vld [vmem:[#allocation73_spill] sm:$0xff]  ;;  %v6380_v17 = vld [vmem:[#allocation15_spill] sm:$0xff] }
 0x2c4   : > { %v5615_v46 = vpop.eup %4185  ;;  %4205 = vpow2.f32 %v1850_v33  ;;  %v5617_v12 = vadd.f32 %v4182_v34, %v4180_v1  ;;  %v1537_v27 = vsub.f32 %v6372_v6, %v6371_v35  ;;  %v1592_v63 = vmul.f32 1.442695, %v1536_v54  ;;  %v6375_v1 = vld [vmem:[#allocation12_spill] sm:$0xff]  ;;  %v6376_v33 = vld [vmem:[#allocation13_spill] sm:$0xff] }
 0x2c5   : > { %v4188_v23 = vpop.eup %4187  ;;  %v1852_v39 = vmul.f32 1.442695, %v1778_v44  ;;  %v1854_v40 = vmul.f32 1.442695, %v1779_v41  ;;  %2569 = vmatprep.mubr.bf16.mxu1 %v2410_v45  ;;  %2284 = vperm.xlu0 %4093, %v5586_v43   ;;  %4207 = vpow2.f32 %v1588_v60  ;;  %v1538_v53 = vsub.f32 %v6374_v11, %v6373_v9 }
 0x2c6   : > { %v4190_v28 = vpop.eup %4189  ;;  %2570 = vmatmul.mubr.bf16.vlgmr.msra.gmra.mrb[0].mxu1 %v2409_v52  ;;  %v1641_v24 = vpop.permute.xlu1 %1640  ;;  %v1594_v60 = vmul.f32 1.442695, %v1537_v27  ;;  %v6377_v52 = vld [vmem:[#allocation75_spill] sm:$0xff]  ;;  %v1540_v11 = vsub.f32 %v5449_v21, %v5457_v31 }
 0x2c7   : > { %v5627_v42 = vpop.eup %4191  ;;  %4209 = vpow2.f32 %v1852_v39  ;;  %v1780_v2 = vsub.f32 %v6375_v1, %v1641_v24  ;;  %v1781_v34 = vsub.f32 %v6376_v33, %v1641_v24  ;;  %2289 = vperm.xlu1 %4094, %v5595_v61   ;;  %v5632_v58 = vadd.f32 %v4190_v28, %v4188_v23  ;;  %v6382_v1 = vld [vmem:[#allocation17_spill] sm:$0xff] }
 0x2c8   : > { %v5634_v38 = vpop.eup %4193  ;;  %4211 = vpow2.f32 %v1854_v40  ;;  %v1596_v51 = vmul.f32 1.442695, %v1538_v53  ;;  %v1539_v44 = vsub.f32 %v6378_v5, %v6377_v52  ;;  %v6381_v53 = vld [vmem:[#allocation16_spill] sm:$0xff] }
 0x2c9   : > { %v4196_v13 = vpop.eup %4195  ;;  %4213 = vpow2.f32 %v1590_v59  ;;  %v1856_v14 = vmul.f32 1.442695, %v1780_v2  ;;  %v1858_v32 = vmul.f32 1.442695, %v1781_v34  ;;  %2294 = vperm.xlu0 %4093, %v5602_v37  }
 0x2ca   : > { %v4198_v54 = vpop.eup %4197  ;;  %4215 = vpow2.f32 %v1592_v63  ;;  %v1646_v10 = vpop.permute.xlu1 %1645  ;;  %v2411_v41 = vpack.c.bf16 %v4196_v13, %v4188_v23  ;;  %v1598_v9 = vmul.f32 1.442695, %v1539_v44  ;;  %v1600_v44 = vmul.f32 1.442695, %v1540_v11  ;;  %v6388_v11 = vld [vmem:[#allocation21_spill] sm:$0xff] }
 0x2cb   : > { %v5639_v45 = vpop.eup %4199  ;;  %4217 = vpow2.f32 %v1856_v14  ;;  %v1782_v8 = vsub.f32 %v6379_v7, %v1646_v10  ;;  %v1783_v59 = vsub.f32 %v6380_v17, %v1646_v10  ;;  %2299 = vperm.xlu1 %4094, %v5610_v3   ;;  %v2412_v35 = vpack.c.bf16 %v4198_v54, %v4190_v28 }
 0x2cc   : > { %v5644_v6 = vpop.eup %4201  ;;  %4219 = vpow2.f32 %v1858_v32  ;;  %v5646_v27 = vadd.f32 %v4198_v54, %v4196_v13  ;;  %v1541_v13 = vsub.f32 %v5454_v15, %v5465_v25  ;;  %v6383_v32 = vld [vmem:[#allocation18_spill] sm:$0xff]  ;;  %v1542_v10 = vsub.f32 %v5477_v56, %v5485_v62 }
 0x2cd   : > { %v4204_v39 = vpop.eup %4203  ;;  %4221 = vpow2.f32 %v1594_v60  ;;  %v1860_v40 = vmul.f32 1.442695, %v1782_v8  ;;  %v1862_v63 = vmul.f32 1.442695, %v1783_v59  ;;  %2577 = vmatprep.mubr.bf16.mxu1 %v2412_v35  ;;  %2304 = vperm.xlu0 %4093, %v5615_v46  }
 0x2ce   : > { %v4206_v23 = vpop.eup %4205  ;;  %4223 = vpow2.f32 %v1596_v51  ;;  %2578 = vmatmul.mubr.bf16.gmra.mrb[4].mxu1 %v2411_v41  ;;  %v1651_v28 = vpop.permute.xlu1 %1650  ;;  %v6384_v51 = vld [vmem:[#allocation19_spill] sm:$0xff]  ;;  %v1602_v59 = vmul.f32 1.442695, %v1541_v13  ;;  %v1604_v62 = vmul.f32 1.442695, %v1542_v10 }
 0x2cf   : > { %4225 = vpow2.f32 %v1860_v40  ;;  %v1784_v24 = vsub.f32 %v6381_v53, %v1651_v28  ;;  %v1785_v2 = vsub.f32 %v6382_v1, %v1651_v28  ;;  %2309 = vperm.xlu1 %4094, %v5627_v42   ;;  %v5654_v33 = vadd.f32 %v4206_v23, %v4204_v39  ;;  %v5656_v34 = vpop.eup %4207 }
 0x2d0   : > { %4227 = vpow2.f32 %v1862_v63  ;;  %v1656_v60 = vpop.permute.xlu0 %1655 }
 0x2d1   : > { %v4210_v14 = vpop.eup %4209  ;;  %v1864_v21 = vmul.f32 1.442695, %v1784_v24  ;;  %v1866_v31 = vmul.f32 1.442695, %v1785_v2  ;;  %v1786_v54 = vsub.f32 %v6383_v32, %v1656_v60  ;;  %v1787_v52 = vsub.f32 %v6384_v51, %v1656_v60  ;;  %2314 = vperm.xlu0 %4093, %v5634_v38  }
 0x2d2   : > { %v4212_v5 = vpop.eup %4211  ;;  %4229 = vpow2.f32 %v1598_v9  ;;  %v2413_v41 = vpack.c.bf16 %v4210_v14, %v4204_v39 }
 0x2d3   : > { %v5665_v7 = vpop.eup %4213  ;;  %4231 = vpow2.f32 %v1864_v21  ;;  %v1868_v15 = vmul.f32 1.442695, %v1786_v54  ;;  %v1870_v25 = vmul.f32 1.442695, %v1787_v52  ;;  %2319 = vperm.xlu1 %4094, %v5639_v45   ;;  %v2414_v8 = vpack.c.bf16 %v4212_v5, %v4206_v23  ;;  %v6387_v23 = vld [vmem:[#allocation20_spill] sm:$0xff] }
 0x2d4   : > { %6385 = vst [vmem:[#allocation64_spill] sm:$0xff] %v5665_v7  ;;  %v5668_v17 = vpop.eup %4215  ;;  %4233 = vpow2.f32 %v1866_v31  ;;  %v5670_v35 = vadd.f32 %v4212_v5, %v4210_v14  ;;  %v6390_v14 = vld [vmem:[#allocation22_spill] sm:$0xff]  ;;  %v6391_v31 = vld [vmem:[#allocation23_spill] sm:$0xff] }
 0x2d5   : > { %v4218_v40 = vpop.eup %4217  ;;  %4235 = vpow2.f32 %v1868_v15  ;;  %2585 = vmatprep.mubr.bf16.mxu1 %v2414_v8  ;;  %2324 = vperm.xlu0 %4093, %v5644_v6  }
 0x2d6   : > { %v4220_v56 = vpop.eup %4219  ;;  %4237 = vpow2.f32 %v1870_v25  ;;  %2586 = vmatmul.mubr.bf16.gmra.mrb[8].mxu1 %v2413_v41  ;;  %v1661_v39 = vpop.permute.xlu1 %1660 }
 0x2d7   : > { %v5673_v63 = vpop.eup %4221  ;;  %4239 = vpow2.f32 %v1600_v44  ;;  %v1788_v9 = vsub.f32 %v6387_v23, %v1661_v39  ;;  %v1789_v28 = vsub.f32 %v6388_v11, %v1661_v39  ;;  %2329 = vperm.xlu1 %4094, %v5656_v34   ;;  %v5678_v53 = vadd.f32 %v4220_v56, %v4218_v40  ;;  %v6394_v39 = vld [vmem:[#allocation25_spill] sm:$0xff] }
 0x2d8   : > { %6386 = vst [vmem:[#allocation66_spill] sm:$0xff] %v5673_v63  ;;  %v5680_v24 = vpop.eup %4223  ;;  %4241 = vpow2.f32 %v1602_v59  ;;  %v1666_v1 = vpop.permute.xlu0 %1665 }
 0x2d9   : > { %6389 = vst [vmem:[#allocation70_spill] sm:$0xff] %v5680_v24  ;;  %v4226_v2 = vpop.eup %4225  ;;  %v1872_v13 = vmul.f32 1.442695, %v1788_v9  ;;  %v1874_v60 = vmul.f32 1.442695, %v1789_v28  ;;  %v1790_v21 = vsub.f32 %v6390_v14, %v1666_v1  ;;  %v1791_v32 = vsub.f32 %v6391_v31, %v1666_v1  ;;  %2334 = vperm.xlu0 %4093, %v5665_v7  }
 0x2da   : > { %v4228_v54 = vpop.eup %4227  ;;  %4243 = vpow2.f32 %v1604_v62  ;;  %v2415_v51 = vpack.c.bf16 %v4226_v2, %v4218_v40  ;;  %v6393_v40 = vld [vmem:[#allocation24_spill] sm:$0xff] }
 0x2db   : > { %4245 = vpow2.f32 %v1872_v13  ;;  %v1876_v52 = vmul.f32 1.442695, %v1790_v21  ;;  %v1878_v5 = vmul.f32 1.442695, %v1791_v32  ;;  %2339 = vperm.xlu1 %4094, %v5668_v17   ;;  %v2416_v44 = vpack.c.bf16 %v4228_v54, %v4220_v56  ;;  %v6397_v21 = vld [vmem:[#allocation27_spill] sm:$0xff] }
 0x2dc   : > { %v5686_v10 = vpop.eup %4229  ;;  %4247 = vpow2.f32 %v1874_v60  ;;  %v5688_v41 = vadd.f32 %v4228_v54, %v4226_v2  ;;  %v6396_v60 = vld [vmem:[#allocation26_spill] sm:$0xff] }
 0x2dd   : > { %6392 = vst [vmem:[#allocation68_spill] sm:$0xff] %v5686_v10  ;;  %v4232_v15 = vpop.eup %4231  ;;  %4249 = vpow2.f32 %v1876_v52  ;;  %2593 = vmatprep.mubr.bf16.mxu1 %v2416_v44  ;;  %2344 = vperm.xlu0 %4093, %v5673_v63  }
 0x2de   : > { %v4234_v25 = vpop.eup %4233  ;;  %4251 = vpow2.f32 %v1878_v5  ;;  %2594 = vmatmul.mubr.bf16.gmra.mrb[12].mxu1 %v2415_v51  ;;  %v1671_v8 = vpop.permute.xlu1 %1670 }
 0x2df   : > { %v4236_v59 = vpop.eup %4235  ;;  %v1792_v62 = vsub.f32 %v6393_v40, %v1671_v8  ;;  %v1793_v23 = vsub.f32 %v6394_v39, %v1671_v8  ;;  %2349 = vperm.xlu1 %4094, %v5680_v24   ;;  %v5694_v56 = vadd.f32 %v4234_v25, %v4232_v15  ;;  %v6401_v39 = vld [vmem:[#allocation29_spill] sm:$0xff] }
 0x2e0   : > { %v4238_v9 = vpop.eup %4237  ;;  %v1676_v11 = vpop.permute.xlu0 %1675  ;;  %v2417_v28 = vpack.c.bf16 %v4236_v59, %v4232_v15 }
 0x2e1   : > { %v5696_v1 = vpop.eup %4239  ;;  %v1880_v2 = vmul.f32 1.442695, %v1792_v62  ;;  %v1882_v13 = vmul.f32 1.442695, %v1793_v23  ;;  %v1794_v14 = vsub.f32 %v6396_v60, %v1676_v11  ;;  %v1795_v31 = vsub.f32 %v6397_v21, %v1676_v11  ;;  %2354 = vperm.xlu0 %4093, %v5686_v10   ;;  %v6402_v21 = vld [vmem:[#allocation30_spill] sm:$0xff] }
 0x2e2   : > { %6395 = vst [vmem:[#allocation10_spill] sm:$0xff] %v5696_v1  ;;  %v5701_v32 = vpop.eup %4241  ;;  %v2418_v54 = vpack.c.bf16 %v4238_v9, %v4234_v25  ;;  %v5703_v51 = vadd.f32 %v4238_v9, %v4236_v59  ;;  %v6400_v59 = vld [vmem:[#allocation28_spill] sm:$0xff] }
 0x2e3   : > { %6398 = vst [vmem:[#allocation11_spill] sm:$0xff] %v5701_v32  ;;  %4253 = vpow2.f32 %v1880_v2  ;;  %v1884_v52 = vmul.f32 1.442695, %v1794_v14  ;;  %v1886_v5 = vmul.f32 1.442695, %v1795_v31  ;;  %2359 = vperm.xlu1 %4094, %v5696_v1  }
 0x2e4   : > { %v5706_v44 = vpop.eup %4243  ;;  %4255 = vpow2.f32 %v1882_v13  ;;  %2601 = vmatprep.mubr.bf16.mxu1 %v2418_v54  ;;  %v6403_v54 = vld [vmem:[#allocation31_spill] sm:$0xff] }
 0x2e5   : > { %6399 = vst [vmem:[#allocation65_spill] sm:$0xff] %v5706_v44  ;;  %v4246_v15 = vpop.eup %4245  ;;  %4257 = vpow2.f32 %v1884_v52  ;;  %2364 = vperm.xlu0 %4093, %v5701_v32  }
 0x2e6   : > { %v4248_v8 = vpop.eup %4247  ;;  %4259 = vpow2.f32 %v1886_v5  ;;  %2602 = vmatmul.mubr.bf16.gmra.mrb[16].mxu1 %v2417_v28  ;;  %v1681_v40 = vpop.permute.xlu1 %1680 }
 0x2e7   : > { %v4250_v25 = vpop.eup %4249  ;;  %v1796_v62 = vsub.f32 %v6400_v59, %v1681_v40  ;;  %v1797_v23 = vsub.f32 %v6401_v39, %v1681_v40  ;;  %2369 = vperm.xlu1 %4094, %v5706_v44   ;;  %v5712_v9 = vadd.f32 %v4248_v8, %v4246_v15 }
 0x2e8   : > { %v4252_v11 = vpop.eup %4251  ;;  %v1686_v2 = vpop.permute.xlu0 %1685  ;;  %v2419_v13 = vpack.c.bf16 %v4250_v25, %v4246_v15 }
 0x2e9   : > { %v1888_v60 = vmul.f32 1.442695, %v1796_v62  ;;  %v1890_v14 = vmul.f32 1.442695, %v1797_v23  ;;  %v1798_v31 = vsub.f32 %v6402_v21, %v1686_v2  ;;  %v1799_v52 = vsub.f32 %v6403_v54, %v1686_v2  ;;  %v6404_v23 = vld [vmem:[#allocation32_spill] sm:$0xff]  ;;  %v6405_v21 = vld [vmem:[#allocation33_spill] sm:$0xff] }
 0x2ea   : > { %v2420_v28 = vpack.c.bf16 %v4252_v11, %v4248_v8  ;;  %v5716_v5 = vadd.f32 %v4252_v11, %v4250_v25 }
 0x2eb   : > { %4261 = vpow2.f32 %v1888_v60  ;;  %v1892_v59 = vmul.f32 1.442695, %v1798_v31  ;;  %v1894_v16 = vmul.f32 1.442695, %v1799_v52  ;;  %v6407_v52 = vld [vmem:[#allocation35_spill] sm:$0xff] }
 0x2ec   : > { %4263 = vpow2.f32 %v1890_v14  ;;  %2609 = vmatprep.mubr.bf16.mxu1 %v2420_v28  ;;  %v6406_v14 = vld [vmem:[#allocation34_spill] sm:$0xff] }
 0x2ed   : > { %v4254_v40 = vpop.eup %4253  ;;  %4265 = vpow2.f32 %v1892_v59 }
 0x2ee   : > { %v4256_v39 = vpop.eup %4255  ;;  %4267 = vpow2.f32 %v1894_v16  ;;  %2610 = vmatmul.mubr.bf16.gmra.mrb[20].mxu1 %v2419_v13  ;;  %v1691_v15 = vpop.permute.xlu1 %1690 }
 0x2ef   : > { %v4258_v62 = vpop.eup %4257  ;;  %v1800_v32 = vsub.f32 %v6404_v23, %v1691_v15  ;;  %v1801_v44 = vsub.f32 %v6405_v21, %v1691_v15  ;;  %v5720_v2 = vadd.f32 %v4256_v39, %v4254_v40 }
 0x2f0   : > { %v4260_v8 = vpop.eup %4259  ;;  %v1696_v25 = vpop.permute.xlu0 %1695  ;;  %v2421_v11 = vpack.c.bf16 %v4258_v62, %v4254_v40 }
 0x2f1   : > { %v1896_v60 = vmul.f32 1.442695, %v1800_v32  ;;  %v1898_v31 = vmul.f32 1.442695, %v1801_v44  ;;  %v1802_v54 = vsub.f32 %v6406_v14, %v1696_v25  ;;  %v1803_v28 = vsub.f32 %v6407_v52, %v1696_v25  ;;  %v6408_v44 = vld [vmem:[#allocation36_spill] sm:$0xff]  ;;  %v6409_v14 = vld [vmem:[#allocation37_spill] sm:$0xff] }
 0x2f2   : > { %v2422_v59 = vpack.c.bf16 %v4260_v8, %v4256_v39  ;;  %v5724_v16 = vadd.f32 %v4260_v8, %v4258_v62 }
 0x2f3   : > { %4269 = vpow2.f32 %v1896_v60  ;;  %v1900_v13 = vmul.f32 1.442695, %v1802_v54  ;;  %v1902_v10 = vmul.f32 1.442695, %v1803_v28  ;;  %v6411_v28 = vld [vmem:[#allocation39_spill] sm:$0xff] }
 0x2f4   : > { %4271 = vpow2.f32 %v1898_v31  ;;  %2617 = vmatprep.mubr.bf16.mxu1 %v2422_v59  ;;  %v6410_v31 = vld [vmem:[#allocation38_spill] sm:$0xff] }
 0x2f5   : > { %v4262_v15 = vpop.eup %4261  ;;  %4273 = vpow2.f32 %v1900_v13 }
 0x2f6   : > { %v4264_v23 = vpop.eup %4263  ;;  %4275 = vpow2.f32 %v1902_v10  ;;  %2618 = vmatmul.mubr.bf16.gmra.mrb[24].mxu1 %v2421_v11  ;;  %v1701_v40 = vpop.permute.xlu1 %1700 }
 0x2f7   : > { %v4266_v32 = vpop.eup %4265  ;;  %v1804_v21 = vsub.f32 %v6408_v44, %v1701_v40  ;;  %v1805_v1 = vsub.f32 %v6409_v14, %v1701_v40  ;;  %v5728_v25 = vadd.f32 %v4264_v23, %v4262_v15 }
 0x2f8   : > { %v4268_v39 = vpop.eup %4267  ;;  %v1706_v62 = vpop.permute.xlu0 %1705  ;;  %v2423_v8 = vpack.c.bf16 %v4266_v32, %v4262_v15 }
 0x2f9   : > { %v1904_v60 = vmul.f32 1.442695, %v1804_v21  ;;  %v1906_v54 = vmul.f32 1.442695, %v1805_v1  ;;  %v1806_v52 = vsub.f32 %v6410_v31, %v1706_v62  ;;  %v1807_v59 = vsub.f32 %v6411_v28, %v1706_v62  ;;  %v6412_v1 = vld [vmem:[#allocation40_spill] sm:$0xff]  ;;  %v6413_v31 = vld [vmem:[#allocation41_spill] sm:$0xff] }
 0x2fa   : > { %v2424_v13 = vpack.c.bf16 %v4268_v39, %v4264_v23  ;;  %v5732_v10 = vadd.f32 %v4268_v39, %v4266_v32 }
 0x2fb   : > { %4277 = vpow2.f32 %v1904_v60  ;;  %v1908_v11 = vmul.f32 1.442695, %v1806_v52  ;;  %v1910_v63 = vmul.f32 1.442695, %v1807_v59  ;;  %v6415_v59 = vld [vmem:[#allocation43_spill] sm:$0xff] }
 0x2fc   : > { %4279 = vpow2.f32 %v1906_v54  ;;  %2625 = vmatprep.mubr.bf16.mxu1 %v2424_v13  ;;  %v6414_v54 = vld [vmem:[#allocation42_spill] sm:$0xff] }
 0x2fd   : > { %v4270_v40 = vpop.eup %4269  ;;  %4281 = vpow2.f32 %v1908_v11 }
 0x2fe   : > { %v4272_v44 = vpop.eup %4271  ;;  %4283 = vpow2.f32 %v1910_v63  ;;  %2626 = vmatmul.mubr.bf16.gmra.mrb[28].mxu1 %v2423_v8  ;;  %v1711_v15 = vpop.permute.xlu1 %1710 }
 0x2ff   : > { %v4274_v21 = vpop.eup %4273  ;;  %v1808_v14 = vsub.f32 %v6412_v1, %v1711_v15  ;;  %v1809_v24 = vsub.f32 %v6413_v31, %v1711_v15  ;;  %v5736_v62 = vadd.f32 %v4272_v44, %v4270_v40 }
 0x300   : > { %v4276_v23 = vpop.eup %4275  ;;  %v1716_v32 = vpop.permute.xlu0 %1715  ;;  %v2425_v39 = vpack.c.bf16 %v4274_v21, %v4270_v40 }
 0x301   : > { %v1912_v60 = vmul.f32 1.442695, %v1808_v14  ;;  %v1914_v52 = vmul.f32 1.442695, %v1809_v24  ;;  %v1810_v28 = vsub.f32 %v6414_v54, %v1716_v32  ;;  %v1811_v13 = vsub.f32 %v6415_v59, %v1716_v32  ;;  %v6416_v14 = vld [vmem:[#allocation44_spill] sm:$0xff]  ;;  %v6417_v32 = vld [vmem:[#allocation45_spill] sm:$0xff] }
 0x302   : > { %v2426_v11 = vpack.c.bf16 %v4276_v23, %v4272_v44  ;;  %v5740_v63 = vadd.f32 %v4276_v23, %v4274_v21 }
 0x303   : > { %4285 = vpow2.f32 %v1912_v60  ;;  %v1916_v8 = vmul.f32 1.442695, %v1810_v28  ;;  %v1918_v7 = vmul.f32 1.442695, %v1811_v13  ;;  %v6418_v28 = vld [vmem:[#allocation46_spill] sm:$0xff]  ;;  %v6419_v13 = vld [vmem:[#allocation47_spill] sm:$0xff] }
 0x304   : > { %4287 = vpow2.f32 %v1914_v52  ;;  %2633 = vmatprep.mubr.bf16.mxu1 %v2426_v11  ;;  %2028 = vadd.xlane.f32.xlu0 %v5617_v12 }
 0x305   : > { %v4278_v15 = vpop.eup %4277  ;;  %4289 = vpow2.f32 %v1916_v8 }
 0x306   : > { %v4280_v1 = vpop.eup %4279  ;;  %4291 = vpow2.f32 %v1918_v7  ;;  %2634 = vmatmul.mubr.bf16.gmra.mrb[32].mxu1 %v2425_v39  ;;  %v1721_v24 = vpop.permute.xlu1 %1720 }
 0x307   : > { %v4282_v40 = vpop.eup %4281  ;;  %v1812_v31 = vsub.f32 %v6416_v14, %v1721_v24  ;;  %v1813_v44 = vsub.f32 %v6417_v32, %v1721_v24  ;;  %v5745_v21 = vadd.f32 %v4280_v1, %v4278_v15  ;;  %v6420_v32 = vld [vmem:[#allocation48_spill] sm:$0xff] }
 0x308   : > { %v4284_v23 = vpop.eup %4283  ;;  %v1726_v60 = vpop.permute.xlu0 %1725  ;;  %2031 = vadd.xlane.f32.xlu0 %v5632_v58  ;;  %v2427_v52 = vpack.c.bf16 %v4282_v40, %v4278_v15 }
 0x309   : > { %v1920_v54 = vmul.f32 1.442695, %v1812_v31  ;;  %v1922_v12 = vmul.f32 1.442695, %v1813_v44  ;;  %v1814_v59 = vsub.f32 %v6418_v28, %v1726_v60  ;;  %v1815_v7 = vsub.f32 %v6419_v13, %v1726_v60  ;;  %v6422_v28 = vld [vmem:[#allocation50_spill] sm:$0xff] }
 0x30a   : > { %v2428_v39 = vpack.c.bf16 %v4284_v23, %v4280_v1  ;;  %v5750_v11 = vadd.f32 %v4284_v23, %v4282_v40  ;;  %v6421_v40 = vld [vmem:[#allocation49_spill] sm:$0xff] }
 0x30b   : > { %4293 = vpow2.f32 %v1920_v54  ;;  %v1924_v8 = vmul.f32 1.442695, %v1814_v59  ;;  %v1926_v14 = vmul.f32 1.442695, %v1815_v7  ;;  %2025 = vadd.xlane.f32.xlu1 %v5600_v29 }
 0x30c   : > { %4295 = vpow2.f32 %v1922_v12  ;;  %2641 = vmatprep.mubr.bf16.mxu1 %v2428_v39  ;;  %2037 = vadd.xlane.f32.xlu0 %v5654_v33 }
 0x30d   : > { %v4286_v58 = vpop.eup %4285  ;;  %4297 = vpow2.f32 %v1924_v8 }
 0x30e   : > { %v4288_v15 = vpop.eup %4287  ;;  %4299 = vpow2.f32 %v1926_v14  ;;  %2642 = vmatmul.mubr.bf16.gmra.mrb[36].mxu1 %v2427_v52  ;;  %v1731_v24 = vpop.permute.xlu1 %1730  ;;  %v6423_v52 = vld [vmem:[#allocation51_spill] sm:$0xff] }
 0x30f   : > { %v4290_v31 = vpop.eup %4289  ;;  %v1816_v1 = vsub.f32 %v6420_v32, %v1731_v24  ;;  %v1817_v44 = vsub.f32 %v6421_v40, %v1731_v24  ;;  %2034 = vadd.xlane.f32.xlu1 %v5646_v27  ;;  %v5757_v23 = vadd.f32 %v4288_v15, %v4286_v58  ;;  %v6424_v32 = vld [vmem:[#allocation52_spill] sm:$0xff] }
 0x310   : > { %v4292_v29 = vpop.eup %4291  ;;  %v1736_v60 = vpop.permute.xlu0 %1735  ;;  %2043 = vadd.xlane.f32.xlu0 %v5678_v53  ;;  %v2429_v33 = vpack.c.bf16 %v4290_v31, %v4286_v58 }
 0x311   : > { %v1928_v54 = vmul.f32 1.442695, %v1816_v1  ;;  %v1930_v12 = vmul.f32 1.442695, %v1817_v44  ;;  %v1818_v59 = vsub.f32 %v6422_v28, %v1736_v60  ;;  %v1819_v13 = vsub.f32 %v6423_v52, %v1736_v60 }
 0x312   : > { %v2430_v7 = vpack.c.bf16 %v4292_v29, %v4288_v15  ;;  %v5762_v39 = vadd.f32 %v4292_v29, %v4290_v31  ;;  %v6425_v31 = vld [vmem:[#allocation53_spill] sm:$0xff] }
 0x313   : > { %4301 = vpow2.f32 %v1928_v54  ;;  %v1932_v8 = vmul.f32 1.442695, %v1818_v59  ;;  %v1934_v14 = vmul.f32 1.442695, %v1819_v13  ;;  %2040 = vadd.xlane.f32.xlu1 %v5670_v35  ;;  %v6426_v54 = vld [vmem:[#allocation54_spill] sm:$0xff] }
 0x314   : > { %4303 = vpow2.f32 %v1930_v12  ;;  %2649 = vmatprep.mubr.bf16.mxu1 %v2430_v7  ;;  %2049 = vadd.xlane.f32.xlu0 %v5694_v56 }
 0x315   : > { %v4294_v27 = vpop.eup %4293  ;;  %4305 = vpow2.f32 %v1932_v8 }
 0x316   : > { %v4296_v53 = vpop.eup %4295  ;;  %4307 = vpow2.f32 %v1934_v14  ;;  %2650 = vmatmul.mubr.bf16.gmra.mrb[40].mxu1 %v2429_v33  ;;  %v1741_v58 = vpop.permute.xlu1 %1740  ;;  %v6427_v33 = vld [vmem:[#allocation55_spill] sm:$0xff] }
 0x317   : > { %v4298_v24 = vpop.eup %4297  ;;  %v1820_v15 = vsub.f32 %v6424_v32, %v1741_v58  ;;  %v1821_v1 = vsub.f32 %v6425_v31, %v1741_v58  ;;  %2046 = vadd.xlane.f32.xlu1 %v5688_v41  ;;  %v5769_v40 = vadd.f32 %v4296_v53, %v4294_v27  ;;  %v6429_v58 = vld [vmem:[#allocation57_spill] sm:$0xff] }
 0x318   : > { %v4300_v35 = vpop.eup %4299  ;;  %v1746_v44 = vpop.permute.xlu0 %1745  ;;  %2055 = vadd.xlane.f32.xlu0 %v5712_v9  ;;  %v2431_v56 = vpack.c.bf16 %v4298_v24, %v4294_v27  ;;  %v6428_v27 = vld [vmem:[#allocation56_spill] sm:$0xff] }
 0x319   : > { %v1936_v29 = vmul.f32 1.442695, %v1820_v15  ;;  %v1938_v60 = vmul.f32 1.442695, %v1821_v1  ;;  %v1822_v12 = vsub.f32 %v6426_v54, %v1746_v44  ;;  %v1823_v28 = vsub.f32 %v6427_v33, %v1746_v44 }
 0x31a   : > { %v2432_v59 = vpack.c.bf16 %v4300_v35, %v4296_v53  ;;  %v5774_v52 = vadd.f32 %v4300_v35, %v4298_v24  ;;  %v6430_v35 = vld [vmem:[#allocation58_spill] sm:$0xff] }
 0x31b   : > { %4309 = vpow2.f32 %v1936_v29  ;;  %v1940_v13 = vmul.f32 1.442695, %v1822_v12  ;;  %v1942_v7 = vmul.f32 1.442695, %v1823_v28  ;;  %2052 = vadd.xlane.f32.xlu1 %v5703_v51  ;;  %v6431_v29 = vld [vmem:[#allocation59_spill] sm:$0xff] }
 0x31c   : > { %4311 = vpow2.f32 %v1938_v60  ;;  %2657 = vmatprep.mubr.bf16.mxu1 %v2432_v59  ;;  %2061 = vadd.xlane.f32.xlu0 %v5720_v2 }
 0x31d   : > { %v4302_v41 = vpop.eup %4301  ;;  %4313 = vpow2.f32 %v1940_v13  ;;  %v6432_v13 = vld [vmem:[#allocation60_spill] sm:$0xff] }
 0x31e   : > { %v4304_v9 = vpop.eup %4303  ;;  %4315 = vpow2.f32 %v1942_v7  ;;  %2658 = vmatmul.mubr.bf16.gmra.mrb[44].mxu1 %v2431_v56  ;;  %v1751_v8 = vpop.permute.xlu1 %1750 }
 0x31f   : > { %v4306_v14 = vpop.eup %4305  ;;  %v1824_v53 = vsub.f32 %v6428_v27, %v1751_v8  ;;  %v1825_v24 = vsub.f32 %v6429_v58, %v1751_v8  ;;  %2058 = vadd.xlane.f32.xlu1 %v5716_v5  ;;  %v2096_v32 = vadd.f32 %v4304_v9, %v4302_v41  ;;  %v6434_v58 = vld [vmem:[#allocation62_spill] sm:$0xff] }
 0x320   : > { %v4308_v15 = vpop.eup %4307  ;;  %v1756_v51 = vpop.permute.xlu0 %1755  ;;  %2067 = vadd.xlane.f32.xlu0 %v5728_v25  ;;  %v2433_v31 = vpack.c.bf16 %v4306_v14, %v4302_v41  ;;  %v6433_v41 = vld [vmem:[#allocation61_spill] sm:$0xff] }
 0x321   : > { %v1944_v2 = vmul.f32 1.442695, %v1824_v53  ;;  %v1946_v1 = vmul.f32 1.442695, %v1825_v24  ;;  %v1826_v44 = vsub.f32 %v6430_v35, %v1756_v51  ;;  %v1827_v56 = vsub.f32 %v6431_v29, %v1756_v51 }
 0x322   : > { %v2434_v60 = vpack.c.bf16 %v4308_v15, %v4304_v9  ;;  %v5784_v54 = vadd.f32 %v4308_v15, %v4306_v14  ;;  %v6435_v15 = vld [vmem:[#allocation63_spill] sm:$0xff] }
 0x323   : > { %4317 = vpow2.f32 %v1944_v2  ;;  %v1948_v12 = vmul.f32 1.442695, %v1826_v44  ;;  %v1950_v33 = vmul.f32 1.442695, %v1827_v56  ;;  %2064 = vadd.xlane.f32.xlu1 %v5724_v16 }
 0x324   : > { %4319 = vpow2.f32 %v1946_v1  ;;  %2665 = vmatprep.mubr.bf16.mxu1 %v2434_v60  ;;  %2073 = vadd.xlane.f32.xlu0 %v5736_v62 }
 0x325   : > { %v4310_v5 = vpop.eup %4309  ;;  %4321 = vpow2.f32 %v1948_v12 }
 0x326   : > { %v4312_v25 = vpop.eup %4311  ;;  %4323 = vpow2.f32 %v1950_v33  ;;  %2666 = vmatmul.mubr.bf16.gmra.mrb[48].mxu1 %v2433_v31  ;;  %v1761_v28 = vpop.permute.xlu1 %1760 }
 0x327   : > { %v4314_v59 = vpop.eup %4313  ;;  %v1828_v7 = vsub.f32 %v6432_v13, %v1761_v28  ;;  %v1829_v9 = vsub.f32 %v6433_v41, %v1761_v28  ;;  %2070 = vadd.xlane.f32.xlu1 %v5732_v10  ;;  %v2102_v8 = vadd.f32 %v4312_v25, %v4310_v5 }
 0x328   : > { %v4316_v14 = vpop.eup %4315  ;;  %v1766_v16 = vpop.permute.xlu0 %1765  ;;  %2079 = vadd.xlane.f32.xlu0 %v5745_v21  ;;  %v2435_v27 = vpack.c.bf16 %v4314_v59, %v4310_v5 }
 0x329   : > { %v1952_v62 = vmul.f32 1.442695, %v1828_v7  ;;  %v1954_v53 = vmul.f32 1.442695, %v1829_v9  ;;  %v1830_v24 = vsub.f32 %v6434_v58, %v1766_v16  ;;  %v1831_v51 = vsub.f32 %v6435_v15, %v1766_v16 }
 0x32a   : > { %v2436_v31 = vpack.c.bf16 %v4316_v14, %v4312_v25  ;;  %v2105_v2 = vadd.f32 %v4316_v14, %v4314_v59  ;;  %v5802_v7 = vpop.permute.xlu1 %2224  ;;  %v6436_v9 = vsub.f32 %v5482_v50, %v5496_v30 }
 0x32b   : > { %4325 = vpow2.f32 %v1952_v62  ;;  %v1956_v1 = vmul.f32 1.442695, %v1830_v24  ;;  %v1958_v35 = vmul.f32 1.442695, %v1831_v51  ;;  %2076 = vadd.xlane.f32.xlu1 %v5740_v63 }
 0x32c   : > { %4327 = vpow2.f32 %v1954_v53  ;;  %2673 = vmatprep.mubr.bf16.mxu1 %v2436_v31  ;;  %2085 = vadd.xlane.f32.xlu0 %v5757_v23  ;;  %v5800_v59 = vpop.permute.xlu0 %2219 }
 0x32d   : > { %v4318_v10 = vpop.eup %4317  ;;  %4329 = vpow2.f32 %v1956_v1 }
 0x32e   : > { %v4320_v21 = vpop.eup %4319  ;;  %4331 = vpow2.f32 %v1958_v35  ;;  %2674 = vmatmul.mubr.bf16.gmra.mrb[52].mxu1 %v2435_v27 }
 0x32f   : > { %v4322_v44 = vpop.eup %4321  ;;  %2082 = vadd.xlane.f32.xlu1 %v5750_v11  ;;  %v2108_v29 = vadd.f32 %v4320_v21, %v4318_v10 }
 0x330   : > { %v4324_v56 = vpop.eup %4323  ;;  %2091 = vadd.xlane.f32.xlu0 %v5769_v40  ;;  %v2437_v60 = vpack.c.bf16 %v4322_v44, %v4318_v10 }
 0x331   : > { %v2438_v12 = vpack.c.bf16 %v4324_v56, %v4320_v21  ;;  %v2111_v33 = vadd.f32 %v4324_v56, %v4322_v44 }
 0x333   : > { %2681 = vmatprep.mubr.bf16.mxu1 %v2438_v12  ;;  %2088 = vadd.xlane.f32.xlu1 %v5762_v39  ;;  %v5805_v39 = vpop.permute.xlu0 %2234 }
 0x334   : > { %2097 = vadd.xlane.f32.xlu0 %v2096_v32  ;;  %v5807_v32 = vpop.permute.xlu1 %2229 }
 0x335   : > { %v4326_v63 = vpop.eup %4325 }
 0x336   : > { %v4328_v23 = vpop.eup %4327  ;;  %2682 = vmatmul.mubr.bf16.gmra.mrb[56].mxu1 %v2437_v60 }
 0x337   : > { %v4330_v5 = vpop.eup %4329  ;;  %2094 = vadd.xlane.f32.xlu1 %v5774_v52  ;;  %v2114_v25 = vadd.f32 %v4328_v23, %v4326_v63  ;;  %v5809_v52 = vpop.permute.xlu0 %2244 }
 0x338   : > { %v4332_v28 = vpop.eup %4331  ;;  %2103 = vadd.xlane.f32.xlu0 %v2102_v8  ;;  %v2439_v11 = vpack.c.bf16 %v4330_v5, %v4326_v63  ;;  %v5811_v41 = vpop.permute.xlu1 %2239  ;;  %v1606_v8 = vmul.f32 1.442695, %v6436_v9  ;;  %v1961_v63 = vld [vmem:[#allocation3 + $0x8] sm:$0xff]  ;;  %v1960_v9 = vld [vmem:[#allocation3] sm:$0xff] }
 0x339   : > { %v2440_v40 = vpack.c.bf16 %v4332_v28, %v4328_v23  ;;  %v2117_v13 = vadd.f32 %v4332_v28, %v4330_v5  ;;  %v1993_v5 = vmul.f32 %v5510_v18, %v1961_v63  ;;  %v1962_v28 = vld [vmem:[#allocation3 + $0x10] sm:$0xff]  ;;  %v1963_v63 = vld [vmem:[#allocation3 + $0x18] sm:$0xff] }
 0x33a   : > { %4333 = vpow2.f32 %v1606_v8 }
 0x33b   : > { %2689 = vmatprep.mubr.bf16.mxu1 %v2440_v40  ;;  %2100 = vadd.xlane.f32.xlu1 %v5784_v54  ;;  %v5816_v54 = vpop.permute.xlu0 %2254 }
 0x33c   : > { %2109 = vadd.xlane.f32.xlu0 %v2108_v29  ;;  %v5818_v14 = vpop.permute.xlu1 %2249 }
 0x33e   : > { %2690 = vmatmul.mubr.bf16.gmra.mrb[60].mxu1 %v2439_v11 }
 0x33f   : > { %2106 = vadd.xlane.f32.xlu1 %v2105_v2  ;;  %v5820_v16 = vpop.permute.xlu0 %2264 }
 0x340   : > { %2115 = vadd.xlane.f32.xlu0 %v2114_v25  ;;  %v5822_v27 = vpop.permute.xlu1 %2259 }
 0x343   : > { %2112 = vadd.xlane.f32.xlu1 %v2111_v33  ;;  %v5827_v53 = vpop.permute.xlu0 %2274 }
 0x344   : > { %v5824_v62 = vpop.eup %4333  ;;  %v5829_v58 = vpop.permute.xlu1 %2269 }
 0x347   : > { %2118 = vadd.xlane.f32.xlu1 %v2117_v13  ;;  %v5831_v50 = vpop.permute.xlu0 %2284  ;;  %v1994_v13 = vmul.f32 %v5528_v36, %v1962_v28  ;;  %v2377_v36 = vmul.f32 0.0, %v5800_v59 }
 0x348   : > { %v5833_v30 = vpop.permute.xlu1 %2279 }
 0x34b   : > { %v5835_v24 = vpop.permute.xlu0 %2294 }
 0x34c   : > { %v5837_v15 = vpop.permute.xlu1 %2289 }
 0x34f   : > { %v5839_v51 = vpop.permute.xlu0 %2304 }
 0x350   : > { %v5841_v31 = vpop.permute.xlu1 %2299 }
 0x353   : > { %v5843_v2 = vpop.permute.xlu0 %2314 }
 0x354   : > { %v5845_v1 = vpop.permute.xlu1 %2309 }
 0x356   : > { %2374 = vperm.xlu0 %4093, %v5824_v62  }
 0x357   : > { %v5847_v35 = vpop.permute.xlu0 %2324 }
 0x358   : > { %v5849_v10 = vpop.permute.xlu1 %2319 }
 0x35b   : > { %v5851_v21 = vpop.permute.xlu0 %2334 }
 0x35c   : > { %6437 = vst [vmem:[#allocation67_spill] sm:$0xff] %v5851_v21  ;;  %v5853_v44 = vpop.permute.xlu1 %2329 }
 0x35f   : > { %v5855_v29 = vpop.permute.xlu0 %2344 }
 0x360   : > { %6438 = vst [vmem:[#allocation71_spill] sm:$0xff] %v5855_v29  ;;  %v5857_v56 = vpop.permute.xlu1 %2339 }
 0x361   : > { %6439 = vst [vmem:[#allocation69_spill] sm:$0xff] %v5857_v56 }
 0x363   : > { %v5859_v60 = vpop.permute.xlu0 %2354 }
 0x364   : > { %6440 = vst [vmem:[#allocation74_spill] sm:$0xff] %v5859_v60  ;;  %v5861_v12 = vpop.permute.xlu1 %2349  ;;  %v1964_v60 = vld [vmem:[#allocation3 + $0x20] sm:$0xff] }
 0x365   : > { %6441 = vst [vmem:[#allocation72_spill] sm:$0xff] %v5861_v12  ;;  %v1996_v18 = vmul.f32 %v5542_v57, %v1964_v60 }
 0x367   : > { %v5863_v33 = vpop.permute.xlu0 %2364 }
 0x368   : > { %6442 = vst [vmem:[#allocation12_spill] sm:$0xff] %v5863_v33  ;;  %v5865_v23 = vpop.permute.xlu1 %2359  ;;  %v1992_v33 = vmul.f32 %v5519_v26, %v1960_v9  ;;  %v1995_v26 = vmul.f32 %v5536_v0, %v1963_v63 }
 0x369   : > { %6443 = vst [vmem:[#allocation13_spill] sm:$0xff] %v5865_v23 }
 0x36c   : > { %v5868_v40 = vpop.permute.xlu1 %2369 }
 0x36d   : > { %6444 = vst [vmem:[#allocation75_spill] sm:$0xff] %v5868_v40  ;;  %v1966_v40 = vld [vmem:[#allocation3 + $0x30] sm:$0xff] }
 0x391   : > { %v2029_v25 = vpop.xlane.xlu0 %2028 }
 0x392   : > { %v2121_v11 = vadd.f32 %v2029_v25, %v1993_v5 }
 0x394   : > { %2154 = vst.msk [vmem:[#allocation3 + $0x8] sm:$0xff] %vm774_vm0, %v2121_v11 }
 0x395   : > { %v2032_v8 = vpop.xlane.xlu0 %2031 }
 0x396   : > { %v2122_v12 = vadd.f32 %v2032_v8, %v1994_v13 }
 0x398   : > { %2155 = vst.msk [vmem:[#allocation3 + $0x10] sm:$0xff] %vm774_vm0, %v2122_v12  ;;  %v2026_v23 = vpop.xlane.xlu1 %2025  ;;  %v1998_v12 = vmul.f32 %v5552_v55, %v1966_v40  ;;  %v1967_v40 = vld [vmem:[#allocation3 + $0x38] sm:$0xff] }
 0x399   : > { %v3905_v29 = vpop.f32.mrb[0].mxu1  ;;  %v2120_v5 = vadd.f32 %v2026_v23, %v1992_v33  ;;  %v2038_v25 = vpop.xlane.xlu0 %2037  ;;  %v1965_v33 = vld [vmem:[#allocation3 + $0x28] sm:$0xff]  ;;  %v2378_v23 = vmul.f32 0.0, %v5802_v7 }
 0x39a   : > { %v3906_v56 = vpop.f32.mrb[1].mxu1  ;;  %v2124_v11 = vadd.f32 %v2038_v25, %v1996_v18  ;;  %v1968_v25 = vld [vmem:[#allocation3 + $0x40] sm:$0xff]  ;;  %v1997_v0 = vmul.f32 %v5550_v47, %v1965_v33 }
 0x39b   : > { %v2798_v28 = vld [vmem:[#allocation3 + $0x8] sm:$0xff]  ;;  %2153 = vst.msk [vmem:[#allocation3] sm:$0xff] %vm774_vm0, %v2120_v5  ;;  %v3907_v13 = vadd.f32 %v3906_v56, %v3905_v29  ;;  %v3908_v8 = vpop.f32.mrb[2].mxu1  ;;  %v2000_v55 = vmul.f32 %v5563_v22, %v1968_v25 }
 0x39c   : > { %4335 = vrcp.f32 %v2798_v28  ;;  %2157 = vst.msk [vmem:[#allocation3 + $0x20] sm:$0xff] %vm774_vm0, %v2124_v11  ;;  %v3909_v57 = vpop.f32.mrb[3].mxu1  ;;  %v2035_v60 = vpop.xlane.xlu1 %2034  ;;  %v1970_v28 = vld [vmem:[#allocation3 + $0x50] sm:$0xff] }
 0x39d   : > { %v3910_v9 = vadd.f32 %v3909_v57, %v3908_v8  ;;  %v2123_v18 = vadd.f32 %v2035_v60, %v1995_v26  ;;  %v2044_v59 = vpop.xlane.xlu0 %2043  ;;  %v5881_v21 = vadd.f32 %v3907_v13, %v2377_v36  ;;  %v2379_v26 = vmul.f32 0.0, %v5807_v32 }
 0x39e   : > { %v2126_v29 = vadd.f32 %v2044_v59, %v1998_v12  ;;  %v1999_v12 = vmul.f32 %v5558_v19, %v1967_v40 }
 0x39f   : > { %2156 = vst.msk [vmem:[#allocation3 + $0x18] sm:$0xff] %vm774_vm0, %v2123_v18  ;;  %v5885_v56 = vadd.f32 %v3910_v9, %v2378_v23  ;;  %v2799_v57 = vld [vmem:[#allocation3 + $0x10] sm:$0xff]  ;;  %v2002_v23 = vmul.f32 %v5570_v4, %v1970_v28  ;;  %v1969_v9 = vld [vmem:[#allocation3 + $0x48] sm:$0xff]  ;;  %v2380_v18 = vmul.f32 0.0, %v5805_v39 }
 0x3a0   : > { %2159 = vst.msk [vmem:[#allocation3 + $0x30] sm:$0xff] %vm774_vm0, %v2126_v29  ;;  %v2041_v63 = vpop.xlane.xlu1 %2040  ;;  %v1972_v29 = vld [vmem:[#allocation3 + $0x60] sm:$0xff]  ;;  %v2001_v4 = vmul.f32 %v5568_v49, %v1969_v9 }
 0x3a1   : > { %v3911_v7 = vpop.f32.mrb[4].mxu1  ;;  %v2125_v5 = vadd.f32 %v2041_v63, %v1997_v0  ;;  %v2050_v11 = vpop.xlane.xlu0 %2049 }
 0x3a2   : > { %v2797_v8 = vld [vmem:[#allocation3] sm:$0xff]  ;;  %v3912_v36 = vpop.f32.mrb[5].mxu1  ;;  %v2128_v13 = vadd.f32 %v2050_v11, %v2000_v55  ;;  %v1971_v11 = vld [vmem:[#allocation3 + $0x58] sm:$0xff] }
 0x3a3   : > { %4337 = vrcp.f32 %v2797_v8  ;;  %2158 = vst.msk [vmem:[#allocation3 + $0x28] sm:$0xff] %vm774_vm0, %v2125_v5  ;;  %v3913_v47 = vadd.f32 %v3912_v36, %v3911_v7  ;;  %v3914_v60 = vpop.f32.mrb[6].mxu1  ;;  %v2801_v19 = vld [vmem:[#allocation3 + $0x20] sm:$0xff]  ;;  %v2004_v5 = vmul.f32 %v5581_v48, %v1972_v29 }
 0x3a4   : > { %2161 = vst.msk [vmem:[#allocation3 + $0x40] sm:$0xff] %vm774_vm0, %v2128_v13  ;;  %v3915_v22 = vpop.f32.mrb[7].mxu1  ;;  %v2047_v33 = vpop.xlane.xlu1 %2046  ;;  %4339 = vrcp.f32 %v2799_v57  ;;  %v1974_v13 = vld [vmem:[#allocation3 + $0x70] sm:$0xff] }
 0x3a5   : > { %v3916_v59 = vadd.f32 %v3915_v22, %v3914_v60  ;;  %v2127_v25 = vadd.f32 %v2047_v33, %v1999_v12  ;;  %v2056_v32 = vpop.xlane.xlu0 %2055  ;;  %v5895_v0 = vadd.f32 %v3913_v47, %v2379_v26  ;;  %v2381_v60 = vmul.f32 0.0, %v5811_v41 }
 0x3a6   : > { %v4336_v63 = vpop.eup %4335  ;;  %v2800_v55 = vld [vmem:[#allocation3 + $0x18] sm:$0xff]  ;;  %v2130_v7 = vadd.f32 %v2056_v32, %v2002_v23  ;;  %v2003_v33 = vmul.f32 %v5576_v20, %v1971_v11  ;;  %v2006_v9 = vmul.f32 %v5595_v61, %v1974_v13 }
 0x3a7   : > { %4341 = vrcp.f32 %v2800_v55  ;;  %2160 = vst.msk [vmem:[#allocation3 + $0x38] sm:$0xff] %vm774_vm0, %v2127_v25  ;;  %2900 = vperm.xlu0 %4093, %v4336_v63   ;;  %v5899_v40 = vadd.f32 %v3916_v59, %v2380_v18  ;;  %v2803_v12 = vld [vmem:[#allocation3 + $0x30] sm:$0xff]  ;;  %v1973_v18 = vld [vmem:[#allocation3 + $0x68] sm:$0xff]  ;;  %v2382_v25 = vmul.f32 0.0, %v5809_v52  ;;  %v1976_v63 = vld [vmem:[#allocation3 + $0x80] sm:$0xff] }
 0x3a8   : > { %2163 = vst.msk [vmem:[#allocation3 + $0x50] sm:$0xff] %vm774_vm0, %v2130_v7  ;;  %v2053_v39 = vpop.xlane.xlu1 %2052  ;;  %4343 = vrcp.f32 %v2801_v19  ;;  %v2005_v61 = vmul.f32 %v5586_v43, %v1973_v18  ;;  %v1975_v11 = vld [vmem:[#allocation3 + $0x78] sm:$0xff]  ;;  %v2383_v43 = vmul.f32 0.0, %v5818_v14  ;;  %v1977_v18 = vld [vmem:[#allocation3 + $0x88] sm:$0xff] }
 0x3a9   : > { %v3917_v28 = vpop.f32.mrb[8].mxu1  ;;  %v2129_v8 = vadd.f32 %v2053_v39, %v2001_v4  ;;  %v2062_v36 = vpop.xlane.xlu0 %2061 }
 0x3aa   : > { %v2802_v26 = vld [vmem:[#allocation3 + $0x28] sm:$0xff]  ;;  %v3918_v57 = vpop.f32.mrb[9].mxu1  ;;  %v2132_v47 = vadd.f32 %v2062_v36, %v2004_v5  ;;  %v2008_v5 = vmul.f32 %v5610_v3, %v1976_v63 }
 0x3ab   : > { %4345 = vrcp.f32 %v2802_v26  ;;  %2162 = vst.msk [vmem:[#allocation3 + $0x48] sm:$0xff] %vm774_vm0, %v2129_v8  ;;  %v3919_v49 = vadd.f32 %v3918_v57, %v3917_v28  ;;  %v3920_v22 = vpop.f32.mrb[10].mxu1  ;;  %v2805_v20 = vld [vmem:[#allocation3 + $0x40] sm:$0xff]  ;;  %v1978_v26 = vld [vmem:[#allocation3 + $0x90] sm:$0xff] }
 0x3ac   : > { %2165 = vst.msk [vmem:[#allocation3 + $0x60] sm:$0xff] %vm774_vm0, %v2132_v47  ;;  %v3921_v48 = vpop.f32.mrb[11].mxu1  ;;  %v2059_v23 = vpop.xlane.xlu1 %2058  ;;  %4347 = vrcp.f32 %v2803_v12 }
 0x3ad   : > { %v4338_v59 = vpop.eup %4337  ;;  %v3922_v32 = vadd.f32 %v3921_v48, %v3920_v22  ;;  %v2131_v41 = vadd.f32 %v2059_v23, %v2003_v33  ;;  %v2068_v29 = vpop.xlane.xlu0 %2067  ;;  %v5909_v55 = vadd.f32 %v3919_v49, %v2381_v60  ;;  %v2007_v22 = vmul.f32 %v5602_v37, %v1975_v11 }
 0x3ae   : > { %v2804_v7 = vld [vmem:[#allocation3 + $0x38] sm:$0xff]  ;;  %v2134_v19 = vadd.f32 %v2068_v29, %v2006_v9  ;;  %2895 = vperm.xlu1 %4094, %v4338_v59   ;;  %v4340_v39 = vpop.eup %4339  ;;  %v2010_v9 = vmul.f32 %v5627_v42, %v1978_v26  ;;  %v1980_v29 = vld [vmem:[#allocation3 + $0xa0] sm:$0xff]  ;;  %v2009_v42 = vmul.f32 %v5615_v46, %v1977_v18  ;;  %v2385_v46 = vmul.f32 0.0, %v5822_v27 }
 0x3af   : > { %4349 = vrcp.f32 %v2804_v7  ;;  %2164 = vst.msk [vmem:[#allocation3 + $0x58] sm:$0xff] %vm774_vm0, %v2131_v41  ;;  %v5913_v4 = vadd.f32 %v3922_v32, %v2382_v25  ;;  %v2807_v12 = vld [vmem:[#allocation3 + $0x50] sm:$0xff]  ;;  %v2384_v25 = vmul.f32 0.0, %v5816_v54 }
 0x3b0   : > { %2167 = vst.msk [vmem:[#allocation3 + $0x70] sm:$0xff] %vm774_vm0, %v2134_v19  ;;  %v2065_v52 = vpop.xlane.xlu1 %2064  ;;  %4351 = vrcp.f32 %v2805_v20 }
 0x3b1   : > { %v4342_v28 = vpop.eup %4341  ;;  %v3923_v8 = vpop.f32.mrb[12].mxu1  ;;  %v2133_v36 = vadd.f32 %v2065_v52, %v2005_v61  ;;  %v1979_v52 = vld [vmem:[#allocation3 + $0x98] sm:$0xff] }
 0x3b2   : > { %v2074_v13 = vpop.xlane.xlu0 %2073  ;;  %v2806_v57 = vld [vmem:[#allocation3 + $0x48] sm:$0xff]  ;;  %v3924_v47 = vpop.f32.mrb[13].mxu1  ;;  %2905 = vperm.xlu1 %4094, %v4340_v39   ;;  %2910 = vperm.xlu0 %4093, %v4342_v28   ;;  %v2012_v39 = vmul.f32 %v5639_v45, %v1980_v29 }
 0x3b3   : > { %v2136_v60 = vadd.f32 %v2074_v13, %v2008_v5  ;;  %4353 = vrcp.f32 %v2806_v57  ;;  %2166 = vst.msk [vmem:[#allocation3 + $0x68] sm:$0xff] %vm774_vm0, %v2133_v36  ;;  %v3925_v49 = vadd.f32 %v3924_v47, %v3923_v8  ;;  %v3926_v3 = vpop.f32.mrb[14].mxu1  ;;  %v4344_v33 = vpop.eup %4343  ;;  %v2809_v19 = vld [vmem:[#allocation3 + $0x60] sm:$0xff]  ;;  %v1982_v36 = vld [vmem:[#allocation3 + $0xb0] sm:$0xff] }
 0x3b4   : > { %v3927_v48 = vpop.f32.mrb[15].mxu1  ;;  %v2071_v23 = vpop.xlane.xlu1 %2070  ;;  %4355 = vrcp.f32 %v2807_v12 }
 0x3b5   : > { %2169 = vst.msk [vmem:[#allocation3 + $0x80] sm:$0xff] %vm774_vm0, %v2136_v60  ;;  %v4346_v59 = vpop.eup %4345  ;;  %v3928_v14 = vadd.f32 %v3927_v48, %v3926_v3  ;;  %v2135_v32 = vadd.f32 %v2071_v23, %v2007_v22  ;;  %v5923_v63 = vadd.f32 %v3925_v49, %v2383_v43  ;;  %v2011_v43 = vmul.f32 %v5634_v38, %v1979_v52 }
 0x3b6   : > { %v2080_v41 = vpop.xlane.xlu0 %2079  ;;  %v2808_v7 = vld [vmem:[#allocation3 + $0x58] sm:$0xff]  ;;  %2915 = vperm.xlu1 %4094, %v4344_v33   ;;  %2920 = vperm.xlu0 %4093, %v4346_v59   ;;  %v4348_v54 = vpop.eup %4347  ;;  %v2014_v22 = vmul.f32 %v5656_v34, %v1982_v36  ;;  %v1981_v33 = vld [vmem:[#allocation3 + $0xa8] sm:$0xff]  ;;  %v2386_v23 = vmul.f32 0.0, %v5820_v16  ;;  %v1984_v59 = vld [vmem:[#allocation3 + $0xc0] sm:$0xff] }
 0x3b7   : > { %v2138_v37 = vadd.f32 %v2080_v41, %v2010_v9  ;;  %4357 = vrcp.f32 %v2808_v7  ;;  %2168 = vst.msk [vmem:[#allocation3 + $0x78] sm:$0xff] %vm774_vm0, %v2135_v32  ;;  %v5927_v20 = vadd.f32 %v3928_v14, %v2384_v25  ;;  %v2811_v47 = vld [vmem:[#allocation3 + $0x70] sm:$0xff]  ;;  %v2013_v34 = vmul.f32 %v5644_v6, %v1981_v33 }
 0x3b8   : > { %v2077_v61 = vpop.xlane.xlu1 %2076  ;;  %4359 = vrcp.f32 %v2809_v19  ;;  %v2016_v7 = vmul.f32 %v5668_v17, %v1984_v59  ;;  %v2387_v6 = vmul.f32 0.0, %v5829_v58  ;;  %v6445_v36 = vld [vmem:[#allocation64_spill] sm:$0xff] }
 0x3b9   : > { %2171 = vst.msk [vmem:[#allocation3 + $0x90] sm:$0xff] %vm774_vm0, %v2138_v37  ;;  %v4350_v5 = vpop.eup %4349  ;;  %v3929_v11 = vpop.f32.mrb[16].mxu1  ;;  %v2137_v28 = vadd.f32 %v2077_v61, %v2009_v42  ;;  %v1983_v37 = vld [vmem:[#allocation3 + $0xb8] sm:$0xff] }
 0x3ba   : > { %v2086_v8 = vpop.xlane.xlu0 %2085  ;;  %v2810_v13 = vld [vmem:[#allocation3 + $0x68] sm:$0xff]  ;;  %v3930_v26 = vpop.f32.mrb[17].mxu1  ;;  %2925 = vperm.xlu1 %4094, %v4348_v54   ;;  %2930 = vperm.xlu0 %4093, %v4350_v5  }
 0x3bb   : > { %v2140_v57 = vadd.f32 %v2086_v8, %v2012_v39  ;;  %4361 = vrcp.f32 %v2810_v13  ;;  %2170 = vst.msk [vmem:[#allocation3 + $0x88] sm:$0xff] %vm774_vm0, %v2137_v28  ;;  %v3931_v60 = vadd.f32 %v3930_v26, %v3929_v11  ;;  %v3932_v45 = vpop.f32.mrb[18].mxu1  ;;  %v4352_v12 = vpop.eup %4351  ;;  %v1986_v39 = vld [vmem:[#allocation3 + $0xd0] sm:$0xff]  ;;  %v2015_v13 = vmul.f32 %v6445_v36, %v1983_v37 }
 0x3bc   : > { %v3933_v49 = vpop.f32.mrb[19].mxu1  ;;  %v2083_v3 = vpop.xlane.xlu1 %2082  ;;  %4363 = vrcp.f32 %v2811_v47  ;;  %v2813_v32 = vld [vmem:[#allocation3 + $0x80] sm:$0xff] }
 0x3bd   : > { %2173 = vst.msk [vmem:[#allocation3 + $0xa0] sm:$0xff] %vm774_vm0, %v2140_v57  ;;  %v4354_v48 = vpop.eup %4353  ;;  %v3934_v27 = vadd.f32 %v3933_v49, %v3932_v45  ;;  %v2139_v9 = vadd.f32 %v2083_v3, %v2011_v43  ;;  %v5937_v25 = vadd.f32 %v3931_v60, %v2385_v46  ;;  %v6446_v47 = vld [vmem:[#allocation70_spill] sm:$0xff]  ;;  %v1985_v45 = vld [vmem:[#allocation3 + $0xc8] sm:$0xff] }
 0x3be   : > { %v2092_v18 = vpop.xlane.xlu0 %2091  ;;  %v2812_v14 = vld [vmem:[#allocation3 + $0x78] sm:$0xff]  ;;  %2935 = vperm.xlu1 %4094, %v4352_v12   ;;  %2940 = vperm.xlu0 %4093, %v4354_v48   ;;  %v4356_v16 = vpop.eup %4355  ;;  %v2018_v60 = vmul.f32 %v6446_v47, %v1986_v39  ;;  %v2388_v12 = vmul.f32 0.0, %v5827_v53  ;;  %v2389_v39 = vmul.f32 0.0, %v5833_v30  ;;  %v2390_v47 = vmul.f32 0.0, %v5831_v50 }
 0x3bf   : > { %v2142_v38 = vadd.f32 %v2092_v18, %v2014_v22  ;;  %4365 = vrcp.f32 %v2812_v14  ;;  %2172 = vst.msk [vmem:[#allocation3 + $0x98] sm:$0xff] %vm774_vm0, %v2139_v9  ;;  %v5941_v41 = vadd.f32 %v3934_v27, %v2386_v23  ;;  %v1988_v22 = vld [vmem:[#allocation3 + $0xe0] sm:$0xff] }
 0x3c0   : > { %v2089_v29 = vpop.xlane.xlu1 %2088  ;;  %4367 = vrcp.f32 %v2813_v32  ;;  %v2815_v28 = vld [vmem:[#allocation3 + $0x90] sm:$0xff]  ;;  %v6447_v9 = vld [vmem:[#allocation66_spill] sm:$0xff] }
 0x3c1   : > { %2175 = vst.msk [vmem:[#allocation3 + $0xb0] sm:$0xff] %vm774_vm0, %v2142_v38  ;;  %v4358_v19 = vpop.eup %4357  ;;  %v3935_v42 = vpop.f32.mrb[20].mxu1  ;;  %v2141_v54 = vadd.f32 %v2089_v29, %v2013_v34  ;;  %v2017_v18 = vmul.f32 %v6447_v9, %v1985_v45  ;;  %v6448_v38 = vld [vmem:[#allocation10_spill] sm:$0xff]  ;;  %v1987_v34 = vld [vmem:[#allocation3 + $0xd8] sm:$0xff] }
 0x3c2   : > { %v2098_v61 = vpop.xlane.xlu0 %2097  ;;  %v2814_v52 = vld [vmem:[#allocation3 + $0x88] sm:$0xff]  ;;  %v3936_v5 = vpop.f32.mrb[21].mxu1  ;;  %2945 = vperm.xlu1 %4094, %v4356_v16   ;;  %2950 = vperm.xlu0 %4093, %v4358_v19   ;;  %v2020_v32 = vmul.f32 %v6448_v38, %v1988_v22  ;;  %v1990_v19 = vld [vmem:[#allocation3 + $0xf0] sm:$0xff] }
 0x3c3   : > { %v2144_v11 = vadd.f32 %v2098_v61, %v2016_v7  ;;  %4369 = vrcp.f32 %v2814_v52  ;;  %2174 = vst.msk [vmem:[#allocation3 + $0xa8] sm:$0xff] %vm774_vm0, %v2141_v54  ;;  %v3937_v8 = vadd.f32 %v3936_v5, %v3935_v42  ;;  %v3938_v17 = vpop.f32.mrb[22].mxu1  ;;  %v4360_v26 = vpop.eup %4359 }
 0x3c4   : > { %v3939_v57 = vpop.f32.mrb[23].mxu1  ;;  %v2095_v46 = vpop.xlane.xlu1 %2094  ;;  %4371 = vrcp.f32 %v2815_v28  ;;  %v2817_v27 = vld [vmem:[#allocation3 + $0xa0] sm:$0xff] }
 0x3c5   : > { %2177 = vst.msk [vmem:[#allocation3 + $0xc0] sm:$0xff] %vm774_vm0, %v2144_v11  ;;  %v4362_v43 = vpop.eup %4361  ;;  %v3940_v58 = vadd.f32 %v3939_v57, %v3938_v17  ;;  %v2143_v49 = vadd.f32 %v2095_v46, %v2015_v13  ;;  %v5951_v33 = vadd.f32 %v3937_v8, %v2387_v6  ;;  %v6449_v6 = vld [vmem:[#allocation68_spill] sm:$0xff]  ;;  %v6450_v13 = vld [vmem:[#allocation65_spill] sm:$0xff]  ;;  %v1989_v57 = vld [vmem:[#allocation3 + $0xe8] sm:$0xff] }
 0x3c6   : > { %v2104_v3 = vpop.xlane.xlu0 %2103  ;;  %v2816_v48 = vld [vmem:[#allocation3 + $0x98] sm:$0xff]  ;;  %2955 = vperm.xlu1 %4094, %v4360_v26   ;;  %2960 = vperm.xlu0 %4093, %v4362_v43   ;;  %v4364_v53 = vpop.eup %4363  ;;  %v2019_v28 = vmul.f32 %v6449_v6, %v1987_v34  ;;  %v2022_v26 = vmul.f32 %v6450_v13, %v1990_v19 }
 0x3c7   : > { %v2146_v23 = vadd.f32 %v2104_v3, %v2018_v60  ;;  %4373 = vrcp.f32 %v2816_v48  ;;  %2176 = vst.msk [vmem:[#allocation3 + $0xb8] sm:$0xff] %vm774_vm0, %v2143_v49  ;;  %v5955_v59 = vadd.f32 %v3940_v58, %v2388_v12  ;;  %v6451_v3 = vld [vmem:[#allocation11_spill] sm:$0xff] }
 0x3c8   : > { %v2101_v14 = vpop.xlane.xlu1 %2100  ;;  %4375 = vrcp.f32 %v2817_v27  ;;  %v2819_v52 = vld [vmem:[#allocation3 + $0xb0] sm:$0xff]  ;;  %v2021_v22 = vmul.f32 %v6451_v3, %v1989_v57  ;;  %v1991_v27 = vld [vmem:[#allocation3 + $0xf8] sm:$0xff] }
 0x3c9   : > { %2179 = vst.msk [vmem:[#allocation3 + $0xd0] sm:$0xff] %vm774_vm0, %v2146_v23  ;;  %v4366_v16 = vpop.eup %4365  ;;  %v3941_v29 = vpop.f32.mrb[24].mxu1  ;;  %v2145_v7 = vadd.f32 %v2101_v14, %v2017_v18 }
 0x3ca   : > { %v2110_v37 = vpop.xlane.xlu0 %2109  ;;  %v2818_v42 = vld [vmem:[#allocation3 + $0xa8] sm:$0xff]  ;;  %v3942_v54 = vpop.f32.mrb[25].mxu1  ;;  %2965 = vperm.xlu1 %4094, %v4364_v53   ;;  %2970 = vperm.xlu0 %4093, %v4366_v16  }
 0x3cb   : > { %v2148_v61 = vadd.f32 %v2110_v37, %v2020_v32  ;;  %4377 = vrcp.f32 %v2818_v42  ;;  %2178 = vst.msk [vmem:[#allocation3 + $0xc8] sm:$0xff] %vm774_vm0, %v2145_v7  ;;  %v3943_v5 = vadd.f32 %v3942_v54, %v3941_v29  ;;  %v3944_v11 = vpop.f32.mrb[26].mxu1  ;;  %v4368_v8 = vpop.eup %4367  ;;  %v2391_v32 = vmul.f32 0.0, %v5837_v15 }
 0x3cc   : > { %v3945_v17 = vpop.f32.mrb[27].mxu1  ;;  %v2107_v36 = vpop.xlane.xlu1 %2106  ;;  %4379 = vrcp.f32 %v2819_v52  ;;  %v2821_v49 = vld [vmem:[#allocation3 + $0xc0] sm:$0xff]  ;;  %v2023_v7 = vmul.f32 %v5824_v62, %v1991_v27 }
 0x3cd   : > { %2181 = vst.msk [vmem:[#allocation3 + $0xe0] sm:$0xff] %vm774_vm0, %v2148_v61  ;;  %v4370_v46 = vpop.eup %4369  ;;  %v3946_v30 = vadd.f32 %v3945_v17, %v3944_v11  ;;  %v2147_v60 = vadd.f32 %v2107_v36, %v2019_v28  ;;  %v5965_v43 = vadd.f32 %v3943_v5, %v2389_v39  ;;  %v2392_v61 = vmul.f32 0.0, %v5835_v24 }
 0x3ce   : > { %v2116_v45 = vpop.xlane.xlu0 %2115  ;;  %v2820_v12 = vld [vmem:[#allocation3 + $0xb8] sm:$0xff]  ;;  %2975 = vperm.xlu1 %4094, %v4368_v8   ;;  %2980 = vperm.xlu0 %4093, %v4370_v46   ;;  %v4372_v23 = vpop.eup %4371  ;;  %v2393_v36 = vmul.f32 0.0, %v5841_v31 }
 0x3cf   : > { %v2150_v58 = vadd.f32 %v2116_v45, %v2022_v26  ;;  %4381 = vrcp.f32 %v2820_v12  ;;  %2180 = vst.msk [vmem:[#allocation3 + $0xd8] sm:$0xff] %vm774_vm0, %v2147_v60  ;;  %v5969_v48 = vadd.f32 %v3946_v30, %v2390_v47  ;;  %v2394_v60 = vmul.f32 0.0, %v5839_v51 }
 0x3d0   : > { %v2113_v50 = vpop.xlane.xlu1 %2112  ;;  %4383 = vrcp.f32 %v2821_v49  ;;  %v2823_v34 = vld [vmem:[#allocation3 + $0xd0] sm:$0xff] }
 0x3d1   : > { %2183 = vst.msk [vmem:[#allocation3 + $0xf0] sm:$0xff] %vm774_vm0, %v2150_v58  ;;  %v4374_v9 = vpop.eup %4373  ;;  %v3947_v18 = vpop.f32.mrb[28].mxu1  ;;  %v2149_v53 = vadd.f32 %v2113_v50, %v2021_v22  ;;  %v2395_v50 = vmul.f32 0.0, %v5845_v1  ;;  %v2397_v1 = vmul.f32 0.0, %v5849_v10 }
 0x3d2   : > { %v2822_v14 = vld [vmem:[#allocation3 + $0xc8] sm:$0xff]  ;;  %v3948_v38 = vpop.f32.mrb[29].mxu1  ;;  %2985 = vperm.xlu1 %4094, %v4372_v23   ;;  %2990 = vperm.xlu0 %4093, %v4374_v9   ;;  %v4376_v37 = vpop.eup %4375 }
 0x3d3   : > { %4385 = vrcp.f32 %v2822_v14  ;;  %2182 = vst.msk [vmem:[#allocation3 + $0xe8] sm:$0xff] %vm774_vm0, %v2149_v53  ;;  %v3949_v16 = vadd.f32 %v3948_v38, %v3947_v18  ;;  %v3950_v29 = vpop.f32.mrb[30].mxu1  ;;  %v2396_v14 = vmul.f32 0.0, %v5843_v2  ;;  %v2398_v2 = vmul.f32 0.0, %v5847_v35 }
 0x3d4   : > { %v3951_v19 = vpop.f32.mrb[31].mxu1  ;;  %v2119_v42 = vpop.xlane.xlu1 %2118  ;;  %4387 = vrcp.f32 %v2823_v34  ;;  %v2825_v11 = vld [vmem:[#allocation3 + $0xe0] sm:$0xff] }
 0x3d5   : > { %v4378_v54 = vpop.eup %4377  ;;  %v3952_v39 = vadd.f32 %v3951_v19, %v3950_v29  ;;  %v2151_v52 = vadd.f32 %v2119_v42, %v2023_v7  ;;  %v5976_v5 = vadd.f32 %v3949_v16, %v2391_v32 }
 0x3d6   : > { %v2824_v15 = vld [vmem:[#allocation3 + $0xd8] sm:$0xff]  ;;  %2995 = vperm.xlu1 %4094, %v4376_v37   ;;  %3000 = vperm.xlu0 %4093, %v4378_v54   ;;  %v4380_v62 = vpop.eup %4379 }
 0x3d7   : > { %4389 = vrcp.f32 %v2824_v15  ;;  %2184 = vst.msk [vmem:[#allocation3 + $0xf8] sm:$0xff] %vm774_vm0, %v2151_v52  ;;  %v5979_v6 = vadd.f32 %v3952_v39, %v2392_v61 }
 0x3d8   : > { %4391 = vrcp.f32 %v2825_v11  ;;  %v2827_v13 = vld [vmem:[#allocation3 + $0xf0] sm:$0xff] }
 0x3d9   : > { %v4382_v28 = vpop.eup %4381  ;;  %v3953_v8 = vpop.f32.mrb[32].mxu1 }
 0x3da   : > { %v2826_v17 = vld [vmem:[#allocation3 + $0xe8] sm:$0xff]  ;;  %v3954_v24 = vpop.f32.mrb[33].mxu1  ;;  %3005 = vperm.xlu1 %4094, %v4380_v62   ;;  %3010 = vperm.xlu0 %4093, %v4382_v28   ;;  %v4384_v46 = vpop.eup %4383  ;;  %v2399_v62 = vmul.f32 0.0, %v5853_v44 }
 0x3db   : > { %4393 = vrcp.f32 %v2826_v17  ;;  %v3955_v26 = vadd.f32 %v3954_v24, %v3953_v8  ;;  %v3956_v57 = vpop.f32.mrb[34].mxu1  ;;  %v6452_v24 = vld [vmem:[#allocation67_spill] sm:$0xff] }
 0x3dc   : > { %v3957_v47 = vpop.f32.mrb[35].mxu1  ;;  %4395 = vrcp.f32 %v2827_v13 }
 0x3dd   : > { %v4386_v30 = vpop.eup %4385  ;;  %v3958_v45 = vadd.f32 %v3957_v47, %v3956_v57  ;;  %v5983_v12 = vadd.f32 %v3955_v26, %v2393_v36  ;;  %v2400_v36 = vmul.f32 0.0, %v6452_v24 }
 0x3de   : > { %v2828_v58 = vld [vmem:[#allocation3 + $0xf8] sm:$0xff]  ;;  %3015 = vperm.xlu1 %4094, %v4384_v46   ;;  %3020 = vperm.xlu0 %4093, %v4386_v30   ;;  %v4388_v31 = vpop.eup %4387 }
 0x3df   : > { %4397 = vrcp.f32 %v2828_v58  ;;  %v5985_v49 = vadd.f32 %v3958_v45, %v2394_v60  ;;  %v6453_v46 = vld [vmem:[#allocation69_spill] sm:$0xff]  ;;  %v6454_v58 = vld [vmem:[#allocation71_spill] sm:$0xff] }
 0x3e0   : > { %v2401_v47 = vmul.f32 0.0, %v6453_v46 }
 0x3e1   : > { %v4390_v3 = vpop.eup %4389  ;;  %v3959_v22 = vpop.f32.mrb[36].mxu1 }
 0x3e2   : > { %v3960_v23 = vpop.f32.mrb[37].mxu1  ;;  %3025 = vperm.xlu1 %4094, %v4388_v31   ;;  %3030 = vperm.xlu0 %4093, %v4390_v3   ;;  %v4392_v9 = vpop.eup %4391  ;;  %v2402_v31 = vmul.f32 0.0, %v6454_v58 }
 0x3e3   : > { %v3961_v27 = vadd.f32 %v3960_v23, %v3959_v22  ;;  %v3962_v51 = vpop.f32.mrb[38].mxu1 }
 0x3e4   : > { %v3963_v18 = vpop.f32.mrb[39].mxu1 }
 0x3e5   : > { %v4394_v53 = vpop.eup %4393  ;;  %v3964_v38 = vadd.f32 %v3963_v18, %v3962_v51  ;;  %v5989_v32 = vadd.f32 %v3961_v27, %v2395_v50  ;;  %v6455_v27 = vld [vmem:[#allocation72_spill] sm:$0xff] }
 0x3e6   : > { %3035 = vperm.xlu1 %4094, %v4392_v9   ;;  %3040 = vperm.xlu0 %4093, %v4394_v53   ;;  %v4396_v16 = vpop.eup %4395  ;;  %v2403_v51 = vmul.f32 0.0, %v6455_v27 }
 0x3e7   : > { %v5991_v34 = vadd.f32 %v3964_v38, %v2396_v14  ;;  %v6456_v14 = vld [vmem:[#allocation74_spill] sm:$0xff] }
 0x3e8   : > { %v2404_v38 = vmul.f32 0.0, %v6456_v14 }
 0x3e9   : > { %v4398_v29 = vpop.eup %4397  ;;  %v3965_v7 = vpop.f32.mrb[40].mxu1 }
 0x3ea   : > { %v3966_v37 = vpop.f32.mrb[41].mxu1  ;;  %3045 = vperm.xlu1 %4094, %v4396_v16   ;;  %3050 = vperm.xlu0 %4093, %v4398_v29  }
 0x3eb   : > { %v3967_v19 = vadd.f32 %v3966_v37, %v3965_v7  ;;  %v3968_v42 = vpop.f32.mrb[42].mxu1 }
 0x3ec   : > { %v3969_v54 = vpop.f32.mrb[43].mxu1 }
 0x3ed   : > { %v3970_v61 = vadd.f32 %v3969_v54, %v3968_v42  ;;  %v5995_v39 = vadd.f32 %v3967_v19, %v2397_v1  ;;  %v6457_v19 = vld [vmem:[#allocation13_spill] sm:$0xff] }
 0x3ee   : > { %v2405_v42 = vmul.f32 0.0, %v6457_v19 }
 0x3ef   : > { %v5997_v52 = vadd.f32 %v3970_v61, %v2398_v2 }
 0x3f1   : > { %v3971_v15 = vpop.f32.mrb[44].mxu1 }
 0x3f2   : > { %v3972_v11 = vpop.f32.mrb[45].mxu1 }
 0x3f3   : > { %v3973_v28 = vadd.f32 %v3972_v11, %v3971_v15  ;;  %v3974_v8 = vpop.f32.mrb[46].mxu1  ;;  %v6458_v15 = vld [vmem:[#allocation12_spill] sm:$0xff] }
 0x3f4   : > { %v3975_v17 = vpop.f32.mrb[47].mxu1  ;;  %v2406_v11 = vmul.f32 0.0, %v6458_v15 }
 0x3f5   : > { %v3976_v10 = vadd.f32 %v3975_v17, %v3974_v8  ;;  %v6001_v13 = vadd.f32 %v3973_v28, %v2399_v62 }
 0x3f7   : > { %v6003_v26 = vadd.f32 %v3976_v10, %v2400_v36  ;;  %v6459_v36 = vld [vmem:[#allocation75_spill] sm:$0xff] }
 0x3f8   : > { %v2407_v10 = vmul.f32 0.0, %v6459_v36 }
 0x3f9   : > { %v3977_v35 = vpop.f32.mrb[48].mxu1 }
 0x3fa   : > { %v3978_v57 = vpop.f32.mrb[49].mxu1 }
 0x3fb   : > { %v3979_v30 = vadd.f32 %v3978_v57, %v3977_v35  ;;  %v3980_v60 = vpop.f32.mrb[50].mxu1 }
 0x3fc   : > { %v3981_v45 = vpop.f32.mrb[51].mxu1 }
 0x3fd   : > { %v3982_v44 = vadd.f32 %v3981_v45, %v3980_v60  ;;  %v6007_v3 = vadd.f32 %v3979_v30, %v2401_v47  ;;  %v6028_v60 = vpop.permute.xlu0 %2374 }
 0x3ff   : > { %v6009_v22 = vadd.f32 %v3982_v44, %v2402_v31 }
 0x401   : > { %v3983_v23 = vpop.f32.mrb[52].mxu1 }
 0x402   : > { %v3984_v50 = vpop.f32.mrb[53].mxu1 }
 0x403   : > { %v3985_v9 = vadd.f32 %v3984_v50, %v3983_v23  ;;  %v3986_v18 = vpop.f32.mrb[54].mxu1 }
 0x404   : > { %v3987_v53 = vpop.f32.mrb[55].mxu1 }
 0x405   : > { %v3988_v16 = vadd.f32 %v3987_v53, %v3986_v18  ;;  %v6013_v29 = vadd.f32 %v3985_v9, %v2403_v51 }
 0x407   : > { %v6015_v7 = vadd.f32 %v3988_v16, %v2404_v38 }
 0x409   : > { %v3989_v37 = vpop.f32.mrb[56].mxu1 }
 0x40a   : > { %v3990_v1 = vpop.f32.mrb[57].mxu1 }
 0x40b   : > { %v3991_v54 = vadd.f32 %v3990_v1, %v3989_v37  ;;  %v3992_v2 = vpop.f32.mrb[58].mxu1 }
 0x40c   : > { %v3993_v61 = vpop.f32.mrb[59].mxu1 }
 0x40d   : > { %v3994_v62 = vadd.f32 %v3993_v61, %v3992_v2  ;;  %v6019_v28 = vadd.f32 %v3991_v54, %v2405_v42 }
 0x40f   : > { %v6021_v8 = vadd.f32 %v3994_v62, %v2406_v11 }
 0x411   : > { %v3995_v17 = vpop.f32.mrb[60].mxu1 }
 0x412   : > { %v3996_v24 = vpop.f32.mrb[61].mxu1 }
 0x413   : > { %v3997_v35 = vadd.f32 %v3996_v24, %v3995_v17  ;;  %v3998_v57 = vpop.f32.mrb[62].mxu1 }
 0x414   : > { %v3999_v46 = vpop.f32.mrb[63].mxu1 }
 0x415   : > { %v6024_v47 = vadd.f32 %v3999_v46, %v3998_v57  ;;  %v6026_v30 = vadd.f32 %v3997_v35, %v2407_v10 }
 0x426   : > { %v2901_v45 = vpop.permute.xlu0 %2900 }
 0x427   : > { %v3054_v31 = vmul.f32 %v2901_v45, %v5885_v56 }
 0x42d   : > { %v2896_v58 = vpop.permute.xlu1 %2895 }
 0x42e   : > { %v3053_v44 = vmul.f32 %v2896_v58, %v5881_v21 }
 0x430   : > { %v3749_v23 = vpack.c.bf16 %v3054_v31, %v3053_v44 }
 0x431   : > { %v2911_v50 = vpop.permute.xlu0 %2910  ;;  %v2906_v27 = vpop.permute.xlu1 %2905 }
 0x432   : > { %3750 = vst [vmem:[%s6033_s12] sm:$0xff] %v3749_v23   ;;  %v3056_v51 = vmul.f32 %v2911_v50, %v5899_v40  ;;  %v3055_v9 = vmul.f32 %v2906_v27, %v5895_v0 }
 0x434   : > { %v3754_v18 = vpack.c.bf16 %v3056_v51, %v3055_v9 }
 0x435   : > { %v2921_v53 = vpop.permute.xlu0 %2920  ;;  %v2916_v14 = vpop.permute.xlu1 %2915 }
 0x436   : > { %3826 = vst [vmem:[%s6033_s12 + $0x8] sm:$0xff] %v3754_v18   ;;  %v3058_v21 = vmul.f32 %v2921_v53, %v5913_v4  ;;  %v3057_v56 = vmul.f32 %v2916_v14, %v5909_v55 }
 0x438   : > { %v3759_v38 = vpack.c.bf16 %v3058_v21, %v3057_v56 }
 0x439   : > { %v2931_v16 = vpop.permute.xlu0 %2930  ;;  %v2926_v37 = vpop.permute.xlu1 %2925 }
 0x43a   : > { %3827 = vst [vmem:[%s6033_s12 + $0x10] sm:$0xff] %v3759_v38   ;;  %v3060_v1 = vmul.f32 %v2931_v16, %v5927_v20  ;;  %v3059_v40 = vmul.f32 %v2926_v37, %v5923_v63 }
 0x43c   : > { %v3764_v0 = vpack.c.bf16 %v3060_v1, %v3059_v40  ;;  %v2408_v1 = vmul.f32 0.0, %v6028_v60 }
 0x43d   : > { %v2941_v19 = vpop.permute.xlu0 %2940  ;;  %v2936_v42 = vpop.permute.xlu1 %2935 }
 0x43e   : > { %3828 = vst [vmem:[%s6033_s12 + $0x18] sm:$0xff] %v3764_v0   ;;  %v3062_v54 = vmul.f32 %v2941_v19, %v5941_v41  ;;  %v3061_v4 = vmul.f32 %v2936_v42, %v5937_v25  ;;  %v2729_v0 = vadd.f32 %v6024_v47, %v2408_v1  ;;  %v3278_v47 = vld [vmem:[%s6033_s12 + $0x8] sm:$0xf] (%p4623_p13) }
 0x43f   : > { %3279 = vst [vmem:[%s6096_s10 + $0x10] sm:$0xf] (%p4623_p13), %v3278_v47 }
 0x440   : > { %v3769_v55 = vpack.c.bf16 %v3062_v54, %v3061_v4 }
 0x441   : > { %v2951_v2 = vpop.permute.xlu0 %2950  ;;  %v2946_v61 = vpop.permute.xlu1 %2945  ;;  %v3282_v60 = vld [vmem:[%s6033_s12 + $0x10] sm:$0xf] (%p4623_p13)  ;;  %v3284_v4 = vld [vmem:[%s6033_s12 + $0x14] sm:$0xf] (%p4623_p13) }
 0x442   : > { %3829 = vst [vmem:[%s6033_s12 + $0x20] sm:$0xff] %v3769_v55   ;;  %v3064_v15 = vmul.f32 %v2951_v2, %v5955_v59  ;;  %v3063_v20 = vmul.f32 %v2946_v61, %v5951_v33  ;;  %3283 = vst [vmem:[%s6096_s10 + $0x20] sm:$0xf] (%p4623_p13), %v3282_v60 }
 0x443   : > { %3285 = vst [vmem:[%s6096_s10 + $0x28] sm:$0xf] (%p4623_p13), %v3284_v4 }
 0x444   : > { %v3774_v63 = vpack.c.bf16 %v3064_v15, %v3063_v20 }
 0x445   : > { %v2961_v11 = vpop.permute.xlu0 %2960  ;;  %v2956_v62 = vpop.permute.xlu1 %2955  ;;  %v3286_v55 = vld [vmem:[%s6033_s12 + $0x18] sm:$0xf] (%p4623_p13)  ;;  %v3288_v2 = vld [vmem:[%s6033_s12 + $0x1c] sm:$0xf] (%p4623_p13) }
 0x446   : > { %3830 = vst [vmem:[%s6033_s12 + $0x28] sm:$0xff] %v3774_v63   ;;  %v3066_v17 = vmul.f32 %v2961_v11, %v5969_v48  ;;  %v3065_v41 = vmul.f32 %v2956_v62, %v5965_v43  ;;  %3287 = vst [vmem:[%s6096_s10 + $0x30] sm:$0xf] (%p4623_p13), %v3286_v55 }
 0x447   : > { %3289 = vst [vmem:[%s6096_s10 + $0x38] sm:$0xf] (%p4623_p13), %v3288_v2 }
 0x448   : > { %v3779_v25 = vpack.c.bf16 %v3066_v17, %v3065_v41 }
 0x449   : > { %v2971_v24 = vpop.permute.xlu0 %2970  ;;  %v2966_v36 = vpop.permute.xlu1 %2965  ;;  %v3290_v61 = vld [vmem:[%s6033_s12 + $0x20] sm:$0xf] (%p4623_p13)  ;;  %v3292_v15 = vld [vmem:[%s6033_s12 + $0x24] sm:$0xf] (%p4623_p13) }
 0x44a   : > { %3831 = vst [vmem:[%s6033_s12 + $0x30] sm:$0xff] %v3779_v25   ;;  %v3068_v10 = vmul.f32 %v2971_v24, %v5979_v6  ;;  %v3067_v59 = vmul.f32 %v2966_v36, %v5976_v5  ;;  %3291 = vst [vmem:[%s6096_s10 + $0x40] sm:$0xf] (%p4623_p13), %v3290_v61 }
 0x44b   : > { %3293 = vst [vmem:[%s6096_s10 + $0x48] sm:$0xf] (%p4623_p13), %v3292_v15 }
 0x44c   : > { %v3784_v33 = vpack.c.bf16 %v3068_v10, %v3067_v59 }
 0x44d   : > { %v2981_v35 = vpop.permute.xlu0 %2980  ;;  %v2976_v57 = vpop.permute.xlu1 %2975  ;;  %v3294_v20 = vld [vmem:[%s6033_s12 + $0x28] sm:$0xf] (%p4623_p13)  ;;  %v3296_v63 = vld [vmem:[%s6033_s12 + $0x2c] sm:$0xf] (%p4623_p13) }
 0x44e   : > { %3832 = vst [vmem:[%s6033_s12 + $0x38] sm:$0xff] %v3784_v33   ;;  %v3070_v46 = vmul.f32 %v2981_v35, %v5985_v49  ;;  %v3069_v48 = vmul.f32 %v2976_v57, %v5983_v12  ;;  %3295 = vst [vmem:[%s6096_s10 + $0x50] sm:$0xf] (%p4623_p13), %v3294_v20 }
 0x44f   : > { %3297 = vst [vmem:[%s6096_s10 + $0x58] sm:$0xf] (%p4623_p13), %v3296_v63 }
 0x450   : > { %v3789_v43 = vpack.c.bf16 %v3070_v46, %v3069_v48 }
 0x451   : > { %v2991_v45 = vpop.permute.xlu0 %2990  ;;  %v2986_v58 = vpop.permute.xlu1 %2985  ;;  %v3298_v11 = vld [vmem:[%s6033_s12 + $0x30] sm:$0xf] (%p4623_p13)  ;;  %v3300_v62 = vld [vmem:[%s6033_s12 + $0x34] sm:$0xf] (%p4623_p13) }
 0x452   : > { %3833 = vst [vmem:[%s6033_s12 + $0x40] sm:$0xff] %v3789_v43   ;;  %v3072_v31 = vmul.f32 %v2991_v45, %v5991_v34  ;;  %v3071_v6 = vmul.f32 %v2986_v58, %v5989_v32  ;;  %3299 = vst [vmem:[%s6096_s10 + $0x60] sm:$0xf] (%p4623_p13), %v3298_v11 }
 0x453   : > { %3301 = vst [vmem:[%s6096_s10 + $0x68] sm:$0xf] (%p4623_p13), %v3300_v62 }
 0x454   : > { %v3794_v5 = vpack.c.bf16 %v3072_v31, %v3071_v6 }
 0x455   : > { %v3001_v44 = vpop.permute.xlu0 %3000  ;;  %v2996_v23 = vpop.permute.xlu1 %2995  ;;  %v3302_v17 = vld [vmem:[%s6033_s12 + $0x38] sm:$0xf] (%p4623_p13)  ;;  %v3304_v41 = vld [vmem:[%s6033_s12 + $0x3c] sm:$0xf] (%p4623_p13) }
 0x456   : > { %3834 = vst [vmem:[%s6033_s12 + $0x48] sm:$0xff] %v3794_v5   ;;  %v3074_v50 = vmul.f32 %v3001_v44, %v5997_v52  ;;  %v3073_v49 = vmul.f32 %v2996_v23, %v5995_v39  ;;  %3303 = vst [vmem:[%s6096_s10 + $0x70] sm:$0xf] (%p4623_p13), %v3302_v17 }
 0x457   : > { %3305 = vst [vmem:[%s6096_s10 + $0x78] sm:$0xf] (%p4623_p13), %v3304_v41 }
 0x458   : > { %v3799_v12 = vpack.c.bf16 %v3074_v50, %v3073_v49 }
 0x459   : > { %v3011_v27 = vpop.permute.xlu0 %3010  ;;  %v3006_v51 = vpop.permute.xlu1 %3005  ;;  %v3306_v25 = vld [vmem:[%s6033_s12 + $0x40] sm:$0xf] (%p4623_p13)  ;;  %v3308_v24 = vld [vmem:[%s6033_s12 + $0x44] sm:$0xf] (%p4623_p13) }
 0x45a   : > { %3835 = vst [vmem:[%s6033_s12 + $0x50] sm:$0xff] %v3799_v12   ;;  %v3076_v9 = vmul.f32 %v3011_v27, %v6003_v26  ;;  %v3075_v34 = vmul.f32 %v3006_v51, %v6001_v13  ;;  %3307 = vst [vmem:[%s6096_s10 + $0x80] sm:$0xf] (%p4623_p13), %v3306_v25 }
 0x45b   : > { %3309 = vst [vmem:[%s6096_s10 + $0x88] sm:$0xf] (%p4623_p13), %v3308_v24 }
 0x45c   : > { %v3804_v18 = vpack.c.bf16 %v3076_v9, %v3075_v34 }
 0x45d   : > { %v3021_v32 = vpop.permute.xlu0 %3020  ;;  %v3016_v53 = vpop.permute.xlu1 %3015  ;;  %v3310_v36 = vld [vmem:[%s6033_s12 + $0x48] sm:$0xf] (%p4623_p13)  ;;  %v3312_v10 = vld [vmem:[%s6033_s12 + $0x4c] sm:$0xf] (%p4623_p13) }
 0x45e   : > { %3836 = vst [vmem:[%s6033_s12 + $0x58] sm:$0xff] %v3804_v18   ;;  %v3078_v14 = vmul.f32 %v3021_v32, %v6009_v22  ;;  %v3077_v52 = vmul.f32 %v3016_v53, %v6007_v3  ;;  %3311 = vst [vmem:[%s6096_s10 + $0x90] sm:$0xf] (%p4623_p13), %v3310_v36 }
 0x45f   : > { %3313 = vst [vmem:[%s6096_s10 + $0x98] sm:$0xf] (%p4623_p13), %v3312_v10 }
 0x460   : > { %v3809_v21 = vpack.c.bf16 %v3078_v14, %v3077_v52 }
 0x461   : > { %v3031_v39 = vpop.permute.xlu0 %3030  ;;  %v3026_v56 = vpop.permute.xlu1 %3025  ;;  %v3314_v59 = vld [vmem:[%s6033_s12 + $0x50] sm:$0xf] (%p4623_p13)  ;;  %v3316_v33 = vld [vmem:[%s6033_s12 + $0x54] sm:$0xf] (%p4623_p13) }
 0x462   : > { %3837 = vst [vmem:[%s6033_s12 + $0x60] sm:$0xff] %v3809_v21   ;;  %v3080_v38 = vmul.f32 %v3031_v39, %v6015_v7  ;;  %v3079_v26 = vmul.f32 %v3026_v56, %v6013_v29  ;;  %3315 = vst [vmem:[%s6096_s10 + $0xa0] sm:$0xf] (%p4623_p13), %v3314_v59 }
 0x463   : > { %3317 = vst [vmem:[%s6096_s10 + $0xa8] sm:$0xf] (%p4623_p13), %v3316_v33 }
 0x464   : > { %v3814_v13 = vpack.c.bf16 %v3080_v38, %v3079_v26 }
 0x465   : > { %v3041_v16 = vpop.permute.xlu0 %3040  ;;  %v3036_v37 = vpop.permute.xlu1 %3035  ;;  %v3318_v35 = vld [vmem:[%s6033_s12 + $0x58] sm:$0xf] (%p4623_p13)  ;;  %v3320_v57 = vld [vmem:[%s6033_s12 + $0x5c] sm:$0xf] (%p4623_p13) }
 0x466   : > { %3838 = vst [vmem:[%s6033_s12 + $0x68] sm:$0xff] %v3814_v13   ;;  %v3082_v22 = vmul.f32 %v3041_v16, %v6021_v8  ;;  %v3081_v3 = vmul.f32 %v3036_v37, %v6019_v28  ;;  %v3274_v28 = vld [vmem:[%s6033_s12] sm:$0xf] (%p4623_p13)  ;;  %v3276_v8 = vld [vmem:[%s6033_s12 + $0x4] sm:$0xf] (%p4623_p13) }
 0x467   : > { %3275 = vst [vmem:[%s6096_s10] sm:$0xf] (%p4623_p13), %v3274_v28  ;;  %3277 = vst [vmem:[%s6096_s10 + $0x8] sm:$0xf] (%p4623_p13), %v3276_v8 }
 0x468   : > { %v3819_v40 = vpack.c.bf16 %v3082_v22, %v3081_v3  ;;  %3251 = sbr.rel (!%p4623_p13) target bundleno = 1143 (0x477), region = 167  ;;  %3319 = vst [vmem:[%s6096_s10 + $0xb0] sm:$0xf] (%p4623_p13), %v3318_v35  ;;  %3321 = vst [vmem:[%s6096_s10 + $0xb8] sm:$0xf] (%p4623_p13), %v3320_v57 }
 0x469   : > { %v3051_v19 = vpop.permute.xlu0 %3050  ;;  %v3046_v42 = vpop.permute.xlu1 %3045  ;;  %v3322_v46 = vld [vmem:[%s6033_s12 + $0x60] sm:$0xf] (%p4623_p13)  ;;  %v3324_v48 = vld [vmem:[%s6033_s12 + $0x64] sm:$0xf] (%p4623_p13) }
 0x46a   : > { %3839 = vst [vmem:[%s6033_s12 + $0x70] sm:$0xff] %v3819_v40   ;;  %v3084_v7 = vmul.f32 %v3051_v19, %v2729_v0  ;;  %v3083_v29 = vmul.f32 %v3046_v42, %v6026_v30  ;;  %v3280_v30 = vld [vmem:[%s6033_s12 + $0xc] sm:$0xf] (%p4623_p13)  ;;  %3323 = vst [vmem:[%s6096_s10 + $0xc0] sm:$0xf] (%p4623_p13), %v3322_v46 }
 0x46b   : > { %3281 = vst [vmem:[%s6096_s10 + $0x18] sm:$0xf] (%p4623_p13), %v3280_v30  ;;  %3325 = vst [vmem:[%s6096_s10 + $0xc8] sm:$0xf] (%p4623_p13), %v3324_v48 }
 0x46c   : > { %v3824_v54 = vpack.c.bf16 %v3084_v7, %v3083_v29 }
 0x46d   : > { %v3326_v43 = vld [vmem:[%s6033_s12 + $0x68] sm:$0xf] (%p4623_p13)  ;;  %v3328_v45 = vld [vmem:[%s6033_s12 + $0x6c] sm:$0xf] (%p4623_p13) }
 0x46e   : > { %3840 = vst [vmem:[%s6033_s12 + $0x78] sm:$0xff] %v3824_v54   ;;  %3327 = vst [vmem:[%s6096_s10 + $0xd0] sm:$0xf] (%p4623_p13), %v3326_v43 }
 0x46f   : > { %3329 = vst [vmem:[%s6096_s10 + $0xd8] sm:$0xf] %v3328_v45 }
 0x471   : > { %v3330_v58 = vld [vmem:[%s6033_s12 + $0x70] sm:$0xf]  ;;  %v3332_v31 = vld [vmem:[%s6033_s12 + $0x74] sm:$0xf] }
 0x472   : > { %3331 = vst [vmem:[%s6096_s10 + $0xe0] sm:$0xf] %v3330_v58  ;;  %3333 = vst [vmem:[%s6096_s10 + $0xe8] sm:$0xf] %v3332_v31 }
 0x475   : > { %v3334_v6 = vld [vmem:[%s6033_s12 + $0x78] sm:$0xf]  ;;  %v3336_v5 = vld [vmem:[%s6033_s12 + $0x7c] sm:$0xf] }
 0x476   : > { %3335 = vst [vmem:[%s6096_s10 + $0xf0] sm:$0xf] %v3334_v6  ;;  %3337 = vst [vmem:[%s6096_s10 + $0xf8] sm:$0xf] %v3336_v5 }
 0x477 PF: > { %s13_s22 = sadd.s32 1, %s4485_s22   ;;  %s6461_s30 = sld [smem:[#allocation9_spill]] }
 0x478   : > { %p10_p4 = scmp.ge.s32.totalorder %s13_s22, 6   ;;  %s6462_s12 = smov %s4449_s13 }
 0x479   : > { %s6463_s13 = smov %s4628_s26  ;;  %s6464_s14 = smov %s4457_s15 }
 0x47a   : > { %s6465_s15 = smov %s4606_s28  ;;  %s6466_s16 = smov %s4465_s17 }
 0x47b   : > { %s6467_s17 = smov %s4603_s11  ;;  %s6468_s18 = smov %s4477_s20 }
 0x47c   : > { %s6469_s19 = smov %s4481_s21  ;;  %s6470_s20 = smov %s6473_s24 }
 0x47d   : > { %s6471_s21 = smov %s6461_s30  ;;  %12 = sbr.rel (!%p10_p4) target bundleno = 8 (0x8), region = 255 }

</bundles_post_ra>
